<compile_context>
chip_gen: v5e
topology: v5e:2x2
jax: 0.10.0
libtpu: 0.0.40
codegen_flags: <defaults>
</compile_context>

<pallas_src>
import math
from functools import partial

import jax
import jax.numpy as jnp
from jax.experimental import pallas as pl
from jax.experimental.pallas import tpu as pltpu

NEG_INF = -1e9
LN_EPS = 1e-5  # torch nn.LayerNorm default


# ----------------------------- in-kernel helpers ---------------------------- #

def _layer_norm_f32(y, gamma, beta):
    mean = jnp.mean(y, axis=-1, keepdims=True)
    var = jnp.mean((y - mean) ** 2, axis=-1, keepdims=True)
    return (y - mean) * jax.lax.rsqrt(var + LN_EPS) * gamma + beta


def _dot_t(a, b):
    # a [M, D], b [N, D] -> [M, N]; contract last dims (no materialized transpose)
    return jax.lax.dot_general(a, b, (((1,), (1,)), ((), ())),
                               preferred_element_type=jnp.float32)


def _multihead_attn(q_in_bf16, kv_in_bf16, bias, wq_ref, bq_ref, wk_ref, bk_ref,
                    wv_ref, bv_ref, wo_ref, nheads, d):
    """All heads of one attention sublayer, entirely in VMEM.

    q_in: [T, H] bf16, kv_in: [S, H] bf16, bias: f32 additive, broadcastable to [T, S].
    Per-head weights are stacked on dim 0 (leading-dim ref indexing only).
    Returns f32 [T, H] (sum of per-head output projections).
    """
    scale = 1.0 / math.sqrt(d)
    out = None
    for h in range(nheads):
        q_h = jnp.dot(q_in_bf16, wq_ref[h],
                      preferred_element_type=jnp.float32) + bq_ref[h]
        k_h = jnp.dot(kv_in_bf16, wk_ref[h],
                      preferred_element_type=jnp.float32) + bk_ref[h]
        v_h = jnp.dot(kv_in_bf16, wv_ref[h],
                      preferred_element_type=jnp.float32) + bv_ref[h]
        s = _dot_t(q_h.astype(jnp.bfloat16), k_h.astype(jnp.bfloat16)) * scale + bias
        m = jnp.max(s, axis=-1, keepdims=True)
        p = jnp.exp(s - m)
        p = p * pl.reciprocal(jnp.sum(p, axis=-1, keepdims=True), approx=True)
        ctx_h = jnp.dot(p.astype(jnp.bfloat16), v_h.astype(jnp.bfloat16),
                        preferred_element_type=jnp.float32)
        proj = jnp.dot(ctx_h.astype(jnp.bfloat16), wo_ref[h],
                       preferred_element_type=jnp.float32)
        out = proj if out is None else out + proj
    return out


# ----------------------------- Pallas kernels ------------------------------- #

def _self_attn_ln_kernel(x_ref, wq_ref, bq_ref, wk_ref, bk_ref, wv_ref, bv_ref,
                         wo_ref, bo_ref, g_ref, beta_ref, o_ref, *, nheads):
    x = x_ref[0]                                   # [T, H] f32
    T, H = x.shape
    d = H // nheads
    xb = x.astype(jnp.bfloat16)

    # causal additive mask built in-kernel (no HBM bias tensor, pure VPU work)
    row = jax.lax.broadcasted_iota(jnp.int32, (T, T), 0)
    col = jax.lax.broadcasted_iota(jnp.int32, (T, T), 1)
    causal = jnp.where(row >= col, 0.0, NEG_INF).astype(jnp.float32)

    attn = _multihead_attn(xb, xb, causal, wq_ref, bq_ref, wk_ref, bk_ref,
                           wv_ref, bv_ref, wo_ref, nheads, d)
    y = attn + bo_ref[...] + x                     # out-proj bias + residual
    o_ref[0] = _layer_norm_f32(y, g_ref[...], beta_ref[...])


def _enc_attn_ln_kernel(x_ref, enc_ref, ebias_ref, wq_ref, bq_ref, wk_ref, bk_ref,
                        wv_ref, bv_ref, wo_ref, bo_ref, g_ref, beta_ref, o_ref,
                        *, nheads):
    x = x_ref[0]                                   # [T, H] f32
    enc = enc_ref[0]                               # [S, H] bf16
    ebias = ebias_ref[0]                           # [1, S] f32 additive mask
    T, H = x.shape
    d = H // nheads
    xb = x.astype(jnp.bfloat16)

    attn = _multihead_attn(xb, enc, ebias, wq_ref, bq_ref, wk_ref, bk_ref,
                           wv_ref, bv_ref, wo_ref, nheads, d)
    y = attn + bo_ref[...] + x
    o_ref[0] = _layer_norm_f32(y, g_ref[...], beta_ref[...])


def _ffn_ln_kernel(x_ref, w1_ref, b1_ref, w2_ref, b2_ref, g_ref, beta_ref, o_ref):
    x = x_ref[...]                                 # [TM, H] f32
    h = jnp.dot(x.astype(jnp.bfloat16), w1_ref[...],
                preferred_element_type=jnp.float32) + b1_ref[...]
    h = jnp.maximum(h, 0.0)                        # ReLU
    y = jnp.dot(h.astype(jnp.bfloat16), w2_ref[...],
                preferred_element_type=jnp.float32) + b2_ref[...]
    y = y + x                                      # residual
    o_ref[...] = _layer_norm_f32(y, g_ref[...], beta_ref[...])


# ------------------------------ pallas wrappers ----------------------------- #

def _wspec(shape):
    zeros = (0,) * len(shape)
    return pl.BlockSpec(shape, lambda i: zeros)    # weights stay resident


def _attn_weight_specs(H, nheads):
    d = H // nheads
    return [
        _wspec((nheads, H, d)), _wspec((nheads, 1, d)),   # wq, bq
        _wspec((nheads, H, d)), _wspec((nheads, 1, d)),   # wk, bk
        _wspec((nheads, H, d)), _wspec((nheads, 1, d)),   # wv, bv
        _wspec((nheads, d, H)), _wspec((1, H)),           # wo, bo
        _wspec((1, H)), _wspec((1, H)),                   # ln gamma, beta
    ]


def self_attn_ln(x, p, nheads):
    B, T, H = x.shape
    return pl.pallas_call(
        partial(_self_attn_ln_kernel, nheads=nheads),
        grid=(B,),
        in_specs=[pl.BlockSpec((1, T, H), lambda i: (i, 0, 0))]
                 + _attn_weight_specs(H, nheads),
        out_specs=pl.BlockSpec((1, T, H), lambda i: (i, 0, 0)),
        out_shape=jax.ShapeDtypeStruct((B, T, H), jnp.float32),
        compiler_params=pltpu.CompilerParams(dimension_semantics=("parallel",)),
    )(x, p["wq"], p["bq"], p["wk"], p["bk"], p["wv"], p["bv"],
      p["wo"], p["bo"], p["ln_g"], p["ln_b"])


def enc_attn_ln(x, enc_bf16, enc_bias, p, nheads):
    B, T, H = x.shape
    S = enc_bf16.shape[1]
    return pl.pallas_call(
        partial(_enc_attn_ln_kernel, nheads=nheads),
        grid=(B,),
        in_specs=[pl.BlockSpec((1, T, H), lambda i: (i, 0, 0)),
                  pl.BlockSpec((1, S, H), lambda i: (i, 0, 0)),
                  pl.BlockSpec((1, 1, S), lambda i: (i, 0, 0))]
                 + _attn_weight_specs(H, nheads),
        out_specs=pl.BlockSpec((1, T, H), lambda i: (i, 0, 0)),
        out_shape=jax.ShapeDtypeStruct((B, T, H), jnp.float32),
        compiler_params=pltpu.CompilerParams(dimension_semantics=("parallel",)),
    )(x, enc_bf16, enc_bias, p["wq"], p["bq"], p["wk"], p["bk"], p["wv"], p["bv"],
      p["wo"], p["bo"], p["ln_g"], p["ln_b"])


def _row_tile(M, target=512):
    if M <= target:
        return M
    t = target - (target % 8)
    while t >= 8:
        if M % t == 0:
            return t
        t -= 8
    return M


def ffn_ln(x2d, p):
    M, H = x2d.shape
    F = p["w1"].shape[1]
    TM = _row_tile(M)
    return pl.pallas_call(
        _ffn_ln_kernel,
        grid=(M // TM,),
        in_specs=[pl.BlockSpec((TM, H), lambda i: (i, 0)),
                  _wspec((H, F)), _wspec((1, F)),
                  _wspec((F, H)), _wspec((1, H)),
                  _wspec((1, H)), _wspec((1, H))],
        out_specs=pl.BlockSpec((TM, H), lambda i: (i, 0)),
        out_shape=jax.ShapeDtypeStruct((M, H), jnp.float32),
        compiler_params=pltpu.CompilerParams(dimension_semantics=("parallel",)),
    )(x2d, p["w1"], p["b1"], p["w2"], p["b2"], p["ln_g"], p["ln_b"])


# ------------------------------- model pieces -------------------------------- #

def transformer_decoder(tokens, encoder_output, encoder_mask, params, nheads):
    B, T = tokens.shape
    H = params["emb"].shape[1]

    # embedding + sqrt(H) scale + learned positional embedding (plain-JAX glue)
    x = params["emb"][tokens] * jnp.float32(math.sqrt(H))
    x = x + params["pos"][:T][None, :, :]

    # encoder tensors are reused every layer: cast to bf16 once, build additive
    # padding bias once (tiny [B, 1, S] instead of a [B, 1, T, S] tensor).
    enc_bf16 = encoder_output.astype(jnp.bfloat16)
    enc_bias = jnp.where(encoder_mask > 0, 0.0, NEG_INF).astype(jnp.float32)[:, None, :]

    for lp in params["layers"]:
        x = self_attn_ln(x, lp["self"], nheads)                  # attn+res+LN fused
        x = enc_attn_ln(x, enc_bf16, enc_bias, lp["enc"], nheads)
        x = ffn_ln(x.reshape(B * T, H), lp["ffn"]).reshape(B, T, H)
    return x


def context_knowledge_decoder(inp, encoder_state, params, nheads, incr_state=None):
    """Forward of ContextKnowledgeDecoder: unpack encoder_state, run decoder."""
    encoder_output, encoder_mask, _ = encoder_state
    hidden = transformer_decoder(inp, encoder_output, encoder_mask, params, nheads)
    # TODO(synk): incremental decoding state (incr_state) is not modeled; passthrough.
    return hidden, incr_state


# -------------------------------- param init --------------------------------- #

def make_params(key, vocab, n_pos, H, F, n_layers, nheads):
    d = H // nheads

    def nrm(k, shape, dtype=jnp.float32):
        return (0.02 * jax.random.normal(k, shape, jnp.float32)).astype(dtype)

    keys = jax.random.split(key, 2 + n_layers)
    params = {"emb": nrm(keys[0], (vocab, H)), "pos": nrm(keys[1], (n_pos, H))}

    def attn_block(ks):
        return {
            "wq": nrm(ks[0], (nheads, H, d), jnp.bfloat16),
            "bq": jnp.zeros((nheads, 1, d), jnp.float32),
            "wk": nrm(ks[1], (nheads, H, d), jnp.bfloat16),
            "bk": jnp.zeros((nheads, 1, d), jnp.float32),
            "wv": nrm(ks[2], (nheads, H, d), jnp.bfloat16),
            "bv": jnp.zeros((nheads, 1, d), jnp.float32),
            "wo": nrm(ks[3], (nheads, d, H), jnp.bfloat16),
            "bo": jnp.zeros((1, H), jnp.float32),
            "ln_g": jnp.ones((1, H), jnp.float32),
            "ln_b": jnp.zeros((1, H), jnp.float32),
        }

    layers = []
    for li in range(n_layers):
        lk = jax.random.split(keys[2 + li], 10)
        layers.append({
            "self": attn_block(lk[0:4]),
            "enc": attn_block(lk[4:8]),
            "ffn": {
                "w1": nrm(lk[8], (H, F), jnp.bfloat16),
                "b1": jnp.zeros((1, F), jnp.float32),
                "w2": nrm(lk[9], (F, H), jnp.bfloat16),
                "b2": jnp.zeros((1, H), jnp.float32),
                "ln_g": jnp.ones((1, H), jnp.float32),
                "ln_b": jnp.zeros((1, H), jnp.float32),
            },
        })
    params["layers"] = layers
    return params


# ----------------------------------- main ------------------------------------ #

if __name__ == "__main__":
    B, T, S = 2, 8, 16          # batch, decoder len, encoder len
    H, NH, F = 32, 4, 64        # hidden, heads, ffn size
    VOCAB, NPOS, NLAYERS = 50, 32, 2

    root = jax.random.PRNGKey(0)
    k_tok, k_enc, k_par = jax.random.split(root, 3)

    tokens = jax.random.randint(k_tok, (B, T), 0, VOCAB, dtype=jnp.int32)
    encoder_output = jax.random.normal(k_enc, (B, S, H), dtype=jnp.float32)
    # mask out the tail of the second sequence to exercise encoder masking
    encoder_mask = jnp.ones((B, S), dtype=jnp.int32)
    encoder_mask = encoder_mask.at[1, 10:].set(0)
    encoder_state = (encoder_output, encoder_mask, None)

    params = make_params(k_par, VOCAB, NPOS, H, F, NLAYERS, NH)

    fwd = jax.jit(partial(context_knowledge_decoder, nheads=NH))
    hidden, incr_state = fwd(tokens, encoder_state, params)
    jax.block_until_ready(hidden)

    assert hidden.shape == (B, T, H)
    assert bool(jnp.all(jnp.isfinite(hidden)))
    print("KERNEL_OK")
</pallas_src>

<mosaic_0001>
module attributes {stable_mosaic.version = 11 : i64} {
  func.func @_enc_attn_ln_kernel(%arg0: i32, %arg1: memref<1x8x32xf32, #tpu.memory_space<vmem>>, %arg2: memref<1x16x32xbf16, #tpu.memory_space<vmem>>, %arg3: memref<1x1x16xf32, #tpu.memory_space<vmem>>, %arg4: memref<4x32x8xbf16, #tpu.memory_space<vmem>>, %arg5: memref<4x1x8xf32, #tpu.memory_space<vmem>>, %arg6: memref<4x32x8xbf16, #tpu.memory_space<vmem>>, %arg7: memref<4x1x8xf32, #tpu.memory_space<vmem>>, %arg8: memref<4x32x8xbf16, #tpu.memory_space<vmem>>, %arg9: memref<4x1x8xf32, #tpu.memory_space<vmem>>, %arg10: memref<4x8x32xbf16, #tpu.memory_space<vmem>>, %arg11: memref<1x32xf32, #tpu.memory_space<vmem>>, %arg12: memref<1x32xf32, #tpu.memory_space<vmem>>, %arg13: memref<1x32xf32, #tpu.memory_space<vmem>>, %arg14: memref<1x8x32xf32, #tpu.memory_space<vmem>>) attributes {dimension_semantics = [#tpu.dimension_semantics<parallel>], iteration_bounds = array<i64: 2>, scalar_prefetch = 0 : i64, scratch_operands = 0 : i64, tpu.core_type = #tpu.core_type<tc>, window_params = [{transform_indices = @transform_0, window_bounds = array<i64: 1, 8, 32>}, {transform_indices = @transform_1, window_bounds = array<i64: 1, 16, 32>}, {transform_indices = @transform_2, window_bounds = array<i64: 1, 1, 16>}, {pipeline_mode = #tpu.pipeline_mode<synchronous>, transform_indices = @transform_3, window_bounds = array<i64: 4, 32, 8>}, {pipeline_mode = #tpu.pipeline_mode<synchronous>, transform_indices = @transform_4, window_bounds = array<i64: 4, 1, 8>}, {pipeline_mode = #tpu.pipeline_mode<synchronous>, transform_indices = @transform_5, window_bounds = array<i64: 4, 32, 8>}, {pipeline_mode = #tpu.pipeline_mode<synchronous>, transform_indices = @transform_6, window_bounds = array<i64: 4, 1, 8>}, {pipeline_mode = #tpu.pipeline_mode<synchronous>, transform_indices = @transform_7, window_bounds = array<i64: 4, 32, 8>}, {pipeline_mode = #tpu.pipeline_mode<synchronous>, transform_indices = @transform_8, window_bounds = array<i64: 4, 1, 8>}, {pipeline_mode = #tpu.pipeline_mode<synchronous>, transform_indices = @transform_9, window_bounds = array<i64: 4, 8, 32>}, {pipeline_mode = #tpu.pipeline_mode<synchronous>, transform_indices = @transform_10, window_bounds = array<i64: 1, 32>}, {pipeline_mode = #tpu.pipeline_mode<synchronous>, transform_indices = @transform_11, window_bounds = array<i64: 1, 32>}, {pipeline_mode = #tpu.pipeline_mode<synchronous>, transform_indices = @transform_12, window_bounds = array<i64: 1, 32>}, {transform_indices = @transform_13, window_bounds = array<i64: 1, 8, 32>}]} {
    %c0 = arith.constant 0 : index
    %c0_0 = arith.constant 0 : index
    %c0_1 = arith.constant 0 : index
    %0 = vector.load %arg1[%c0, %c0_0, %c0_1] : memref<1x8x32xf32, #tpu.memory_space<vmem>>, vector<1x8x32xf32>
    %1 = vector.shape_cast %0 : vector<1x8x32xf32> to vector<8x32xf32>
    %c0_2 = arith.constant 0 : index
    %c0_3 = arith.constant 0 : index
    %c0_4 = arith.constant 0 : index
    %2 = vector.load %arg2[%c0_2, %c0_3, %c0_4] : memref<1x16x32xbf16, #tpu.memory_space<vmem>>, vector<1x16x32xbf16>
    %3 = vector.shape_cast %2 : vector<1x16x32xbf16> to vector<16x32xbf16>
    %c0_5 = arith.constant 0 : index
    %c0_6 = arith.constant 0 : index
    %c0_7 = arith.constant 0 : index
    %4 = vector.load %arg3[%c0_5, %c0_6, %c0_7] : memref<1x1x16xf32, #tpu.memory_space<vmem>>, vector<1x1x16xf32>
    %5 = vector.shape_cast %4 : vector<1x1x16xf32> to vector<1x16xf32>
    %6 = arith.truncf %1 : vector<8x32xf32> to vector<8x32xbf16>
    %c0_8 = arith.constant 0 : index
    %c0_9 = arith.constant 0 : index
    %c0_10 = arith.constant 0 : index
    %7 = vector.load %arg4[%c0_8, %c0_9, %c0_10] : memref<4x32x8xbf16, #tpu.memory_space<vmem>>, vector<1x32x8xbf16>
    %8 = vector.shape_cast %7 : vector<1x32x8xbf16> to vector<32x8xbf16>
    %cst = arith.constant dense<0.000000e+00> : vector<8x8xf32>
    %9 = tpu.matmul %6, %8, %cst {dimension_numbers = #tpu.dot_dimension_numbers<[1], [0], [0], [1], [0, 0, 1, 1], [], []>} : vector<8x32xbf16>, vector<32x8xbf16>, vector<8x8xf32> -> vector<8x8xf32>
    %c0_11 = arith.constant 0 : index
    %c0_12 = arith.constant 0 : index
    %c0_13 = arith.constant 0 : index
    %10 = vector.load %arg5[%c0_11, %c0_12, %c0_13] : memref<4x1x8xf32, #tpu.memory_space<vmem>>, vector<1x1x8xf32>
    %11 = vector.shape_cast %10 : vector<1x1x8xf32> to vector<1x8xf32>
    %12 = vector.broadcast %11 : vector<1x8xf32> to vector<8x8xf32>
    %13 = arith.addf %9, %12 : vector<8x8xf32>
    %c0_14 = arith.constant 0 : index
    %c0_15 = arith.constant 0 : index
    %c0_16 = arith.constant 0 : index
    %14 = vector.load %arg6[%c0_14, %c0_15, %c0_16] : memref<4x32x8xbf16, #tpu.memory_space<vmem>>, vector<1x32x8xbf16>
    %15 = vector.shape_cast %14 : vector<1x32x8xbf16> to vector<32x8xbf16>
    %cst_17 = arith.constant dense<0.000000e+00> : vector<16x8xf32>
    %16 = tpu.matmul %3, %15, %cst_17 {dimension_numbers = #tpu.dot_dimension_numbers<[1], [0], [0], [1], [0, 0, 1, 1], [], []>} : vector<16x32xbf16>, vector<32x8xbf16>, vector<16x8xf32> -> vector<16x8xf32>
    %c0_18 = arith.constant 0 : index
    %c0_19 = arith.constant 0 : index
    %c0_20 = arith.constant 0 : index
    %17 = vector.load %arg7[%c0_18, %c0_19, %c0_20] : memref<4x1x8xf32, #tpu.memory_space<vmem>>, vector<1x1x8xf32>
    %18 = vector.shape_cast %17 : vector<1x1x8xf32> to vector<1x8xf32>
    %19 = vector.broadcast %18 : vector<1x8xf32> to vector<16x8xf32>
    %20 = arith.addf %16, %19 : vector<16x8xf32>
    %c0_21 = arith.constant 0 : index
    %c0_22 = arith.constant 0 : index
    %c0_23 = arith.constant 0 : index
    %21 = vector.load %arg8[%c0_21, %c0_22, %c0_23] : memref<4x32x8xbf16, #tpu.memory_space<vmem>>, vector<1x32x8xbf16>
    %22 = vector.shape_cast %21 : vector<1x32x8xbf16> to vector<32x8xbf16>
    %cst_24 = arith.constant dense<0.000000e+00> : vector<16x8xf32>
    %23 = tpu.matmul %3, %22, %cst_24 {dimension_numbers = #tpu.dot_dimension_numbers<[1], [0], [0], [1], [0, 0, 1, 1], [], []>} : vector<16x32xbf16>, vector<32x8xbf16>, vector<16x8xf32> -> vector<16x8xf32>
    %c0_25 = arith.constant 0 : index
    %c0_26 = arith.constant 0 : index
    %c0_27 = arith.constant 0 : index
    %24 = vector.load %arg9[%c0_25, %c0_26, %c0_27] : memref<4x1x8xf32, #tpu.memory_space<vmem>>, vector<1x1x8xf32>
    %25 = vector.shape_cast %24 : vector<1x1x8xf32> to vector<1x8xf32>
    %26 = vector.broadcast %25 : vector<1x8xf32> to vector<16x8xf32>
    %27 = arith.addf %23, %26 : vector<16x8xf32>
    %28 = arith.truncf %13 : vector<8x8xf32> to vector<8x8xbf16>
    %29 = arith.truncf %20 : vector<16x8xf32> to vector<16x8xbf16>
    %cst_28 = arith.constant dense<0.000000e+00> : vector<8x16xf32>
    %30 = tpu.matmul %28, %29, %cst_28 {dimension_numbers = #tpu.dot_dimension_numbers<[1], [1], [0], [0], [0, 0, 1, 0], [], []>} : vector<8x8xbf16>, vector<16x8xbf16>, vector<8x16xf32> -> vector<8x16xf32>
    %cst_29 = arith.constant 0.353553385 : f32
    %31 = vector.broadcast %cst_29 : f32 to vector<8x16xf32>
    %32 = arith.mulf %30, %31 : vector<8x16xf32>
    %33 = vector.broadcast %5 : vector<1x16xf32> to vector<8x16xf32>
    %34 = arith.addf %32, %33 : vector<8x16xf32>
    %cst_30 = arith.constant dense<0xFF800000> : vector<8xf32>
    %35 = vector.multi_reduction <maximumf>, %34, %cst_30 [1] : vector<8x16xf32> to vector<8xf32>
    %36 = vector.shape_cast %35 : vector<8xf32> to vector<8x1xf32>
    %37 = vector.broadcast %36 : vector<8x1xf32> to vector<8x16xf32>
    %38 = arith.subf %34, %37 : vector<8x16xf32>
    %39 = math.exp %38 : vector<8x16xf32>
    %cst_31 = arith.constant dense<0.000000e+00> : vector<8xf32>
    %40 = vector.multi_reduction <add>, %39, %cst_31 [1] : vector<8x16xf32> to vector<8xf32>
    %41 = vector.shape_cast %40 : vector<8xf32> to vector<8x1xf32>
    %42 = tpu.reciprocal %41 {approx = true} : vector<8x1xf32> -> vector<8x1xf32>
    %43 = vector.broadcast %42 : vector<8x1xf32> to vector<8x16xf32>
    %44 = arith.mulf %39, %43 : vector<8x16xf32>
    %45 = arith.truncf %44 : vector<8x16xf32> to vector<8x16xbf16>
    %46 = arith.truncf %27 : vector<16x8xf32> to vector<16x8xbf16>
    %cst_32 = arith.constant dense<0.000000e+00> : vector<8x8xf32>
    %47 = tpu.matmul %45, %46, %cst_32 {dimension_numbers = #tpu.dot_dimension_numbers<[1], [0], [0], [1], [0, 0, 1, 1], [], []>} : vector<8x16xbf16>, vector<16x8xbf16>, vector<8x8xf32> -> vector<8x8xf32>
    %48 = arith.truncf %47 : vector<8x8xf32> to vector<8x8xbf16>
    %c0_33 = arith.constant 0 : index
    %c0_34 = arith.constant 0 : index
    %c0_35 = arith.constant 0 : index
    %49 = vector.load %arg10[%c0_33, %c0_34, %c0_35] : memref<4x8x32xbf16, #tpu.memory_space<vmem>>, vector<1x8x32xbf16>
    %50 = vector.shape_cast %49 : vector<1x8x32xbf16> to vector<8x32xbf16>
    %cst_36 = arith.constant dense<0.000000e+00> : vector<8x32xf32>
    %51 = tpu.matmul %48, %50, %cst_36 {dimension_numbers = #tpu.dot_dimension_numbers<[1], [0], [0], [1], [0, 0, 1, 1], [], []>} : vector<8x8xbf16>, vector<8x32xbf16>, vector<8x32xf32> -> vector<8x32xf32>
    %c1 = arith.constant 1 : index
    %c0_37 = arith.constant 0 : index
    %c0_38 = arith.constant 0 : index
    %52 = vector.load %arg4[%c1, %c0_37, %c0_38] : memref<4x32x8xbf16, #tpu.memory_space<vmem>>, vector<1x32x8xbf16>
    %53 = vector.shape_cast %52 : vector<1x32x8xbf16> to vector<32x8xbf16>
    %cst_39 = arith.constant dense<0.000000e+00> : vector<8x8xf32>
    %54 = tpu.matmul %6, %53, %cst_39 {dimension_numbers = #tpu.dot_dimension_numbers<[1], [0], [0], [1], [0, 0, 1, 1], [], []>} : vector<8x32xbf16>, vector<32x8xbf16>, vector<8x8xf32> -> vector<8x8xf32>
    %c1_40 = arith.constant 1 : index
    %c0_41 = arith.constant 0 : index
    %c0_42 = arith.constant 0 : index
    %55 = vector.load %arg5[%c1_40, %c0_41, %c0_42] : memref<4x1x8xf32, #tpu.memory_space<vmem>>, vector<1x1x8xf32>
    %56 = vector.shape_cast %55 : vector<1x1x8xf32> to vector<1x8xf32>
    %57 = vector.broadcast %56 : vector<1x8xf32> to vector<8x8xf32>
    %58 = arith.addf %54, %57 : vector<8x8xf32>
    %c1_43 = arith.constant 1 : index
    %c0_44 = arith.constant 0 : index
    %c0_45 = arith.constant 0 : index
    %59 = vector.load %arg6[%c1_43, %c0_44, %c0_45] : memref<4x32x8xbf16, #tpu.memory_space<vmem>>, vector<1x32x8xbf16>
    %60 = vector.shape_cast %59 : vector<1x32x8xbf16> to vector<32x8xbf16>
    %cst_46 = arith.constant dense<0.000000e+00> : vector<16x8xf32>
    %61 = tpu.matmul %3, %60, %cst_46 {dimension_numbers = #tpu.dot_dimension_numbers<[1], [0], [0], [1], [0, 0, 1, 1], [], []>} : vector<16x32xbf16>, vector<32x8xbf16>, vector<16x8xf32> -> vector<16x8xf32>
    %c1_47 = arith.constant 1 : index
    %c0_48 = arith.constant 0 : index
    %c0_49 = arith.constant 0 : index
    %62 = vector.load %arg7[%c1_47, %c0_48, %c0_49] : memref<4x1x8xf32, #tpu.memory_space<vmem>>, vector<1x1x8xf32>
    %63 = vector.shape_cast %62 : vector<1x1x8xf32> to vector<1x8xf32>
    %64 = vector.broadcast %63 : vector<1x8xf32> to vector<16x8xf32>
    %65 = arith.addf %61, %64 : vector<16x8xf32>
    %c1_50 = arith.constant 1 : index
    %c0_51 = arith.constant 0 : index
    %c0_52 = arith.constant 0 : index
    %66 = vector.load %arg8[%c1_50, %c0_51, %c0_52] : memref<4x32x8xbf16, #tpu.memory_space<vmem>>, vector<1x32x8xbf16>
    %67 = vector.shape_cast %66 : vector<1x32x8xbf16> to vector<32x8xbf16>
    %cst_53 = arith.constant dense<0.000000e+00> : vector<16x8xf32>
    %68 = tpu.matmul %3, %67, %cst_53 {dimension_numbers = #tpu.dot_dimension_numbers<[1], [0], [0], [1], [0, 0, 1, 1], [], []>} : vector<16x32xbf16>, vector<32x8xbf16>, vector<16x8xf32> -> vector<16x8xf32>
    %c1_54 = arith.constant 1 : index
    %c0_55 = arith.constant 0 : index
    %c0_56 = arith.constant 0 : index
    %69 = vector.load %arg9[%c1_54, %c0_55, %c0_56] : memref<4x1x8xf32, #tpu.memory_space<vmem>>, vector<1x1x8xf32>
    %70 = vector.shape_cast %69 : vector<1x1x8xf32> to vector<1x8xf32>
    %71 = vector.broadcast %70 : vector<1x8xf32> to vector<16x8xf32>
    %72 = arith.addf %68, %71 : vector<16x8xf32>
    %73 = arith.truncf %58 : vector<8x8xf32> to vector<8x8xbf16>
    %74 = arith.truncf %65 : vector<16x8xf32> to vector<16x8xbf16>
    %cst_57 = arith.constant dense<0.000000e+00> : vector<8x16xf32>
    %75 = tpu.matmul %73, %74, %cst_57 {dimension_numbers = #tpu.dot_dimension_numbers<[1], [1], [0], [0], [0, 0, 1, 0], [], []>} : vector<8x8xbf16>, vector<16x8xbf16>, vector<8x16xf32> -> vector<8x16xf32>
    %cst_58 = arith.constant 0.353553385 : f32
    %76 = vector.broadcast %cst_58 : f32 to vector<8x16xf32>
    %77 = arith.mulf %75, %76 : vector<8x16xf32>
    %78 = vector.broadcast %5 : vector<1x16xf32> to vector<8x16xf32>
    %79 = arith.addf %77, %78 : vector<8x16xf32>
    %cst_59 = arith.constant dense<0xFF800000> : vector<8xf32>
    %80 = vector.multi_reduction <maximumf>, %79, %cst_59 [1] : vector<8x16xf32> to vector<8xf32>
    %81 = vector.shape_cast %80 : vector<8xf32> to vector<8x1xf32>
    %82 = vector.broadcast %81 : vector<8x1xf32> to vector<8x16xf32>
    %83 = arith.subf %79, %82 : vector<8x16xf32>
    %84 = math.exp %83 : vector<8x16xf32>
    %cst_60 = arith.constant dense<0.000000e+00> : vector<8xf32>
    %85 = vector.multi_reduction <add>, %84, %cst_60 [1] : vector<8x16xf32> to vector<8xf32>
    %86 = vector.shape_cast %85 : vector<8xf32> to vector<8x1xf32>
    %87 = tpu.reciprocal %86 {approx = true} : vector<8x1xf32> -> vector<8x1xf32>
    %88 = vector.broadcast %87 : vector<8x1xf32> to vector<8x16xf32>
    %89 = arith.mulf %84, %88 : vector<8x16xf32>
    %90 = arith.truncf %89 : vector<8x16xf32> to vector<8x16xbf16>
    %91 = arith.truncf %72 : vector<16x8xf32> to vector<16x8xbf16>
    %cst_61 = arith.constant dense<0.000000e+00> : vector<8x8xf32>
    %92 = tpu.matmul %90, %91, %cst_61 {dimension_numbers = #tpu.dot_dimension_numbers<[1], [0], [0], [1], [0, 0, 1, 1], [], []>} : vector<8x16xbf16>, vector<16x8xbf16>, vector<8x8xf32> -> vector<8x8xf32>
    %93 = arith.truncf %92 : vector<8x8xf32> to vector<8x8xbf16>
    %c1_62 = arith.constant 1 : index
    %c0_63 = arith.constant 0 : index
    %c0_64 = arith.constant 0 : index
    %94 = vector.load %arg10[%c1_62, %c0_63, %c0_64] : memref<4x8x32xbf16, #tpu.memory_space<vmem>>, vector<1x8x32xbf16>
    %95 = vector.shape_cast %94 : vector<1x8x32xbf16> to vector<8x32xbf16>
    %cst_65 = arith.constant dense<0.000000e+00> : vector<8x32xf32>
    %96 = tpu.matmul %93, %95, %cst_65 {dimension_numbers = #tpu.dot_dimension_numbers<[1], [0], [0], [1], [0, 0, 1, 1], [], []>} : vector<8x8xbf16>, vector<8x32xbf16>, vector<8x32xf32> -> vector<8x32xf32>
    %97 = arith.addf %51, %96 : vector<8x32xf32>
    %c2 = arith.constant 2 : index
    %c0_66 = arith.constant 0 : index
    %c0_67 = arith.constant 0 : index
    %98 = vector.load %arg4[%c2, %c0_66, %c0_67] : memref<4x32x8xbf16, #tpu.memory_space<vmem>>, vector<1x32x8xbf16>
    %99 = vector.shape_cast %98 : vector<1x32x8xbf16> to vector<32x8xbf16>
    %cst_68 = arith.constant dense<0.000000e+00> : vector<8x8xf32>
    %100 = tpu.matmul %6, %99, %cst_68 {dimension_numbers = #tpu.dot_dimension_numbers<[1], [0], [0], [1], [0, 0, 1, 1], [], []>} : vector<8x32xbf16>, vector<32x8xbf16>, vector<8x8xf32> -> vector<8x8xf32>
    %c2_69 = arith.constant 2 : index
    %c0_70 = arith.constant 0 : index
    %c0_71 = arith.constant 0 : index
    %101 = vector.load %arg5[%c2_69, %c0_70, %c0_71] : memref<4x1x8xf32, #tpu.memory_space<vmem>>, vector<1x1x8xf32>
    %102 = vector.shape_cast %101 : vector<1x1x8xf32> to vector<1x8xf32>
    %103 = vector.broadcast %102 : vector<1x8xf32> to vector<8x8xf32>
    %104 = arith.addf %100, %103 : vector<8x8xf32>
    %c2_72 = arith.constant 2 : index
    %c0_73 = arith.constant 0 : index
    %c0_74 = arith.constant 0 : index
    %105 = vector.load %arg6[%c2_72, %c0_73, %c0_74] : memref<4x32x8xbf16, #tpu.memory_space<vmem>>, vector<1x32x8xbf16>
    %106 = vector.shape_cast %105 : vector<1x32x8xbf16> to vector<32x8xbf16>
    %cst_75 = arith.constant dense<0.000000e+00> : vector<16x8xf32>
    %107 = tpu.matmul %3, %106, %cst_75 {dimension_numbers = #tpu.dot_dimension_numbers<[1], [0], [0], [1], [0, 0, 1, 1], [], []>} : vector<16x32xbf16>, vector<32x8xbf16>, vector<16x8xf32> -> vector<16x8xf32>
    %c2_76 = arith.constant 2 : index
    %c0_77 = arith.constant 0 : index
    %c0_78 = arith.constant 0 : index
    %108 = vector.load %arg7[%c2_76, %c0_77, %c0_78] : memref<4x1x8xf32, #tpu.memory_space<vmem>>, vector<1x1x8xf32>
    %109 = vector.shape_cast %108 : vector<1x1x8xf32> to vector<1x8xf32>
    %110 = vector.broadcast %109 : vector<1x8xf32> to vector<16x8xf32>
    %111 = arith.addf %107, %110 : vector<16x8xf32>
    %c2_79 = arith.constant 2 : index
    %c0_80 = arith.constant 0 : index
    %c0_81 = arith.constant 0 : index
    %112 = vector.load %arg8[%c2_79, %c0_80, %c0_81] : memref<4x32x8xbf16, #tpu.memory_space<vmem>>, vector<1x32x8xbf16>
    %113 = vector.shape_cast %112 : vector<1x32x8xbf16> to vector<32x8xbf16>
    %cst_82 = arith.constant dense<0.000000e+00> : vector<16x8xf32>
    %114 = tpu.matmul %3, %113, %cst_82 {dimension_numbers = #tpu.dot_dimension_numbers<[1], [0], [0], [1], [0, 0, 1, 1], [], []>} : vector<16x32xbf16>, vector<32x8xbf16>, vector<16x8xf32> -> vector<16x8xf32>
    %c2_83 = arith.constant 2 : index
    %c0_84 = arith.constant 0 : index
    %c0_85 = arith.constant 0 : index
    %115 = vector.load %arg9[%c2_83, %c0_84, %c0_85] : memref<4x1x8xf32, #tpu.memory_space<vmem>>, vector<1x1x8xf32>
    %116 = vector.shape_cast %115 : vector<1x1x8xf32> to vector<1x8xf32>
    %117 = vector.broadcast %116 : vector<1x8xf32> to vector<16x8xf32>
    %118 = arith.addf %114, %117 : vector<16x8xf32>
    %119 = arith.truncf %104 : vector<8x8xf32> to vector<8x8xbf16>
    %120 = arith.truncf %111 : vector<16x8xf32> to vector<16x8xbf16>
    %cst_86 = arith.constant dense<0.000000e+00> : vector<8x16xf32>
    %121 = tpu.matmul %119, %120, %cst_86 {dimension_numbers = #tpu.dot_dimension_numbers<[1], [1], [0], [0], [0, 0, 1, 0], [], []>} : vector<8x8xbf16>, vector<16x8xbf16>, vector<8x16xf32> -> vector<8x16xf32>
    %cst_87 = arith.constant 0.353553385 : f32
    %122 = vector.broadcast %cst_87 : f32 to vector<8x16xf32>
    %123 = arith.mulf %121, %122 : vector<8x16xf32>
    %124 = vector.broadcast %5 : vector<1x16xf32> to vector<8x16xf32>
    %125 = arith.addf %123, %124 : vector<8x16xf32>
    %cst_88 = arith.constant dense<0xFF800000> : vector<8xf32>
    %126 = vector.multi_reduction <maximumf>, %125, %cst_88 [1] : vector<8x16xf32> to vector<8xf32>
    %127 = vector.shape_cast %126 : vector<8xf32> to vector<8x1xf32>
    %128 = vector.broadcast %127 : vector<8x1xf32> to vector<8x16xf32>
    %129 = arith.subf %125, %128 : vector<8x16xf32>
    %130 = math.exp %129 : vector<8x16xf32>
    %cst_89 = arith.constant dense<0.000000e+00> : vector<8xf32>
    %131 = vector.multi_reduction <add>, %130, %cst_89 [1] : vector<8x16xf32> to vector<8xf32>
    %132 = vector.shape_cast %131 : vector<8xf32> to vector<8x1xf32>
    %133 = tpu.reciprocal %132 {approx = true} : vector<8x1xf32> -> vector<8x1xf32>
    %134 = vector.broadcast %133 : vector<8x1xf32> to vector<8x16xf32>
    %135 = arith.mulf %130, %134 : vector<8x16xf32>
    %136 = arith.truncf %135 : vector<8x16xf32> to vector<8x16xbf16>
    %137 = arith.truncf %118 : vector<16x8xf32> to vector<16x8xbf16>
    %cst_90 = arith.constant dense<0.000000e+00> : vector<8x8xf32>
    %138 = tpu.matmul %136, %137, %cst_90 {dimension_numbers = #tpu.dot_dimension_numbers<[1], [0], [0], [1], [0, 0, 1, 1], [], []>} : vector<8x16xbf16>, vector<16x8xbf16>, vector<8x8xf32> -> vector<8x8xf32>
    %139 = arith.truncf %138 : vector<8x8xf32> to vector<8x8xbf16>
    %c2_91 = arith.constant 2 : index
    %c0_92 = arith.constant 0 : index
    %c0_93 = arith.constant 0 : index
    %140 = vector.load %arg10[%c2_91, %c0_92, %c0_93] : memref<4x8x32xbf16, #tpu.memory_space<vmem>>, vector<1x8x32xbf16>
    %141 = vector.shape_cast %140 : vector<1x8x32xbf16> to vector<8x32xbf16>
    %cst_94 = arith.constant dense<0.000000e+00> : vector<8x32xf32>
    %142 = tpu.matmul %139, %141, %cst_94 {dimension_numbers = #tpu.dot_dimension_numbers<[1], [0], [0], [1], [0, 0, 1, 1], [], []>} : vector<8x8xbf16>, vector<8x32xbf16>, vector<8x32xf32> -> vector<8x32xf32>
    %143 = arith.addf %97, %142 : vector<8x32xf32>
    %c3 = arith.constant 3 : index
    %c0_95 = arith.constant 0 : index
    %c0_96 = arith.constant 0 : index
    %144 = vector.load %arg4[%c3, %c0_95, %c0_96] : memref<4x32x8xbf16, #tpu.memory_space<vmem>>, vector<1x32x8xbf16>
    %145 = vector.shape_cast %144 : vector<1x32x8xbf16> to vector<32x8xbf16>
    %cst_97 = arith.constant dense<0.000000e+00> : vector<8x8xf32>
    %146 = tpu.matmul %6, %145, %cst_97 {dimension_numbers = #tpu.dot_dimension_numbers<[1], [0], [0], [1], [0, 0, 1, 1], [], []>} : vector<8x32xbf16>, vector<32x8xbf16>, vector<8x8xf32> -> vector<8x8xf32>
    %c3_98 = arith.constant 3 : index
    %c0_99 = arith.constant 0 : index
    %c0_100 = arith.constant 0 : index
    %147 = vector.load %arg5[%c3_98, %c0_99, %c0_100] : memref<4x1x8xf32, #tpu.memory_space<vmem>>, vector<1x1x8xf32>
    %148 = vector.shape_cast %147 : vector<1x1x8xf32> to vector<1x8xf32>
    %149 = vector.broadcast %148 : vector<1x8xf32> to vector<8x8xf32>
    %150 = arith.addf %146, %149 : vector<8x8xf32>
    %c3_101 = arith.constant 3 : index
    %c0_102 = arith.constant 0 : index
    %c0_103 = arith.constant 0 : index
    %151 = vector.load %arg6[%c3_101, %c0_102, %c0_103] : memref<4x32x8xbf16, #tpu.memory_space<vmem>>, vector<1x32x8xbf16>
    %152 = vector.shape_cast %151 : vector<1x32x8xbf16> to vector<32x8xbf16>
    %cst_104 = arith.constant dense<0.000000e+00> : vector<16x8xf32>
    %153 = tpu.matmul %3, %152, %cst_104 {dimension_numbers = #tpu.dot_dimension_numbers<[1], [0], [0], [1], [0, 0, 1, 1], [], []>} : vector<16x32xbf16>, vector<32x8xbf16>, vector<16x8xf32> -> vector<16x8xf32>
    %c3_105 = arith.constant 3 : index
    %c0_106 = arith.constant 0 : index
    %c0_107 = arith.constant 0 : index
    %154 = vector.load %arg7[%c3_105, %c0_106, %c0_107] : memref<4x1x8xf32, #tpu.memory_space<vmem>>, vector<1x1x8xf32>
    %155 = vector.shape_cast %154 : vector<1x1x8xf32> to vector<1x8xf32>
    %156 = vector.broadcast %155 : vector<1x8xf32> to vector<16x8xf32>
    %157 = arith.addf %153, %156 : vector<16x8xf32>
    %c3_108 = arith.constant 3 : index
    %c0_109 = arith.constant 0 : index
    %c0_110 = arith.constant 0 : index
    %158 = vector.load %arg8[%c3_108, %c0_109, %c0_110] : memref<4x32x8xbf16, #tpu.memory_space<vmem>>, vector<1x32x8xbf16>
    %159 = vector.shape_cast %158 : vector<1x32x8xbf16> to vector<32x8xbf16>
    %cst_111 = arith.constant dense<0.000000e+00> : vector<16x8xf32>
    %160 = tpu.matmul %3, %159, %cst_111 {dimension_numbers = #tpu.dot_dimension_numbers<[1], [0], [0], [1], [0, 0, 1, 1], [], []>} : vector<16x32xbf16>, vector<32x8xbf16>, vector<16x8xf32> -> vector<16x8xf32>
    %c3_112 = arith.constant 3 : index
    %c0_113 = arith.constant 0 : index
    %c0_114 = arith.constant 0 : index
    %161 = vector.load %arg9[%c3_112, %c0_113, %c0_114] : memref<4x1x8xf32, #tpu.memory_space<vmem>>, vector<1x1x8xf32>
    %162 = vector.shape_cast %161 : vector<1x1x8xf32> to vector<1x8xf32>
    %163 = vector.broadcast %162 : vector<1x8xf32> to vector<16x8xf32>
    %164 = arith.addf %160, %163 : vector<16x8xf32>
    %165 = arith.truncf %150 : vector<8x8xf32> to vector<8x8xbf16>
    %166 = arith.truncf %157 : vector<16x8xf32> to vector<16x8xbf16>
    %cst_115 = arith.constant dense<0.000000e+00> : vector<8x16xf32>
    %167 = tpu.matmul %165, %166, %cst_115 {dimension_numbers = #tpu.dot_dimension_numbers<[1], [1], [0], [0], [0, 0, 1, 0], [], []>} : vector<8x8xbf16>, vector<16x8xbf16>, vector<8x16xf32> -> vector<8x16xf32>
    %cst_116 = arith.constant 0.353553385 : f32
    %168 = vector.broadcast %cst_116 : f32 to vector<8x16xf32>
    %169 = arith.mulf %167, %168 : vector<8x16xf32>
    %170 = vector.broadcast %5 : vector<1x16xf32> to vector<8x16xf32>
    %171 = arith.addf %169, %170 : vector<8x16xf32>
    %cst_117 = arith.constant dense<0xFF800000> : vector<8xf32>
    %172 = vector.multi_reduction <maximumf>, %171, %cst_117 [1] : vector<8x16xf32> to vector<8xf32>
    %173 = vector.shape_cast %172 : vector<8xf32> to vector<8x1xf32>
    %174 = vector.broadcast %173 : vector<8x1xf32> to vector<8x16xf32>
    %175 = arith.subf %171, %174 : vector<8x16xf32>
    %176 = math.exp %175 : vector<8x16xf32>
    %cst_118 = arith.constant dense<0.000000e+00> : vector<8xf32>
    %177 = vector.multi_reduction <add>, %176, %cst_118 [1] : vector<8x16xf32> to vector<8xf32>
    %178 = vector.shape_cast %177 : vector<8xf32> to vector<8x1xf32>
    %179 = tpu.reciprocal %178 {approx = true} : vector<8x1xf32> -> vector<8x1xf32>
    %180 = vector.broadcast %179 : vector<8x1xf32> to vector<8x16xf32>
    %181 = arith.mulf %176, %180 : vector<8x16xf32>
    %182 = arith.truncf %181 : vector<8x16xf32> to vector<8x16xbf16>
    %183 = arith.truncf %164 : vector<16x8xf32> to vector<16x8xbf16>
    %cst_119 = arith.constant dense<0.000000e+00> : vector<8x8xf32>
    %184 = tpu.matmul %182, %183, %cst_119 {dimension_numbers = #tpu.dot_dimension_numbers<[1], [0], [0], [1], [0, 0, 1, 1], [], []>} : vector<8x16xbf16>, vector<16x8xbf16>, vector<8x8xf32> -> vector<8x8xf32>
    %185 = arith.truncf %184 : vector<8x8xf32> to vector<8x8xbf16>
    %c3_120 = arith.constant 3 : index
    %c0_121 = arith.constant 0 : index
    %c0_122 = arith.constant 0 : index
    %186 = vector.load %arg10[%c3_120, %c0_121, %c0_122] : memref<4x8x32xbf16, #tpu.memory_space<vmem>>, vector<1x8x32xbf16>
    %187 = vector.shape_cast %186 : vector<1x8x32xbf16> to vector<8x32xbf16>
    %cst_123 = arith.constant dense<0.000000e+00> : vector<8x32xf32>
    %188 = tpu.matmul %185, %187, %cst_123 {dimension_numbers = #tpu.dot_dimension_numbers<[1], [0], [0], [1], [0, 0, 1, 1], [], []>} : vector<8x8xbf16>, vector<8x32xbf16>, vector<8x32xf32> -> vector<8x32xf32>
    %189 = arith.addf %143, %188 : vector<8x32xf32>
    %c0_124 = arith.constant 0 : index
    %c0_125 = arith.constant 0 : index
    %190 = vector.load %arg11[%c0_124, %c0_125] : memref<1x32xf32, #tpu.memory_space<vmem>>, vector<1x32xf32>
    %191 = vector.broadcast %190 : vector<1x32xf32> to vector<8x32xf32>
    %192 = arith.addf %189, %191 : vector<8x32xf32>
    %193 = arith.addf %192, %1 : vector<8x32xf32>
    %c0_126 = arith.constant 0 : index
    %c0_127 = arith.constant 0 : index
    %194 = vector.load %arg12[%c0_126, %c0_127] : memref<1x32xf32, #tpu.memory_space<vmem>>, vector<1x32xf32>
    %c0_128 = arith.constant 0 : index
    %c0_129 = arith.constant 0 : index
    %195 = vector.load %arg13[%c0_128, %c0_129] : memref<1x32xf32, #tpu.memory_space<vmem>>, vector<1x32xf32>
    %cst_130 = arith.constant dense<0.000000e+00> : vector<8xf32>
    %196 = vector.multi_reduction <add>, %193, %cst_130 [1] : vector<8x32xf32> to vector<8xf32>
    %197 = vector.shape_cast %196 : vector<8xf32> to vector<8x1xf32>
    %cst_131 = arith.constant 3.200000e+01 : f32
    %198 = vector.broadcast %cst_131 : f32 to vector<8x1xf32>
    %199 = arith.divf %197, %198 : vector<8x1xf32>
    %200 = vector.broadcast %199 : vector<8x1xf32> to vector<8x32xf32>
    %201 = arith.subf %193, %200 : vector<8x32xf32>
    %202 = arith.mulf %201, %201 : vector<8x32xf32>
    %cst_132 = arith.constant dense<0.000000e+00> : vector<8xf32>
    %203 = vector.multi_reduction <add>, %202, %cst_132 [1] : vector<8x32xf32> to vector<8xf32>
    %204 = vector.shape_cast %203 : vector<8xf32> to vector<8x1xf32>
    %cst_133 = arith.constant 3.200000e+01 : f32
    %205 = vector.broadcast %cst_133 : f32 to vector<8x1xf32>
    %206 = arith.divf %204, %205 : vector<8x1xf32>
    %207 = vector.broadcast %199 : vector<8x1xf32> to vector<8x32xf32>
    %208 = arith.subf %193, %207 : vector<8x32xf32>
    %cst_134 = arith.constant 9.99999974E-6 : f32
    %209 = vector.broadcast %cst_134 : f32 to vector<8x1xf32>
    %210 = arith.addf %206, %209 : vector<8x1xf32>
    %211 = math.rsqrt %210 : vector<8x1xf32>
    %212 = vector.broadcast %211 : vector<8x1xf32> to vector<8x32xf32>
    %213 = arith.mulf %208, %212 : vector<8x32xf32>
    %214 = vector.broadcast %194 : vector<1x32xf32> to vector<8x32xf32>
    %215 = arith.mulf %213, %214 : vector<8x32xf32>
    %216 = vector.broadcast %195 : vector<1x32xf32> to vector<8x32xf32>
    %217 = arith.addf %215, %216 : vector<8x32xf32>
    %c0_135 = arith.constant 0 : index
    %c0_136 = arith.constant 0 : index
    %c0_137 = arith.constant 0 : index
    %218 = vector.load %arg14[%c0_135, %c0_136, %c0_137] : memref<1x8x32xf32, #tpu.memory_space<vmem>>, vector<1x8x32xf32>
    %219 = vector.shape_cast %218 : vector<1x8x32xf32> to vector<8x32xf32>
    %220 = vector.shape_cast %217 : vector<8x32xf32> to vector<1x8x32xf32>
    tpu.vector_store %arg14[%c0_135, %c0_136, %c0_137], %220 {strides = array<i32>} : memref<1x8x32xf32, #tpu.memory_space<vmem>>, vector<1x8x32xf32>,
    return
  }
  func.func @transform_0(%arg0: i32) -> (i32, i32, i32) {
    %c0_i32 = arith.constant 0 : i32
    %c0_i32_0 = arith.constant 0 : i32
    %c0_i32_1 = arith.constant 0 : i32
    return %arg0, %c0_i32, %c0_i32_0 : i32, i32, i32
  }
  func.func @transform_1(%arg0: i32) -> (i32, i32, i32) {
    %c0_i32 = arith.constant 0 : i32
    %c0_i32_0 = arith.constant 0 : i32
    %c0_i32_1 = arith.constant 0 : i32
    return %arg0, %c0_i32, %c0_i32_0 : i32, i32, i32
  }
  func.func @transform_2(%arg0: i32) -> (i32, i32, i32) {
    %c0_i32 = arith.constant 0 : i32
    %c0_i32_0 = arith.constant 0 : i32
    %c0_i32_1 = arith.constant 0 : i32
    return %arg0, %c0_i32, %c0_i32_0 : i32, i32, i32
  }
  func.func @transform_3(%arg0: i32) -> (i32, i32, i32) {
    %c0_i32 = arith.constant 0 : i32
    %c0_i32_0 = arith.constant 0 : i32
    %c0_i32_1 = arith.constant 0 : i32
    %c0_i32_2 = arith.constant 0 : i32
    return %c0_i32, %c0_i32_0, %c0_i32_1 : i32, i32, i32
  }
  func.func @transform_4(%arg0: i32) -> (i32, i32, i32) {
    %c0_i32 = arith.constant 0 : i32
    %c0_i32_0 = arith.constant 0 : i32
    %c0_i32_1 = arith.constant 0 : i32
    %c0_i32_2 = arith.constant 0 : i32
    return %c0_i32, %c0_i32_0, %c0_i32_1 : i32, i32, i32
  }
  func.func @transform_5(%arg0: i32) -> (i32, i32, i32) {
    %c0_i32 = arith.constant 0 : i32
    %c0_i32_0 = arith.constant 0 : i32
    %c0_i32_1 = arith.constant 0 : i32
    %c0_i32_2 = arith.constant 0 : i32
    return %c0_i32, %c0_i32_0, %c0_i32_1 : i32, i32, i32
  }
  func.func @transform_6(%arg0: i32) -> (i32, i32, i32) {
    %c0_i32 = arith.constant 0 : i32
    %c0_i32_0 = arith.constant 0 : i32
    %c0_i32_1 = arith.constant 0 : i32
    %c0_i32_2 = arith.constant 0 : i32
    return %c0_i32, %c0_i32_0, %c0_i32_1 : i32, i32, i32
  }
  func.func @transform_7(%arg0: i32) -> (i32, i32, i32) {
    %c0_i32 = arith.constant 0 : i32
    %c0_i32_0 = arith.constant 0 : i32
    %c0_i32_1 = arith.constant 0 : i32
    %c0_i32_2 = arith.constant 0 : i32
    return %c0_i32, %c0_i32_0, %c0_i32_1 : i32, i32, i32
  }
  func.func @transform_8(%arg0: i32) -> (i32, i32, i32) {
    %c0_i32 = arith.constant 0 : i32
    %c0_i32_0 = arith.constant 0 : i32
    %c0_i32_1 = arith.constant 0 : i32
    %c0_i32_2 = arith.constant 0 : i32
    return %c0_i32, %c0_i32_0, %c0_i32_1 : i32, i32, i32
  }
  func.func @transform_9(%arg0: i32) -> (i32, i32, i32) {
    %c0_i32 = arith.constant 0 : i32
    %c0_i32_0 = arith.constant 0 : i32
    %c0_i32_1 = arith.constant 0 : i32
    %c0_i32_2 = arith.constant 0 : i32
    return %c0_i32, %c0_i32_0, %c0_i32_1 : i32, i32, i32
  }
  func.func @transform_10(%arg0: i32) -> (i32, i32) {
    %c0_i32 = arith.constant 0 : i32
    %c0_i32_0 = arith.constant 0 : i32
    %c0_i32_1 = arith.constant 0 : i32
    return %c0_i32, %c0_i32_0 : i32, i32
  }
  func.func @transform_11(%arg0: i32) -> (i32, i32) {
    %c0_i32 = arith.constant 0 : i32
    %c0_i32_0 = arith.constant 0 : i32
    %c0_i32_1 = arith.constant 0 : i32
    return %c0_i32, %c0_i32_0 : i32, i32
  }
  func.func @transform_12(%arg0: i32) -> (i32, i32) {
    %c0_i32 = arith.constant 0 : i32
    %c0_i32_0 = arith.constant 0 : i32
    %c0_i32_1 = arith.constant 0 : i32
    return %c0_i32, %c0_i32_0 : i32, i32
  }
  func.func @transform_13(%arg0: i32) -> (i32, i32, i32) {
    %c0_i32 = arith.constant 0 : i32
    %c0_i32_0 = arith.constant 0 : i32
    %c0_i32_1 = arith.constant 0 : i32
    return %arg0, %c0_i32, %c0_i32_0 : i32, i32, i32
  }
}

module attributes {stable_mosaic.version = 11 : i64} {
  func.func @_self_attn_ln_kernel(%arg0: i32, %arg1: memref<1x8x32xf32, #tpu.memory_space<vmem>>, %arg2: memref<4x32x8xbf16, #tpu.memory_space<vmem>>, %arg3: memref<4x1x8xf32, #tpu.memory_space<vmem>>, %arg4: memref<4x32x8xbf16, #tpu.memory_space<vmem>>, %arg5: memref<4x1x8xf32, #tpu.memory_space<vmem>>, %arg6: memref<4x32x8xbf16, #tpu.memory_space<vmem>>, %arg7: memref<4x1x8xf32, #tpu.memory_space<vmem>>, %arg8: memref<4x8x32xbf16, #tpu.memory_space<vmem>>, %arg9: memref<1x32xf32, #tpu.memory_space<vmem>>, %arg10: memref<1x32xf32, #tpu.memory_space<vmem>>, %arg11: memref<1x32xf32, #tpu.memory_space<vmem>>, %arg12: memref<1x8x32xf32, #tpu.memory_space<vmem>>) attributes {dimension_semantics = [#tpu.dimension_semantics<parallel>], iteration_bounds = array<i64: 2>, scalar_prefetch = 0 : i64, scratch_operands = 0 : i64, tpu.core_type = #tpu.core_type<tc>, window_params = [{transform_indices = @transform_0, window_bounds = array<i64: 1, 8, 32>}, {pipeline_mode = #tpu.pipeline_mode<synchronous>, transform_indices = @transform_1, window_bounds = array<i64: 4, 32, 8>}, {pipeline_mode = #tpu.pipeline_mode<synchronous>, transform_indices = @transform_2, window_bounds = array<i64: 4, 1, 8>}, {pipeline_mode = #tpu.pipeline_mode<synchronous>, transform_indices = @transform_3, window_bounds = array<i64: 4, 32, 8>}, {pipeline_mode = #tpu.pipeline_mode<synchronous>, transform_indices = @transform_4, window_bounds = array<i64: 4, 1, 8>}, {pipeline_mode = #tpu.pipeline_mode<synchronous>, transform_indices = @transform_5, window_bounds = array<i64: 4, 32, 8>}, {pipeline_mode = #tpu.pipeline_mode<synchronous>, transform_indices = @transform_6, window_bounds = array<i64: 4, 1, 8>}, {pipeline_mode = #tpu.pipeline_mode<synchronous>, transform_indices = @transform_7, window_bounds = array<i64: 4, 8, 32>}, {pipeline_mode = #tpu.pipeline_mode<synchronous>, transform_indices = @transform_8, window_bounds = array<i64: 1, 32>}, {pipeline_mode = #tpu.pipeline_mode<synchronous>, transform_indices = @transform_9, window_bounds = array<i64: 1, 32>}, {pipeline_mode = #tpu.pipeline_mode<synchronous>, transform_indices = @transform_10, window_bounds = array<i64: 1, 32>}, {transform_indices = @transform_11, window_bounds = array<i64: 1, 8, 32>}]} {
    %c0 = arith.constant 0 : index
    %c0_0 = arith.constant 0 : index
    %c0_1 = arith.constant 0 : index
    %0 = vector.load %arg1[%c0, %c0_0, %c0_1] : memref<1x8x32xf32, #tpu.memory_space<vmem>>, vector<1x8x32xf32>
    %1 = vector.shape_cast %0 : vector<1x8x32xf32> to vector<8x32xf32>
    %2 = arith.truncf %1 : vector<8x32xf32> to vector<8x32xbf16>
    %3 = tpu.iota {dimensions = array<i32: 0>} : vector<8x8xi32>
    %4 = tpu.iota {dimensions = array<i32: 1>} : vector<8x8xi32>
    %5 = arith.cmpi sge, %3, %4 : vector<8x8xi32>
    %cst = arith.constant 0.000000e+00 : f32
    %cst_2 = arith.constant -1.000000e+09 : f32
    %6 = vector.broadcast %cst : f32 to vector<8x8xf32>
    %7 = vector.broadcast %cst_2 : f32 to vector<8x8xf32>
    %8 = arith.select %5, %6, %7 : vector<8x8xi1>, vector<8x8xf32>
    %c0_3 = arith.constant 0 : index
    %c0_4 = arith.constant 0 : index
    %c0_5 = arith.constant 0 : index
    %9 = vector.load %arg2[%c0_3, %c0_4, %c0_5] : memref<4x32x8xbf16, #tpu.memory_space<vmem>>, vector<1x32x8xbf16>
    %10 = vector.shape_cast %9 : vector<1x32x8xbf16> to vector<32x8xbf16>
    %cst_6 = arith.constant dense<0.000000e+00> : vector<8x8xf32>
    %11 = tpu.matmul %2, %10, %cst_6 {dimension_numbers = #tpu.dot_dimension_numbers<[1], [0], [0], [1], [0, 0, 1, 1], [], []>} : vector<8x32xbf16>, vector<32x8xbf16>, vector<8x8xf32> -> vector<8x8xf32>
    %c0_7 = arith.constant 0 : index
    %c0_8 = arith.constant 0 : index
    %c0_9 = arith.constant 0 : index
    %12 = vector.load %arg3[%c0_7, %c0_8, %c0_9] : memref<4x1x8xf32, #tpu.memory_space<vmem>>, vector<1x1x8xf32>
    %13 = vector.shape_cast %12 : vector<1x1x8xf32> to vector<1x8xf32>
    %14 = vector.broadcast %13 : vector<1x8xf32> to vector<8x8xf32>
    %15 = arith.addf %11, %14 : vector<8x8xf32>
    %c0_10 = arith.constant 0 : index
    %c0_11 = arith.constant 0 : index
    %c0_12 = arith.constant 0 : index
    %16 = vector.load %arg4[%c0_10, %c0_11, %c0_12] : memref<4x32x8xbf16, #tpu.memory_space<vmem>>, vector<1x32x8xbf16>
    %17 = vector.shape_cast %16 : vector<1x32x8xbf16> to vector<32x8xbf16>
    %cst_13 = arith.constant dense<0.000000e+00> : vector<8x8xf32>
    %18 = tpu.matmul %2, %17, %cst_13 {dimension_numbers = #tpu.dot_dimension_numbers<[1], [0], [0], [1], [0, 0, 1, 1], [], []>} : vector<8x32xbf16>, vector<32x8xbf16>, vector<8x8xf32> -> vector<8x8xf32>
    %c0_14 = arith.constant 0 : index
    %c0_15 = arith.constant 0 : index
    %c0_16 = arith.constant 0 : index
    %19 = vector.load %arg5[%c0_14, %c0_15, %c0_16] : memref<4x1x8xf32, #tpu.memory_space<vmem>>, vector<1x1x8xf32>
    %20 = vector.shape_cast %19 : vector<1x1x8xf32> to vector<1x8xf32>
    %21 = vector.broadcast %20 : vector<1x8xf32> to vector<8x8xf32>
    %22 = arith.addf %18, %21 : vector<8x8xf32>
    %c0_17 = arith.constant 0 : index
    %c0_18 = arith.constant 0 : index
    %c0_19 = arith.constant 0 : index
    %23 = vector.load %arg6[%c0_17, %c0_18, %c0_19] : memref<4x32x8xbf16, #tpu.memory_space<vmem>>, vector<1x32x8xbf16>
    %24 = vector.shape_cast %23 : vector<1x32x8xbf16> to vector<32x8xbf16>
    %cst_20 = arith.constant dense<0.000000e+00> : vector<8x8xf32>
    %25 = tpu.matmul %2, %24, %cst_20 {dimension_numbers = #tpu.dot_dimension_numbers<[1], [0], [0], [1], [0, 0, 1, 1], [], []>} : vector<8x32xbf16>, vector<32x8xbf16>, vector<8x8xf32> -> vector<8x8xf32>
    %c0_21 = arith.constant 0 : index
    %c0_22 = arith.constant 0 : index
    %c0_23 = arith.constant 0 : index
    %26 = vector.load %arg7[%c0_21, %c0_22, %c0_23] : memref<4x1x8xf32, #tpu.memory_space<vmem>>, vector<1x1x8xf32>
    %27 = vector.shape_cast %26 : vector<1x1x8xf32> to vector<1x8xf32>
    %28 = vector.broadcast %27 : vector<1x8xf32> to vector<8x8xf32>
    %29 = arith.addf %25, %28 : vector<8x8xf32>
    %30 = arith.truncf %15 : vector<8x8xf32> to vector<8x8xbf16>
    %31 = arith.truncf %22 : vector<8x8xf32> to vector<8x8xbf16>
    %cst_24 = arith.constant dense<0.000000e+00> : vector<8x8xf32>
    %32 = tpu.matmul %30, %31, %cst_24 {dimension_numbers = #tpu.dot_dimension_numbers<[1], [1], [0], [0], [0, 0, 1, 0], [], []>} : vector<8x8xbf16>, vector<8x8xbf16>, vector<8x8xf32> -> vector<8x8xf32>
    %cst_25 = arith.constant 0.353553385 : f32
    %33 = vector.broadcast %cst_25 : f32 to vector<8x8xf32>
    %34 = arith.mulf %32, %33 : vector<8x8xf32>
    %35 = arith.addf %34, %8 : vector<8x8xf32>
    %cst_26 = arith.constant dense<0xFF800000> : vector<8xf32>
    %36 = vector.multi_reduction <maximumf>, %35, %cst_26 [1] : vector<8x8xf32> to vector<8xf32>
    %37 = vector.shape_cast %36 : vector<8xf32> to vector<8x1xf32>
    %38 = vector.broadcast %37 : vector<8x1xf32> to vector<8x8xf32>
    %39 = arith.subf %35, %38 : vector<8x8xf32>
    %40 = math.exp %39 : vector<8x8xf32>
    %cst_27 = arith.constant dense<0.000000e+00> : vector<8xf32>
    %41 = vector.multi_reduction <add>, %40, %cst_27 [1] : vector<8x8xf32> to vector<8xf32>
    %42 = vector.shape_cast %41 : vector<8xf32> to vector<8x1xf32>
    %43 = tpu.reciprocal %42 {approx = true} : vector<8x1xf32> -> vector<8x1xf32>
    %44 = vector.broadcast %43 : vector<8x1xf32> to vector<8x8xf32>
    %45 = arith.mulf %40, %44 : vector<8x8xf32>
    %46 = arith.truncf %45 : vector<8x8xf32> to vector<8x8xbf16>
    %47 = arith.truncf %29 : vector<8x8xf32> to vector<8x8xbf16>
    %cst_28 = arith.constant dense<0.000000e+00> : vector<8x8xf32>
    %48 = tpu.matmul %46, %47, %cst_28 {dimension_numbers = #tpu.dot_dimension_numbers<[1], [0], [0], [1], [0, 0, 1, 1], [], []>} : vector<8x8xbf16>, vector<8x8xbf16>, vector<8x8xf32> -> vector<8x8xf32>
    %49 = arith.truncf %48 : vector<8x8xf32> to vector<8x8xbf16>
    %c0_29 = arith.constant 0 : index
    %c0_30 = arith.constant 0 : index
    %c0_31 = arith.constant 0 : index
    %50 = vector.load %arg8[%c0_29, %c0_30, %c0_31] : memref<4x8x32xbf16, #tpu.memory_space<vmem>>, vector<1x8x32xbf16>
    %51 = vector.shape_cast %50 : vector<1x8x32xbf16> to vector<8x32xbf16>
    %cst_32 = arith.constant dense<0.000000e+00> : vector<8x32xf32>
    %52 = tpu.matmul %49, %51, %cst_32 {dimension_numbers = #tpu.dot_dimension_numbers<[1], [0], [0], [1], [0, 0, 1, 1], [], []>} : vector<8x8xbf16>, vector<8x32xbf16>, vector<8x32xf32> -> vector<8x32xf32>
    %c1 = arith.constant 1 : index
    %c0_33 = arith.constant 0 : index
    %c0_34 = arith.constant 0 : index
    %53 = vector.load %arg2[%c1, %c0_33, %c0_34] : memref<4x32x8xbf16, #tpu.memory_space<vmem>>, vector<1x32x8xbf16>
    %54 = vector.shape_cast %53 : vector<1x32x8xbf16> to vector<32x8xbf16>
    %cst_35 = arith.constant dense<0.000000e+00> : vector<8x8xf32>
    %55 = tpu.matmul %2, %54, %cst_35 {dimension_numbers = #tpu.dot_dimension_numbers<[1], [0], [0], [1], [0, 0, 1, 1], [], []>} : vector<8x32xbf16>, vector<32x8xbf16>, vector<8x8xf32> -> vector<8x8xf32>
    %c1_36 = arith.constant 1 : index
    %c0_37 = arith.constant 0 : index
    %c0_38 = arith.constant 0 : index
    %56 = vector.load %arg3[%c1_36, %c0_37, %c0_38] : memref<4x1x8xf32, #tpu.memory_space<vmem>>, vector<1x1x8xf32>
    %57 = vector.shape_cast %56 : vector<1x1x8xf32> to vector<1x8xf32>
    %58 = vector.broadcast %57 : vector<1x8xf32> to vector<8x8xf32>
    %59 = arith.addf %55, %58 : vector<8x8xf32>
    %c1_39 = arith.constant 1 : index
    %c0_40 = arith.constant 0 : index
    %c0_41 = arith.constant 0 : index
    %60 = vector.load %arg4[%c1_39, %c0_40, %c0_41] : memref<4x32x8xbf16, #tpu.memory_space<vmem>>, vector<1x32x8xbf16>
    %61 = vector.shape_cast %60 : vector<1x32x8xbf16> to vector<32x8xbf16>
    %cst_42 = arith.constant dense<0.000000e+00> : vector<8x8xf32>
    %62 = tpu.matmul %2, %61, %cst_42 {dimension_numbers = #tpu.dot_dimension_numbers<[1], [0], [0], [1], [0, 0, 1, 1], [], []>} : vector<8x32xbf16>, vector<32x8xbf16>, vector<8x8xf32> -> vector<8x8xf32>
    %c1_43 = arith.constant 1 : index
    %c0_44 = arith.constant 0 : index
    %c0_45 = arith.constant 0 : index
    %63 = vector.load %arg5[%c1_43, %c0_44, %c0_45] : memref<4x1x8xf32, #tpu.memory_space<vmem>>, vector<1x1x8xf32>
    %64 = vector.shape_cast %63 : vector<1x1x8xf32> to vector<1x8xf32>
    %65 = vector.broadcast %64 : vector<1x8xf32> to vector<8x8xf32>
    %66 = arith.addf %62, %65 : vector<8x8xf32>
    %c1_46 = arith.constant 1 : index
    %c0_47 = arith.constant 0 : index
    %c0_48 = arith.constant 0 : index
    %67 = vector.load %arg6[%c1_46, %c0_47, %c0_48] : memref<4x32x8xbf16, #tpu.memory_space<vmem>>, vector<1x32x8xbf16>
    %68 = vector.shape_cast %67 : vector<1x32x8xbf16> to vector<32x8xbf16>
    %cst_49 = arith.constant dense<0.000000e+00> : vector<8x8xf32>
    %69 = tpu.matmul %2, %68, %cst_49 {dimension_numbers = #tpu.dot_dimension_numbers<[1], [0], [0], [1], [0, 0, 1, 1], [], []>} : vector<8x32xbf16>, vector<32x8xbf16>, vector<8x8xf32> -> vector<8x8xf32>
    %c1_50 = arith.constant 1 : index
    %c0_51 = arith.constant 0 : index
    %c0_52 = arith.constant 0 : index
    %70 = vector.load %arg7[%c1_50, %c0_51, %c0_52] : memref<4x1x8xf32, #tpu.memory_space<vmem>>, vector<1x1x8xf32>
    %71 = vector.shape_cast %70 : vector<1x1x8xf32> to vector<1x8xf32>
    %72 = vector.broadcast %71 : vector<1x8xf32> to vector<8x8xf32>
    %73 = arith.addf %69, %72 : vector<8x8xf32>
    %74 = arith.truncf %59 : vector<8x8xf32> to vector<8x8xbf16>
    %75 = arith.truncf %66 : vector<8x8xf32> to vector<8x8xbf16>
    %cst_53 = arith.constant dense<0.000000e+00> : vector<8x8xf32>
    %76 = tpu.matmul %74, %75, %cst_53 {dimension_numbers = #tpu.dot_dimension_numbers<[1], [1], [0], [0], [0, 0, 1, 0], [], []>} : vector<8x8xbf16>, vector<8x8xbf16>, vector<8x8xf32> -> vector<8x8xf32>
    %cst_54 = arith.constant 0.353553385 : f32
    %77 = vector.broadcast %cst_54 : f32 to vector<8x8xf32>
    %78 = arith.mulf %76, %77 : vector<8x8xf32>
    %79 = arith.addf %78, %8 : vector<8x8xf32>
    %cst_55 = arith.constant dense<0xFF800000> : vector<8xf32>
    %80 = vector.multi_reduction <maximumf>, %79, %cst_55 [1] : vector<8x8xf32> to vector<8xf32>
    %81 = vector.shape_cast %80 : vector<8xf32> to vector<8x1xf32>
    %82 = vector.broadcast %81 : vector<8x1xf32> to vector<8x8xf32>
    %83 = arith.subf %79, %82 : vector<8x8xf32>
    %84 = math.exp %83 : vector<8x8xf32>
    %cst_56 = arith.constant dense<0.000000e+00> : vector<8xf32>
    %85 = vector.multi_reduction <add>, %84, %cst_56 [1] : vector<8x8xf32> to vector<8xf32>
    %86 = vector.shape_cast %85 : vector<8xf32> to vector<8x1xf32>
    %87 = tpu.reciprocal %86 {approx = true} : vector<8x1xf32> -> vector<8x1xf32>
    %88 = vector.broadcast %87 : vector<8x1xf32> to vector<8x8xf32>
    %89 = arith.mulf %84, %88 : vector<8x8xf32>
    %90 = arith.truncf %89 : vector<8x8xf32> to vector<8x8xbf16>
    %91 = arith.truncf %73 : vector<8x8xf32> to vector<8x8xbf16>
    %cst_57 = arith.constant dense<0.000000e+00> : vector<8x8xf32>
    %92 = tpu.matmul %90, %91, %cst_57 {dimension_numbers = #tpu.dot_dimension_numbers<[1], [0], [0], [1], [0, 0, 1, 1], [], []>} : vector<8x8xbf16>, vector<8x8xbf16>, vector<8x8xf32> -> vector<8x8xf32>
    %93 = arith.truncf %92 : vector<8x8xf32> to vector<8x8xbf16>
    %c1_58 = arith.constant 1 : index
    %c0_59 = arith.constant 0 : index
    %c0_60 = arith.constant 0 : index
    %94 = vector.load %arg8[%c1_58, %c0_59, %c0_60] : memref<4x8x32xbf16, #tpu.memory_space<vmem>>, vector<1x8x32xbf16>
    %95 = vector.shape_cast %94 : vector<1x8x32xbf16> to vector<8x32xbf16>
    %cst_61 = arith.constant dense<0.000000e+00> : vector<8x32xf32>
    %96 = tpu.matmul %93, %95, %cst_61 {dimension_numbers = #tpu.dot_dimension_numbers<[1], [0], [0], [1], [0, 0, 1, 1], [], []>} : vector<8x8xbf16>, vector<8x32xbf16>, vector<8x32xf32> -> vector<8x32xf32>
    %97 = arith.addf %52, %96 : vector<8x32xf32>
    %c2 = arith.constant 2 : index
    %c0_62 = arith.constant 0 : index
    %c0_63 = arith.constant 0 : index
    %98 = vector.load %arg2[%c2, %c0_62, %c0_63] : memref<4x32x8xbf16, #tpu.memory_space<vmem>>, vector<1x32x8xbf16>
    %99 = vector.shape_cast %98 : vector<1x32x8xbf16> to vector<32x8xbf16>
    %cst_64 = arith.constant dense<0.000000e+00> : vector<8x8xf32>
    %100 = tpu.matmul %2, %99, %cst_64 {dimension_numbers = #tpu.dot_dimension_numbers<[1], [0], [0], [1], [0, 0, 1, 1], [], []>} : vector<8x32xbf16>, vector<32x8xbf16>, vector<8x8xf32> -> vector<8x8xf32>
    %c2_65 = arith.constant 2 : index
    %c0_66 = arith.constant 0 : index
    %c0_67 = arith.constant 0 : index
    %101 = vector.load %arg3[%c2_65, %c0_66, %c0_67] : memref<4x1x8xf32, #tpu.memory_space<vmem>>, vector<1x1x8xf32>
    %102 = vector.shape_cast %101 : vector<1x1x8xf32> to vector<1x8xf32>
    %103 = vector.broadcast %102 : vector<1x8xf32> to vector<8x8xf32>
    %104 = arith.addf %100, %103 : vector<8x8xf32>
    %c2_68 = arith.constant 2 : index
    %c0_69 = arith.constant 0 : index
    %c0_70 = arith.constant 0 : index
    %105 = vector.load %arg4[%c2_68, %c0_69, %c0_70] : memref<4x32x8xbf16, #tpu.memory_space<vmem>>, vector<1x32x8xbf16>
    %106 = vector.shape_cast %105 : vector<1x32x8xbf16> to vector<32x8xbf16>
    %cst_71 = arith.constant dense<0.000000e+00> : vector<8x8xf32>
    %107 = tpu.matmul %2, %106, %cst_71 {dimension_numbers = #tpu.dot_dimension_numbers<[1], [0], [0], [1], [0, 0, 1, 1], [], []>} : vector<8x32xbf16>, vector<32x8xbf16>, vector<8x8xf32> -> vector<8x8xf32>
    %c2_72 = arith.constant 2 : index
    %c0_73 = arith.constant 0 : index
    %c0_74 = arith.constant 0 : index
    %108 = vector.load %arg5[%c2_72, %c0_73, %c0_74] : memref<4x1x8xf32, #tpu.memory_space<vmem>>, vector<1x1x8xf32>
    %109 = vector.shape_cast %108 : vector<1x1x8xf32> to vector<1x8xf32>
    %110 = vector.broadcast %109 : vector<1x8xf32> to vector<8x8xf32>
    %111 = arith.addf %107, %110 : vector<8x8xf32>
    %c2_75 = arith.constant 2 : index
    %c0_76 = arith.constant 0 : index
    %c0_77 = arith.constant 0 : index
    %112 = vector.load %arg6[%c2_75, %c0_76, %c0_77] : memref<4x32x8xbf16, #tpu.memory_space<vmem>>, vector<1x32x8xbf16>
    %113 = vector.shape_cast %112 : vector<1x32x8xbf16> to vector<32x8xbf16>
    %cst_78 = arith.constant dense<0.000000e+00> : vector<8x8xf32>
    %114 = tpu.matmul %2, %113, %cst_78 {dimension_numbers = #tpu.dot_dimension_numbers<[1], [0], [0], [1], [0, 0, 1, 1], [], []>} : vector<8x32xbf16>, vector<32x8xbf16>, vector<8x8xf32> -> vector<8x8xf32>
    %c2_79 = arith.constant 2 : index
    %c0_80 = arith.constant 0 : index
    %c0_81 = arith.constant 0 : index
    %115 = vector.load %arg7[%c2_79, %c0_80, %c0_81] : memref<4x1x8xf32, #tpu.memory_space<vmem>>, vector<1x1x8xf32>
    %116 = vector.shape_cast %115 : vector<1x1x8xf32> to vector<1x8xf32>
    %117 = vector.broadcast %116 : vector<1x8xf32> to vector<8x8xf32>
    %118 = arith.addf %114, %117 : vector<8x8xf32>
    %119 = arith.truncf %104 : vector<8x8xf32> to vector<8x8xbf16>
    %120 = arith.truncf %111 : vector<8x8xf32> to vector<8x8xbf16>
    %cst_82 = arith.constant dense<0.000000e+00> : vector<8x8xf32>
    %121 = tpu.matmul %119, %120, %cst_82 {dimension_numbers = #tpu.dot_dimension_numbers<[1], [1], [0], [0], [0, 0, 1, 0], [], []>} : vector<8x8xbf16>, vector<8x8xbf16>, vector<8x8xf32> -> vector<8x8xf32>
    %cst_83 = arith.constant 0.353553385 : f32
    %122 = vector.broadcast %cst_83 : f32 to vector<8x8xf32>
    %123 = arith.mulf %121, %122 : vector<8x8xf32>
    %124 = arith.addf %123, %8 : vector<8x8xf32>
    %cst_84 = arith.constant dense<0xFF800000> : vector<8xf32>
    %125 = vector.multi_reduction <maximumf>, %124, %cst_84 [1] : vector<8x8xf32> to vector<8xf32>
    %126 = vector.shape_cast %125 : vector<8xf32> to vector<8x1xf32>
    %127 = vector.broadcast %126 : vector<8x1xf32> to vector<8x8xf32>
    %128 = arith.subf %124, %127 : vector<8x8xf32>
    %129 = math.exp %128 : vector<8x8xf32>
    %cst_85 = arith.constant dense<0.000000e+00> : vector<8xf32>
    %130 = vector.multi_reduction <add>, %129, %cst_85 [1] : vector<8x8xf32> to vector<8xf32>
    %131 = vector.shape_cast %130 : vector<8xf32> to vector<8x1xf32>
    %132 = tpu.reciprocal %131 {approx = true} : vector<8x1xf32> -> vector<8x1xf32>
    %133 = vector.broadcast %132 : vector<8x1xf32> to vector<8x8xf32>
    %134 = arith.mulf %129, %133 : vector<8x8xf32>
    %135 = arith.truncf %134 : vector<8x8xf32> to vector<8x8xbf16>
    %136 = arith.truncf %118 : vector<8x8xf32> to vector<8x8xbf16>
    %cst_86 = arith.constant dense<0.000000e+00> : vector<8x8xf32>
    %137 = tpu.matmul %135, %136, %cst_86 {dimension_numbers = #tpu.dot_dimension_numbers<[1], [0], [0], [1], [0, 0, 1, 1], [], []>} : vector<8x8xbf16>, vector<8x8xbf16>, vector<8x8xf32> -> vector<8x8xf32>
    %138 = arith.truncf %137 : vector<8x8xf32> to vector<8x8xbf16>
    %c2_87 = arith.constant 2 : index
    %c0_88 = arith.constant 0 : index
    %c0_89 = arith.constant 0 : index
    %139 = vector.load %arg8[%c2_87, %c0_88, %c0_89] : memref<4x8x32xbf16, #tpu.memory_space<vmem>>, vector<1x8x32xbf16>
    %140 = vector.shape_cast %139 : vector<1x8x32xbf16> to vector<8x32xbf16>
    %cst_90 = arith.constant dense<0.000000e+00> : vector<8x32xf32>
    %141 = tpu.matmul %138, %140, %cst_90 {dimension_numbers = #tpu.dot_dimension_numbers<[1], [0], [0], [1], [0, 0, 1, 1], [], []>} : vector<8x8xbf16>, vector<8x32xbf16>, vector<8x32xf32> -> vector<8x32xf32>
    %142 = arith.addf %97, %141 : vector<8x32xf32>
    %c3 = arith.constant 3 : index
    %c0_91 = arith.constant 0 : index
    %c0_92 = arith.constant 0 : index
    %143 = vector.load %arg2[%c3, %c0_91, %c0_92] : memref<4x32x8xbf16, #tpu.memory_space<vmem>>, vector<1x32x8xbf16>
    %144 = vector.shape_cast %143 : vector<1x32x8xbf16> to vector<32x8xbf16>
    %cst_93 = arith.constant dense<0.000000e+00> : vector<8x8xf32>
    %145 = tpu.matmul %2, %144, %cst_93 {dimension_numbers = #tpu.dot_dimension_numbers<[1], [0], [0], [1], [0, 0, 1, 1], [], []>} : vector<8x32xbf16>, vector<32x8xbf16>, vector<8x8xf32> -> vector<8x8xf32>
    %c3_94 = arith.constant 3 : index
    %c0_95 = arith.constant 0 : index
    %c0_96 = arith.constant 0 : index
    %146 = vector.load %arg3[%c3_94, %c0_95, %c0_96] : memref<4x1x8xf32, #tpu.memory_space<vmem>>, vector<1x1x8xf32>
    %147 = vector.shape_cast %146 : vector<1x1x8xf32> to vector<1x8xf32>
    %148 = vector.broadcast %147 : vector<1x8xf32> to vector<8x8xf32>
    %149 = arith.addf %145, %148 : vector<8x8xf32>
    %c3_97 = arith.constant 3 : index
    %c0_98 = arith.constant 0 : index
    %c0_99 = arith.constant 0 : index
    %150 = vector.load %arg4[%c3_97, %c0_98, %c0_99] : memref<4x32x8xbf16, #tpu.memory_space<vmem>>, vector<1x32x8xbf16>
    %151 = vector.shape_cast %150 : vector<1x32x8xbf16> to vector<32x8xbf16>
    %cst_100 = arith.constant dense<0.000000e+00> : vector<8x8xf32>
    %152 = tpu.matmul %2, %151, %cst_100 {dimension_numbers = #tpu.dot_dimension_numbers<[1], [0], [0], [1], [0, 0, 1, 1], [], []>} : vector<8x32xbf16>, vector<32x8xbf16>, vector<8x8xf32> -> vector<8x8xf32>
    %c3_101 = arith.constant 3 : index
    %c0_102 = arith.constant 0 : index
    %c0_103 = arith.constant 0 : index
    %153 = vector.load %arg5[%c3_101, %c0_102, %c0_103] : memref<4x1x8xf32, #tpu.memory_space<vmem>>, vector<1x1x8xf32>
    %154 = vector.shape_cast %153 : vector<1x1x8xf32> to vector<1x8xf32>
    %155 = vector.broadcast %154 : vector<1x8xf32> to vector<8x8xf32>
    %156 = arith.addf %152, %155 : vector<8x8xf32>
    %c3_104 = arith.constant 3 : index
    %c0_105 = arith.constant 0 : index
    %c0_106 = arith.constant 0 : index
    %157 = vector.load %arg6[%c3_104, %c0_105, %c0_106] : memref<4x32x8xbf16, #tpu.memory_space<vmem>>, vector<1x32x8xbf16>
    %158 = vector.shape_cast %157 : vector<1x32x8xbf16> to vector<32x8xbf16>
    %cst_107 = arith.constant dense<0.000000e+00> : vector<8x8xf32>
    %159 = tpu.matmul %2, %158, %cst_107 {dimension_numbers = #tpu.dot_dimension_numbers<[1], [0], [0], [1], [0, 0, 1, 1], [], []>} : vector<8x32xbf16>, vector<32x8xbf16>, vector<8x8xf32> -> vector<8x8xf32>
    %c3_108 = arith.constant 3 : index
    %c0_109 = arith.constant 0 : index
    %c0_110 = arith.constant 0 : index
    %160 = vector.load %arg7[%c3_108, %c0_109, %c0_110] : memref<4x1x8xf32, #tpu.memory_space<vmem>>, vector<1x1x8xf32>
    %161 = vector.shape_cast %160 : vector<1x1x8xf32> to vector<1x8xf32>
    %162 = vector.broadcast %161 : vector<1x8xf32> to vector<8x8xf32>
    %163 = arith.addf %159, %162 : vector<8x8xf32>
    %164 = arith.truncf %149 : vector<8x8xf32> to vector<8x8xbf16>
    %165 = arith.truncf %156 : vector<8x8xf32> to vector<8x8xbf16>
    %cst_111 = arith.constant dense<0.000000e+00> : vector<8x8xf32>
    %166 = tpu.matmul %164, %165, %cst_111 {dimension_numbers = #tpu.dot_dimension_numbers<[1], [1], [0], [0], [0, 0, 1, 0], [], []>} : vector<8x8xbf16>, vector<8x8xbf16>, vector<8x8xf32> -> vector<8x8xf32>
    %cst_112 = arith.constant 0.353553385 : f32
    %167 = vector.broadcast %cst_112 : f32 to vector<8x8xf32>
    %168 = arith.mulf %166, %167 : vector<8x8xf32>
    %169 = arith.addf %168, %8 : vector<8x8xf32>
    %cst_113 = arith.constant dense<0xFF800000> : vector<8xf32>
    %170 = vector.multi_reduction <maximumf>, %169, %cst_113 [1] : vector<8x8xf32> to vector<8xf32>
    %171 = vector.shape_cast %170 : vector<8xf32> to vector<8x1xf32>
    %172 = vector.broadcast %171 : vector<8x1xf32> to vector<8x8xf32>
    %173 = arith.subf %169, %172 : vector<8x8xf32>
    %174 = math.exp %173 : vector<8x8xf32>
    %cst_114 = arith.constant dense<0.000000e+00> : vector<8xf32>
    %175 = vector.multi_reduction <add>, %174, %cst_114 [1] : vector<8x8xf32> to vector<8xf32>
    %176 = vector.shape_cast %175 : vector<8xf32> to vector<8x1xf32>
    %177 = tpu.reciprocal %176 {approx = true} : vector<8x1xf32> -> vector<8x1xf32>
    %178 = vector.broadcast %177 : vector<8x1xf32> to vector<8x8xf32>
    %179 = arith.mulf %174, %178 : vector<8x8xf32>
    %180 = arith.truncf %179 : vector<8x8xf32> to vector<8x8xbf16>
    %181 = arith.truncf %163 : vector<8x8xf32> to vector<8x8xbf16>
    %cst_115 = arith.constant dense<0.000000e+00> : vector<8x8xf32>
    %182 = tpu.matmul %180, %181, %cst_115 {dimension_numbers = #tpu.dot_dimension_numbers<[1], [0], [0], [1], [0, 0, 1, 1], [], []>} : vector<8x8xbf16>, vector<8x8xbf16>, vector<8x8xf32> -> vector<8x8xf32>
    %183 = arith.truncf %182 : vector<8x8xf32> to vector<8x8xbf16>
    %c3_116 = arith.constant 3 : index
    %c0_117 = arith.constant 0 : index
    %c0_118 = arith.constant 0 : index
    %184 = vector.load %arg8[%c3_116, %c0_117, %c0_118] : memref<4x8x32xbf16, #tpu.memory_space<vmem>>, vector<1x8x32xbf16>
    %185 = vector.shape_cast %184 : vector<1x8x32xbf16> to vector<8x32xbf16>
    %cst_119 = arith.constant dense<0.000000e+00> : vector<8x32xf32>
    %186 = tpu.matmul %183, %185, %cst_119 {dimension_numbers = #tpu.dot_dimension_numbers<[1], [0], [0], [1], [0, 0, 1, 1], [], []>} : vector<8x8xbf16>, vector<8x32xbf16>, vector<8x32xf32> -> vector<8x32xf32>
    %187 = arith.addf %142, %186 : vector<8x32xf32>
    %c0_120 = arith.constant 0 : index
    %c0_121 = arith.constant 0 : index
    %188 = vector.load %arg9[%c0_120, %c0_121] : memref<1x32xf32, #tpu.memory_space<vmem>>, vector<1x32xf32>
    %189 = vector.broadcast %188 : vector<1x32xf32> to vector<8x32xf32>
    %190 = arith.addf %187, %189 : vector<8x32xf32>
    %191 = arith.addf %190, %1 : vector<8x32xf32>
    %c0_122 = arith.constant 0 : index
    %c0_123 = arith.constant 0 : index
    %192 = vector.load %arg10[%c0_122, %c0_123] : memref<1x32xf32, #tpu.memory_space<vmem>>, vector<1x32xf32>
    %c0_124 = arith.constant 0 : index
    %c0_125 = arith.constant 0 : index
    %193 = vector.load %arg11[%c0_124, %c0_125] : memref<1x32xf32, #tpu.memory_space<vmem>>, vector<1x32xf32>
    %cst_126 = arith.constant dense<0.000000e+00> : vector<8xf32>
    %194 = vector.multi_reduction <add>, %191, %cst_126 [1] : vector<8x32xf32> to vector<8xf32>
    %195 = vector.shape_cast %194 : vector<8xf32> to vector<8x1xf32>
    %cst_127 = arith.constant 3.200000e+01 : f32
    %196 = vector.broadcast %cst_127 : f32 to vector<8x1xf32>
    %197 = arith.divf %195, %196 : vector<8x1xf32>
    %198 = vector.broadcast %197 : vector<8x1xf32> to vector<8x32xf32>
    %199 = arith.subf %191, %198 : vector<8x32xf32>
    %200 = arith.mulf %199, %199 : vector<8x32xf32>
    %cst_128 = arith.constant dense<0.000000e+00> : vector<8xf32>
    %201 = vector.multi_reduction <add>, %200, %cst_128 [1] : vector<8x32xf32> to vector<8xf32>
    %202 = vector.shape_cast %201 : vector<8xf32> to vector<8x1xf32>
    %cst_129 = arith.constant 3.200000e+01 : f32
    %203 = vector.broadcast %cst_129 : f32 to vector<8x1xf32>
    %204 = arith.divf %202, %203 : vector<8x1xf32>
    %205 = vector.broadcast %197 : vector<8x1xf32> to vector<8x32xf32>
    %206 = arith.subf %191, %205 : vector<8x32xf32>
    %cst_130 = arith.constant 9.99999974E-6 : f32
    %207 = vector.broadcast %cst_130 : f32 to vector<8x1xf32>
    %208 = arith.addf %204, %207 : vector<8x1xf32>
    %209 = math.rsqrt %208 : vector<8x1xf32>
    %210 = vector.broadcast %209 : vector<8x1xf32> to vector<8x32xf32>
    %211 = arith.mulf %206, %210 : vector<8x32xf32>
    %212 = vector.broadcast %192 : vector<1x32xf32> to vector<8x32xf32>
    %213 = arith.mulf %211, %212 : vector<8x32xf32>
    %214 = vector.broadcast %193 : vector<1x32xf32> to vector<8x32xf32>
    %215 = arith.addf %213, %214 : vector<8x32xf32>
    %c0_131 = arith.constant 0 : index
    %c0_132 = arith.constant 0 : index
    %c0_133 = arith.constant 0 : index
    %216 = vector.load %arg12[%c0_131, %c0_132, %c0_133] : memref<1x8x32xf32, #tpu.memory_space<vmem>>, vector<1x8x32xf32>
    %217 = vector.shape_cast %216 : vector<1x8x32xf32> to vector<8x32xf32>
    %218 = vector.shape_cast %215 : vector<8x32xf32> to vector<1x8x32xf32>
    tpu.vector_store %arg12[%c0_131, %c0_132, %c0_133], %218 {strides = array<i32>} : memref<1x8x32xf32, #tpu.memory_space<vmem>>, vector<1x8x32xf32>,
    return
  }
  func.func @transform_0(%arg0: i32) -> (i32, i32, i32) {
    %c0_i32 = arith.constant 0 : i32
    %c0_i32_0 = arith.constant 0 : i32
    %c0_i32_1 = arith.constant 0 : i32
    return %arg0, %c0_i32, %c0_i32_0 : i32, i32, i32
  }
  func.func @transform_1(%arg0: i32) -> (i32, i32, i32) {
    %c0_i32 = arith.constant 0 : i32
    %c0_i32_0 = arith.constant 0 : i32
    %c0_i32_1 = arith.constant 0 : i32
    %c0_i32_2 = arith.constant 0 : i32
    return %c0_i32, %c0_i32_0, %c0_i32_1 : i32, i32, i32
  }
  func.func @transform_2(%arg0: i32) -> (i32, i32, i32) {
    %c0_i32 = arith.constant 0 : i32
    %c0_i32_0 = arith.constant 0 : i32
    %c0_i32_1 = arith.constant 0 : i32
    %c0_i32_2 = arith.constant 0 : i32
    return %c0_i32, %c0_i32_0, %c0_i32_1 : i32, i32, i32
  }
  func.func @transform_3(%arg0: i32) -> (i32, i32, i32) {
    %c0_i32 = arith.constant 0 : i32
    %c0_i32_0 = arith.constant 0 : i32
    %c0_i32_1 = arith.constant 0 : i32
    %c0_i32_2 = arith.constant 0 : i32
    return %c0_i32, %c0_i32_0, %c0_i32_1 : i32, i32, i32
  }
  func.func @transform_4(%arg0: i32) -> (i32, i32, i32) {
    %c0_i32 = arith.constant 0 : i32
    %c0_i32_0 = arith.constant 0 : i32
    %c0_i32_1 = arith.constant 0 : i32
    %c0_i32_2 = arith.constant 0 : i32
    return %c0_i32, %c0_i32_0, %c0_i32_1 : i32, i32, i32
  }
  func.func @transform_5(%arg0: i32) -> (i32, i32, i32) {
    %c0_i32 = arith.constant 0 : i32
    %c0_i32_0 = arith.constant 0 : i32
    %c0_i32_1 = arith.constant 0 : i32
    %c0_i32_2 = arith.constant 0 : i32
    return %c0_i32, %c0_i32_0, %c0_i32_1 : i32, i32, i32
  }
  func.func @transform_6(%arg0: i32) -> (i32, i32, i32) {
    %c0_i32 = arith.constant 0 : i32
    %c0_i32_0 = arith.constant 0 : i32
    %c0_i32_1 = arith.constant 0 : i32
    %c0_i32_2 = arith.constant 0 : i32
    return %c0_i32, %c0_i32_0, %c0_i32_1 : i32, i32, i32
  }
  func.func @transform_7(%arg0: i32) -> (i32, i32, i32) {
    %c0_i32 = arith.constant 0 : i32
    %c0_i32_0 = arith.constant 0 : i32
    %c0_i32_1 = arith.constant 0 : i32
    %c0_i32_2 = arith.constant 0 : i32
    return %c0_i32, %c0_i32_0, %c0_i32_1 : i32, i32, i32
  }
  func.func @transform_8(%arg0: i32) -> (i32, i32) {
    %c0_i32 = arith.constant 0 : i32
    %c0_i32_0 = arith.constant 0 : i32
    %c0_i32_1 = arith.constant 0 : i32
    return %c0_i32, %c0_i32_0 : i32, i32
  }
  func.func @transform_9(%arg0: i32) -> (i32, i32) {
    %c0_i32 = arith.constant 0 : i32
    %c0_i32_0 = arith.constant 0 : i32
    %c0_i32_1 = arith.constant 0 : i32
    return %c0_i32, %c0_i32_0 : i32, i32
  }
  func.func @transform_10(%arg0: i32) -> (i32, i32) {
    %c0_i32 = arith.constant 0 : i32
    %c0_i32_0 = arith.constant 0 : i32
    %c0_i32_1 = arith.constant 0 : i32
    return %c0_i32, %c0_i32_0 : i32, i32
  }
  func.func @transform_11(%arg0: i32) -> (i32, i32, i32) {
    %c0_i32 = arith.constant 0 : i32
    %c0_i32_0 = arith.constant 0 : i32
    %c0_i32_1 = arith.constant 0 : i32
    return %arg0, %c0_i32, %c0_i32_0 : i32, i32, i32
  }
}

module attributes {stable_mosaic.version = 11 : i64} {
  func.func @_ffn_ln_kernel(%arg0: i32, %arg1: memref<16x32xf32, #tpu.memory_space<vmem>>, %arg2: memref<32x64xbf16, #tpu.memory_space<vmem>>, %arg3: memref<1x64xf32, #tpu.memory_space<vmem>>, %arg4: memref<64x32xbf16, #tpu.memory_space<vmem>>, %arg5: memref<1x32xf32, #tpu.memory_space<vmem>>, %arg6: memref<1x32xf32, #tpu.memory_space<vmem>>, %arg7: memref<1x32xf32, #tpu.memory_space<vmem>>, %arg8: memref<16x32xf32, #tpu.memory_space<vmem>>) attributes {dimension_semantics = [#tpu.dimension_semantics<parallel>], iteration_bounds = array<i64: 1>, scalar_prefetch = 0 : i64, scratch_operands = 0 : i64, tpu.core_type = #tpu.core_type<tc>, window_params = [{transform_indices = @transform_0, window_bounds = array<i64: 16, 32>}, {pipeline_mode = #tpu.pipeline_mode<synchronous>, transform_indices = @transform_1, window_bounds = array<i64: 32, 64>}, {pipeline_mode = #tpu.pipeline_mode<synchronous>, transform_indices = @transform_2, window_bounds = array<i64: 1, 64>}, {pipeline_mode = #tpu.pipeline_mode<synchronous>, transform_indices = @transform_3, window_bounds = array<i64: 64, 32>}, {pipeline_mode = #tpu.pipeline_mode<synchronous>, transform_indices = @transform_4, window_bounds = array<i64: 1, 32>}, {pipeline_mode = #tpu.pipeline_mode<synchronous>, transform_indices = @transform_5, window_bounds = array<i64: 1, 32>}, {pipeline_mode = #tpu.pipeline_mode<synchronous>, transform_indices = @transform_6, window_bounds = array<i64: 1, 32>}, {transform_indices = @transform_7, window_bounds = array<i64: 16, 32>}]} {
    %c0 = arith.constant 0 : index
    %c0_0 = arith.constant 0 : index
    %0 = vector.load %arg1[%c0, %c0_0] : memref<16x32xf32, #tpu.memory_space<vmem>>, vector<16x32xf32>
    %1 = arith.truncf %0 : vector<16x32xf32> to vector<16x32xbf16>
    %c0_1 = arith.constant 0 : index
    %c0_2 = arith.constant 0 : index
    %2 = vector.load %arg2[%c0_1, %c0_2] : memref<32x64xbf16, #tpu.memory_space<vmem>>, vector<32x64xbf16>
    %cst = arith.constant dense<0.000000e+00> : vector<16x64xf32>
    %3 = tpu.matmul %1, %2, %cst {dimension_numbers = #tpu.dot_dimension_numbers<[1], [0], [0], [1], [0, 0, 1, 1], [], []>} : vector<16x32xbf16>, vector<32x64xbf16>, vector<16x64xf32> -> vector<16x64xf32>
    %c0_3 = arith.constant 0 : index
    %c0_4 = arith.constant 0 : index
    %4 = vector.load %arg3[%c0_3, %c0_4] : memref<1x64xf32, #tpu.memory_space<vmem>>, vector<1x64xf32>
    %5 = vector.broadcast %4 : vector<1x64xf32> to vector<16x64xf32>
    %6 = arith.addf %3, %5 : vector<16x64xf32>
    %cst_5 = arith.constant 0.000000e+00 : f32
    %7 = vector.broadcast %cst_5 : f32 to vector<16x64xf32>
    %8 = arith.maximumf %6, %7 : vector<16x64xf32>
    %9 = arith.truncf %8 : vector<16x64xf32> to vector<16x64xbf16>
    %c0_6 = arith.constant 0 : index
    %c0_7 = arith.constant 0 : index
    %10 = vector.load %arg4[%c0_6, %c0_7] : memref<64x32xbf16, #tpu.memory_space<vmem>>, vector<64x32xbf16>
    %cst_8 = arith.constant dense<0.000000e+00> : vector<16x32xf32>
    %11 = tpu.matmul %9, %10, %cst_8 {dimension_numbers = #tpu.dot_dimension_numbers<[1], [0], [0], [1], [0, 0, 1, 1], [], []>} : vector<16x64xbf16>, vector<64x32xbf16>, vector<16x32xf32> -> vector<16x32xf32>
    %c0_9 = arith.constant 0 : index
    %c0_10 = arith.constant 0 : index
    %12 = vector.load %arg5[%c0_9, %c0_10] : memref<1x32xf32, #tpu.memory_space<vmem>>, vector<1x32xf32>
    %13 = vector.broadcast %12 : vector<1x32xf32> to vector<16x32xf32>
    %14 = arith.addf %11, %13 : vector<16x32xf32>
    %15 = arith.addf %14, %0 : vector<16x32xf32>
    %c0_11 = arith.constant 0 : index
    %c0_12 = arith.constant 0 : index
    %16 = vector.load %arg6[%c0_11, %c0_12] : memref<1x32xf32, #tpu.memory_space<vmem>>, vector<1x32xf32>
    %c0_13 = arith.constant 0 : index
    %c0_14 = arith.constant 0 : index
    %17 = vector.load %arg7[%c0_13, %c0_14] : memref<1x32xf32, #tpu.memory_space<vmem>>, vector<1x32xf32>
    %cst_15 = arith.constant dense<0.000000e+00> : vector<16xf32>
    %18 = vector.multi_reduction <add>, %15, %cst_15 [1] : vector<16x32xf32> to vector<16xf32>
    %19 = vector.shape_cast %18 : vector<16xf32> to vector<16x1xf32>
    %cst_16 = arith.constant 3.200000e+01 : f32
    %20 = vector.broadcast %cst_16 : f32 to vector<16x1xf32>
    %21 = arith.divf %19, %20 : vector<16x1xf32>
    %22 = vector.broadcast %21 : vector<16x1xf32> to vector<16x32xf32>
    %23 = arith.subf %15, %22 : vector<16x32xf32>
    %24 = arith.mulf %23, %23 : vector<16x32xf32>
    %cst_17 = arith.constant dense<0.000000e+00> : vector<16xf32>
    %25 = vector.multi_reduction <add>, %24, %cst_17 [1] : vector<16x32xf32> to vector<16xf32>
    %26 = vector.shape_cast %25 : vector<16xf32> to vector<16x1xf32>
    %cst_18 = arith.constant 3.200000e+01 : f32
    %27 = vector.broadcast %cst_18 : f32 to vector<16x1xf32>
    %28 = arith.divf %26, %27 : vector<16x1xf32>
    %29 = vector.broadcast %21 : vector<16x1xf32> to vector<16x32xf32>
    %30 = arith.subf %15, %29 : vector<16x32xf32>
    %cst_19 = arith.constant 9.99999974E-6 : f32
    %31 = vector.broadcast %cst_19 : f32 to vector<16x1xf32>
    %32 = arith.addf %28, %31 : vector<16x1xf32>
    %33 = math.rsqrt %32 : vector<16x1xf32>
    %34 = vector.broadcast %33 : vector<16x1xf32> to vector<16x32xf32>
    %35 = arith.mulf %30, %34 : vector<16x32xf32>
    %36 = vector.broadcast %16 : vector<1x32xf32> to vector<16x32xf32>
    %37 = arith.mulf %35, %36 : vector<16x32xf32>
    %38 = vector.broadcast %17 : vector<1x32xf32> to vector<16x32xf32>
    %39 = arith.addf %37, %38 : vector<16x32xf32>
    %c0_20 = arith.constant 0 : index
    %c0_21 = arith.constant 0 : index
    %40 = vector.load %arg8[%c0_20, %c0_21] : memref<16x32xf32, #tpu.memory_space<vmem>>, vector<16x32xf32>
    tpu.vector_store %arg8[%c0_20, %c0_21], %39 {strides = array<i32>} : memref<16x32xf32, #tpu.memory_space<vmem>>, vector<16x32xf32>,
    return
  }
  func.func @transform_0(%arg0: i32) -> (i32, i32) {
    %c0_i32 = arith.constant 0 : i32
    %c0_i32_0 = arith.constant 0 : i32
    return %arg0, %c0_i32 : i32, i32
  }
  func.func @transform_1(%arg0: i32) -> (i32, i32) {
    %c0_i32 = arith.constant 0 : i32
    %c0_i32_0 = arith.constant 0 : i32
    %c0_i32_1 = arith.constant 0 : i32
    return %c0_i32, %c0_i32_0 : i32, i32
  }
  func.func @transform_2(%arg0: i32) -> (i32, i32) {
    %c0_i32 = arith.constant 0 : i32
    %c0_i32_0 = arith.constant 0 : i32
    %c0_i32_1 = arith.constant 0 : i32
    return %c0_i32, %c0_i32_0 : i32, i32
  }
  func.func @transform_3(%arg0: i32) -> (i32, i32) {
    %c0_i32 = arith.constant 0 : i32
    %c0_i32_0 = arith.constant 0 : i32
    %c0_i32_1 = arith.constant 0 : i32
    return %c0_i32, %c0_i32_0 : i32, i32
  }
  func.func @transform_4(%arg0: i32) -> (i32, i32) {
    %c0_i32 = arith.constant 0 : i32
    %c0_i32_0 = arith.constant 0 : i32
    %c0_i32_1 = arith.constant 0 : i32
    return %c0_i32, %c0_i32_0 : i32, i32
  }
  func.func @transform_5(%arg0: i32) -> (i32, i32) {
    %c0_i32 = arith.constant 0 : i32
    %c0_i32_0 = arith.constant 0 : i32
    %c0_i32_1 = arith.constant 0 : i32
    return %c0_i32, %c0_i32_0 : i32, i32
  }
  func.func @transform_6(%arg0: i32) -> (i32, i32) {
    %c0_i32 = arith.constant 0 : i32
    %c0_i32_0 = arith.constant 0 : i32
    %c0_i32_1 = arith.constant 0 : i32
    return %c0_i32, %c0_i32_0 : i32, i32
  }
  func.func @transform_7(%arg0: i32) -> (i32, i32) {
    %c0_i32 = arith.constant 0 : i32
    %c0_i32_0 = arith.constant 0 : i32
    return %arg0, %c0_i32 : i32, i32
  }
}

module attributes {stable_mosaic.version = 11 : i64} {
  func.func @_ffn_ln_kernel(%arg0: i32, %arg1: memref<16x32xf32, #tpu.memory_space<vmem>>, %arg2: memref<32x64xbf16, #tpu.memory_space<vmem>>, %arg3: memref<1x64xf32, #tpu.memory_space<vmem>>, %arg4: memref<64x32xbf16, #tpu.memory_space<vmem>>, %arg5: memref<1x32xf32, #tpu.memory_space<vmem>>, %arg6: memref<1x32xf32, #tpu.memory_space<vmem>>, %arg7: memref<1x32xf32, #tpu.memory_space<vmem>>, %arg8: memref<16x32xf32, #tpu.memory_space<vmem>>) attributes {dimension_semantics = [#tpu.dimension_semantics<parallel>], iteration_bounds = array<i64: 1>, scalar_prefetch = 0 : i64, scratch_operands = 0 : i64, tpu.core_type = #tpu.core_type<tc>, window_params = [{transform_indices = @transform_0, window_bounds = array<i64: 16, 32>}, {pipeline_mode = #tpu.pipeline_mode<synchronous>, transform_indices = @transform_1, window_bounds = array<i64: 32, 64>}, {pipeline_mode = #tpu.pipeline_mode<synchronous>, transform_indices = @transform_2, window_bounds = array<i64: 1, 64>}, {pipeline_mode = #tpu.pipeline_mode<synchronous>, transform_indices = @transform_3, window_bounds = array<i64: 64, 32>}, {pipeline_mode = #tpu.pipeline_mode<synchronous>, transform_indices = @transform_4, window_bounds = array<i64: 1, 32>}, {pipeline_mode = #tpu.pipeline_mode<synchronous>, transform_indices = @transform_5, window_bounds = array<i64: 1, 32>}, {pipeline_mode = #tpu.pipeline_mode<synchronous>, transform_indices = @transform_6, window_bounds = array<i64: 1, 32>}, {transform_indices = @transform_7, window_bounds = array<i64: 16, 32>}]} {
    %c0 = arith.constant 0 : index
    %c0_0 = arith.constant 0 : index
    %0 = vector.load %arg1[%c0, %c0_0] : memref<16x32xf32, #tpu.memory_space<vmem>>, vector<16x32xf32>
    %1 = arith.truncf %0 : vector<16x32xf32> to vector<16x32xbf16>
    %c0_1 = arith.constant 0 : index
    %c0_2 = arith.constant 0 : index
    %2 = vector.load %arg2[%c0_1, %c0_2] : memref<32x64xbf16, #tpu.memory_space<vmem>>, vector<32x64xbf16>
    %cst = arith.constant dense<0.000000e+00> : vector<16x64xf32>
    %3 = tpu.matmul %1, %2, %cst {dimension_numbers = #tpu.dot_dimension_numbers<[1], [0], [0], [1], [0, 0, 1, 1], [], []>} : vector<16x32xbf16>, vector<32x64xbf16>, vector<16x64xf32> -> vector<16x64xf32>
    %c0_3 = arith.constant 0 : index
    %c0_4 = arith.constant 0 : index
    %4 = vector.load %arg3[%c0_3, %c0_4] : memref<1x64xf32, #tpu.memory_space<vmem>>, vector<1x64xf32>
    %5 = vector.broadcast %4 : vector<1x64xf32> to vector<16x64xf32>
    %6 = arith.addf %3, %5 : vector<16x64xf32>
    %cst_5 = arith.constant 0.000000e+00 : f32
    %7 = vector.broadcast %cst_5 : f32 to vector<16x64xf32>
    %8 = arith.maximumf %6, %7 : vector<16x64xf32>
    %9 = arith.truncf %8 : vector<16x64xf32> to vector<16x64xbf16>
    %c0_6 = arith.constant 0 : index
    %c0_7 = arith.constant 0 : index
    %10 = vector.load %arg4[%c0_6, %c0_7] : memref<64x32xbf16, #tpu.memory_space<vmem>>, vector<64x32xbf16>
    %cst_8 = arith.constant dense<0.000000e+00> : vector<16x32xf32>
    %11 = tpu.matmul %9, %10, %cst_8 {dimension_numbers = #tpu.dot_dimension_numbers<[1], [0], [0], [1], [0, 0, 1, 1], [], []>} : vector<16x64xbf16>, vector<64x32xbf16>, vector<16x32xf32> -> vector<16x32xf32>
    %c0_9 = arith.constant 0 : index
    %c0_10 = arith.constant 0 : index
    %12 = vector.load %arg5[%c0_9, %c0_10] : memref<1x32xf32, #tpu.memory_space<vmem>>, vector<1x32xf32>
    %13 = vector.broadcast %12 : vector<1x32xf32> to vector<16x32xf32>
    %14 = arith.addf %11, %13 : vector<16x32xf32>
    %15 = arith.addf %14, %0 : vector<16x32xf32>
    %c0_11 = arith.constant 0 : index
    %c0_12 = arith.constant 0 : index
    %16 = vector.load %arg6[%c0_11, %c0_12] : memref<1x32xf32, #tpu.memory_space<vmem>>, vector<1x32xf32>
    %c0_13 = arith.constant 0 : index
    %c0_14 = arith.constant 0 : index
    %17 = vector.load %arg7[%c0_13, %c0_14] : memref<1x32xf32, #tpu.memory_space<vmem>>, vector<1x32xf32>
    %cst_15 = arith.constant dense<0.000000e+00> : vector<16xf32>
    %18 = vector.multi_reduction <add>, %15, %cst_15 [1] : vector<16x32xf32> to vector<16xf32>
    %19 = vector.shape_cast %18 : vector<16xf32> to vector<16x1xf32>
    %cst_16 = arith.constant 3.200000e+01 : f32
    %20 = vector.broadcast %cst_16 : f32 to vector<16x1xf32>
    %21 = arith.divf %19, %20 : vector<16x1xf32>
    %22 = vector.broadcast %21 : vector<16x1xf32> to vector<16x32xf32>
    %23 = arith.subf %15, %22 : vector<16x32xf32>
    %24 = arith.mulf %23, %23 : vector<16x32xf32>
    %cst_17 = arith.constant dense<0.000000e+00> : vector<16xf32>
    %25 = vector.multi_reduction <add>, %24, %cst_17 [1] : vector<16x32xf32> to vector<16xf32>
    %26 = vector.shape_cast %25 : vector<16xf32> to vector<16x1xf32>
    %cst_18 = arith.constant 3.200000e+01 : f32
    %27 = vector.broadcast %cst_18 : f32 to vector<16x1xf32>
    %28 = arith.divf %26, %27 : vector<16x1xf32>
    %29 = vector.broadcast %21 : vector<16x1xf32> to vector<16x32xf32>
    %30 = arith.subf %15, %29 : vector<16x32xf32>
    %cst_19 = arith.constant 9.99999974E-6 : f32
    %31 = vector.broadcast %cst_19 : f32 to vector<16x1xf32>
    %32 = arith.addf %28, %31 : vector<16x1xf32>
    %33 = math.rsqrt %32 : vector<16x1xf32>
    %34 = vector.broadcast %33 : vector<16x1xf32> to vector<16x32xf32>
    %35 = arith.mulf %30, %34 : vector<16x32xf32>
    %36 = vector.broadcast %16 : vector<1x32xf32> to vector<16x32xf32>
    %37 = arith.mulf %35, %36 : vector<16x32xf32>
    %38 = vector.broadcast %17 : vector<1x32xf32> to vector<16x32xf32>
    %39 = arith.addf %37, %38 : vector<16x32xf32>
    %c0_20 = arith.constant 0 : index
    %c0_21 = arith.constant 0 : index
    %40 = vector.load %arg8[%c0_20, %c0_21] : memref<16x32xf32, #tpu.memory_space<vmem>>, vector<16x32xf32>
    tpu.vector_store %arg8[%c0_20, %c0_21], %39 {strides = array<i32>} : memref<16x32xf32, #tpu.memory_space<vmem>>, vector<16x32xf32>,
    return
  }
  func.func @transform_0(%arg0: i32) -> (i32, i32) {
    %c0_i32 = arith.constant 0 : i32
    %c0_i32_0 = arith.constant 0 : i32
    return %arg0, %c0_i32 : i32, i32
  }
  func.func @transform_1(%arg0: i32) -> (i32, i32) {
    %c0_i32 = arith.constant 0 : i32
    %c0_i32_0 = arith.constant 0 : i32
    %c0_i32_1 = arith.constant 0 : i32
    return %c0_i32, %c0_i32_0 : i32, i32
  }
  func.func @transform_2(%arg0: i32) -> (i32, i32) {
    %c0_i32 = arith.constant 0 : i32
    %c0_i32_0 = arith.constant 0 : i32
    %c0_i32_1 = arith.constant 0 : i32
    return %c0_i32, %c0_i32_0 : i32, i32
  }
  func.func @transform_3(%arg0: i32) -> (i32, i32) {
    %c0_i32 = arith.constant 0 : i32
    %c0_i32_0 = arith.constant 0 : i32
    %c0_i32_1 = arith.constant 0 : i32
    return %c0_i32, %c0_i32_0 : i32, i32
  }
  func.func @transform_4(%arg0: i32) -> (i32, i32) {
    %c0_i32 = arith.constant 0 : i32
    %c0_i32_0 = arith.constant 0 : i32
    %c0_i32_1 = arith.constant 0 : i32
    return %c0_i32, %c0_i32_0 : i32, i32
  }
  func.func @transform_5(%arg0: i32) -> (i32, i32) {
    %c0_i32 = arith.constant 0 : i32
    %c0_i32_0 = arith.constant 0 : i32
    %c0_i32_1 = arith.constant 0 : i32
    return %c0_i32, %c0_i32_0 : i32, i32
  }
  func.func @transform_6(%arg0: i32) -> (i32, i32) {
    %c0_i32 = arith.constant 0 : i32
    %c0_i32_0 = arith.constant 0 : i32
    %c0_i32_1 = arith.constant 0 : i32
    return %c0_i32, %c0_i32_0 : i32, i32
  }
  func.func @transform_7(%arg0: i32) -> (i32, i32) {
    %c0_i32 = arith.constant 0 : i32
    %c0_i32_0 = arith.constant 0 : i32
    return %arg0, %c0_i32 : i32, i32
  }
}

</mosaic_0001>

<bundles_post_ra>
// kernel: context_knowledge_decoder.11
= control target key start
LH: loop header
LB: loop body
LE: loop exit
PB: predicated region body
PF: predicated region fallthrough
CT: control target
= control target key end

     0   :  { %s373_s0 = inlined_call_operand.vmem [shape: f32[16,32], index: 0, kind: input, shape index: {}]   ;;  %s374_s1 = inlined_call_operand.vmem [shape: bf16[32,64], index: 1, kind: input, shape index: {}]   ;;  %s375_s2 = inlined_call_operand.vmem [shape: f32[1,64], index: 2, kind: input, shape index: {}]   ;;  %s376_s3 = inlined_call_operand.vmem [shape: bf16[64,32], index: 3, kind: input, shape index: {}]   ;;  %s377_s4 = inlined_call_operand.vmem [shape: f32[1,32], index: 4, kind: input, shape index: {}]   ;;  %s378_s5 = inlined_call_operand.vmem [shape: f32[1,32], index: 5, kind: input, shape index: {}]   ;;  %s379_s6 = inlined_call_operand.vmem [shape: f32[1,32], index: 6, kind: input, shape index: {}]   ;;  %s380_s7 = inlined_call_operand.hbm [shape: f32[16,32], index: 7, kind: output, shape index: {}]  }
   0x1   :  { %v238_v0 = vld [vmem:[%s374_s1 + $0x8] sm:$0xff]  ;;  %v237_v1 = vld [vmem:[%s374_s1] sm:$0xff] }
   0x2   :  { %v28_v2 = vld [vmem:[%s373_s0] sm:$0xff]  ;;  %v29_v3 = vld [vmem:[%s373_s0 + $0x8] sm:$0xff]  ;;  %61 = vmatpush.bf16.msra.mxu0 %v238_v0 }
   0x3   :  { %12 = vsyncpa [#allocation3], 0  ;;  %v30_v4 = vpack.c.bf16 %v29_v3, %v28_v2  ;;  %vm51_vm0 = vcmask 261120   ;;  %v242_v5 = vld [vmem:[%s376_s3 + $0x18] sm:$0xff]  ;;  %v241_v6 = vld [vmem:[%s376_s3 + $0x10] sm:$0xff]  ;;  %vm108_vm1 = vcmask 523264  }
   0x4   :  { %116 = vmatpush.bf16.msra.mxu1 %v242_v5  ;;  %v240_v7 = vld [vmem:[%s376_s3 + $0x8] sm:$0xff]  ;;  %v239_v8 = vld [vmem:[%s376_s3] sm:$0xff]  ;;  %v283_v26 = vmov 32.0   ;;  %s199_s23 = sshll.u32 %s380_s7, 4  ;;  %s286_s24 = smov 8   ;;  %s200_s23 = int_to_ptr.hbm [resolvable:$true] %s199_s23 }
   0x5   :  { %v247_v10 = vld [vmem:[%s375_s2] ss:$0 sm:$0xff]  ;;  %251 = vrcp.f32 %v283_v26 }
   0x6   :  { %62 = vmatpush.bf16.msra.mxu0 %v237_v1  ;;  %v248_v17 = vld [vmem:[%s377_s4] ss:$0 sm:$0xff] }
   0x7   :  { %v249_v57 = vld [vmem:[%s378_s5] ss:$0 sm:$0xff]  ;;  %s284_s5 = smov [#allocation2]  }
   0x8   :  { %117 = vmatpush.bf16.msra.mxu1 %v241_v6  ;;  %v250_v61 = vld [vmem:[%s379_s6] ss:$0 sm:$0xff]  ;;  %s197_s20 = sshll.u32 %s284_s5, 4  ;;  %s285_s6 = smov 128   ;;  %s198_s20 = int_to_ptr.vmem [resolvable:$true] %s197_s20 }
   0x9   :  { %219 = vmatmul.msk.bf16.vlgmr.msra.gmra.mxu0 %vm51_vm0, %v30_v4 }
   0xb   :  { %v252_v27 = vpop.eup %251 }
   0xc   :  { %118 = vmatpush.bf16.msra.mxu1 %v240_v7  ;;  %v137_v28 = vmul.f32 32.0, %v252_v27  ;;  %vm141_vm2 = vweird.f32 %v252_v27 }
   0xe   :  { %v138_v29 = vsub.f32 1.0, %v137_v28 }
  0x10   :  { %119 = vmatpush.bf16.msra.mxu1 %v239_v8  ;;  %v139_v30 = vmul.f32 %v252_v27, %v138_v29 }
  0x12   :  { %v140_v31 = vadd.f32 %v252_v27, %v139_v30 }
  0x14   :  { %v142_v32 = vsel %vm141_vm2, %v252_v27, %v140_v31 }
  0x86   :  { %v64_v9 = vpop.f32.mrf.mxu0 }
  0x87   :  { %v65_v11 = vadd.f32 %v247_v10, %v64_v9 }
  0x89   :  { %v69_v14 = vmax.f32 %v65_v11, 0.0 }
  0x8e   :  { %v66_v12 = vpop.f32.mrf.mxu0 }
  0x8f   :  { %v67_v13 = vadd.f32 %v247_v10, %v66_v12 }
  0x91   :  { %v70_v15 = vmax.f32 %v67_v13, 0.0 }
  0x93   :  { %v71_v16 = vpack.c.bf16 %v70_v15, %v69_v14 }
  0x95   :  { %236 = vmatmul.msk.bf16.vlgmr.msra.gmra.mxu1 %vm108_vm1, %v71_v16 }
 0x112   :  { %v121_v18 = vpop.f32.mrf.mxu1 }
 0x113   :  { %v122_v19 = vadd.f32 %v248_v17, %v121_v18 }
 0x115   :  { %v126_v20 = vadd.f32 %v122_v19, %v28_v2 }
 0x117   :  { %v130_v21 = vsel %vm51_vm0, %v126_v20, 0.0 }
 0x118   :  { %131 = vadd.xlane.f32.xlu0 %v130_v21 }
 0x11a   :  { %v123_v22 = vpop.f32.mrf.mxu1 }
 0x11b   :  { %v124_v23 = vadd.f32 %v248_v17, %v123_v22 }
 0x11d   :  { %v127_v24 = vadd.f32 %v124_v23, %v29_v3 }
 0x11f   :  { %v133_v25 = vsel %vm51_vm0, %v127_v24, 0.0 }
 0x120   :  { %134 = vadd.xlane.f32.xlu0 %v133_v25 }
 0x18b   :  { %v132_v33 = vpop.xlane.xlu0 %131 }
 0x18c   :  { %v143_v34 = vmul.f32 %v142_v32, %v132_v33 }
 0x18e   :  { %v145_v35 = vsub.f32 %v126_v20, %v143_v34 }
 0x190   :  { %v147_v36 = vmul.f32 %v145_v35, %v145_v35 }
 0x192   :  { %v149_v37 = vsel %vm51_vm0, %v147_v36, 0.0 }
 0x193   :  { %150 = vadd.xlane.f32.xlu1 %v149_v37  ;;  %v135_v38 = vpop.xlane.xlu0 %134 }
 0x194   :  { %v144_v39 = vmul.f32 %v142_v32, %v135_v38 }
 0x196   :  { %v146_v40 = vsub.f32 %v127_v24, %v144_v39 }
 0x198   :  { %v148_v41 = vmul.f32 %v146_v40, %v146_v40 }
 0x19a   :  { %v152_v42 = vsel %vm51_vm0, %v148_v41, 0.0 }
 0x19b   :  { %153 = vadd.xlane.f32.xlu1 %v152_v42 }
 0x206   :  { %v151_v43 = vpop.xlane.xlu1 %150 }
 0x207   :  { %v155_v44 = vmul.f32 %v151_v43, %v142_v32 }
 0x209   :  { %v157_v45 = vadd.f32 1e-05, %v155_v44 }
 0x20b   :  { %253 = vrsqrt.f32 %v157_v45  ;;  %vm165_vm4 = vweird.f32 %v157_v45 }
 0x20e   :  { %v154_v46 = vpop.xlane.xlu1 %153 }
 0x20f   :  { %v156_v47 = vmul.f32 %v154_v46, %v142_v32 }
 0x211   :  { %v254_v48 = vpop.eup %253  ;;  %v158_v49 = vadd.f32 1e-05, %v156_v47 }
 0x212   :  { %v160_v50 = vmul.f32 %v254_v48, %v157_v45  ;;  %vm166_vm3 = vweird.f32 %v254_v48 }
 0x213   :  { %255 = vrsqrt.f32 %v158_v49  ;;  %vm167_vm5 = vmor %vm165_vm4, %vm166_vm3  ;;  %vm175_vm7 = vweird.f32 %v158_v49 }
 0x214   :  { %v161_v51 = vmul.f32 %v254_v48, %v160_v50 }
 0x216   :  { %v162_v52 = vmul.f32 0.5, %v161_v51 }
 0x218   :  { %v163_v53 = vsub.f32 1.5, %v162_v52 }
 0x219   :  { %v256_v54 = vpop.eup %255 }
 0x21a   :  { %v164_v55 = vmul.f32 %v254_v48, %v163_v53  ;;  %v170_v56 = vmul.f32 %v256_v54, %v158_v49  ;;  %vm176_vm6 = vweird.f32 %v256_v54 }
 0x21b   :  { %vm177_vm8 = vmor %vm175_vm7, %vm176_vm6 }
 0x21c   :  { %v168_v58 = vsel %vm167_vm5, %v254_v48, %v164_v55  ;;  %v171_v59 = vmul.f32 %v256_v54, %v170_v56 }
 0x21d   :  { %v179_v60 = vmul.f32 %v168_v58, %v145_v35 }
 0x21e   :  { %v172_v62 = vmul.f32 0.5, %v171_v59 }
 0x21f   :  { %v184_v63 = vmul.f32 %v249_v57, %v179_v60 }
 0x220   :  { %v173_v0 = vsub.f32 1.5, %v172_v62 }
 0x221   :  { %v189_v1 = vadd.f32 %v250_v61, %v184_v63 }
 0x222   :  { %v174_v2 = vmul.f32 %v256_v54, %v173_v0 }
 0x223   :  { %191 = vst.msk [vmem:[#allocation2] sm:$0xff] %vm51_vm0, %v189_v1 }
 0x224   :  { %v178_v3 = vsel %vm177_vm8, %v256_v54, %v174_v2 }
 0x225   :  { %v180_v4 = vmul.f32 %v178_v3, %v146_v40 }
 0x227   :  { %v185_v5 = vmul.f32 %v249_v57, %v180_v4 }
 0x229   :  { %v190_v6 = vadd.f32 %v250_v61, %v185_v5 }
 0x22b   :  { %192 = vst.msk [vmem:[#allocation2 + $0x8] sm:$0xff] %vm51_vm0, %v190_v6 }
 0x22c   :  { %205 = dma.vmem_to_hbm [thread:$0]  %s198_s20, 256, %s200_s23, [#allocation3], %s285_s6, %s285_s6, %s286_s24  }
 0x22d   :  { %281 = dma.done.wait [#allocation3], 256  }
 0x22e   :  { %282 = vsyncadd [#allocation3], 4294967040 }
 0x22f   :  { %210 = vsyncpa [#allocation3], 1 }

// kernel: context_knowledge_decoder.8
= control target key start
LH: loop header
LB: loop body
LE: loop exit
PB: predicated region body
PF: predicated region fallthrough
CT: control target
= control target key end

     0   :  { %vm50_vm0 = vcmask 261120   ;;  %vm107_vm1 = vcmask 523264   ;;  %v239_v26 = vmov 32.0   ;;  %s329_s1 = inlined_call_operand.vmem [shape: bf16[32,64], index: 1, kind: input, shape index: {}]   ;;  %s330_s0 = inlined_call_operand.vmem [shape: f32[16,32], index: 0, kind: input, shape index: {}]   ;;  %s331_s2 = inlined_call_operand.vmem [shape: f32[1,64], index: 2, kind: input, shape index: {}]   ;;  %s332_s4 = inlined_call_operand.vmem [shape: f32[1,32], index: 4, kind: input, shape index: {}]   ;;  %s333_s3 = inlined_call_operand.vmem [shape: bf16[64,32], index: 3, kind: input, shape index: {}]   ;;  %s334_s5 = inlined_call_operand.vmem [shape: f32[1,32], index: 5, kind: input, shape index: {}]   ;;  %s335_s6 = inlined_call_operand.vmem [shape: f32[1,32], index: 6, kind: input, shape index: {}]   ;;  %s336_s7 = inlined_call_operand.vmem [shape: f32[16,32], index: 7, kind: output, shape index: {}]  }
   0x1   :  { %v223_v0 = vld [vmem:[%s329_s1 + $0x8] sm:$0xff]  ;;  %v222_v1 = vld [vmem:[%s329_s1] sm:$0xff]  ;;  %v227_v5 = vld [vmem:[%s333_s3 + $0x18] sm:$0xff]  ;;  %233 = vrcp.f32 %v239_v26 }
   0x2   :  { %60 = vmatpush.bf16.msra.mxu0 %v223_v0  ;;  %v27_v2 = vld [vmem:[%s330_s0] sm:$0xff]  ;;  %v28_v3 = vld [vmem:[%s330_s0 + $0x8] sm:$0xff]  ;;  %115 = vmatpush.bf16.msra.mxu1 %v227_v5  ;;  %v226_v6 = vld [vmem:[%s333_s3 + $0x10] sm:$0xff] }
   0x3   :  { %v29_v4 = vpack.c.bf16 %v28_v3, %v27_v2  ;;  %v225_v7 = vld [vmem:[%s333_s3 + $0x8] sm:$0xff]  ;;  %v224_v8 = vld [vmem:[%s333_s3] sm:$0xff] }
   0x4   :  { %v229_v10 = vld [vmem:[%s331_s2] ss:$0 sm:$0xff] }
   0x5   :  { %v230_v17 = vld [vmem:[%s332_s4] ss:$0 sm:$0xff] }
   0x6   :  { %61 = vmatpush.bf16.msra.mxu0 %v222_v1  ;;  %116 = vmatpush.bf16.msra.mxu1 %v226_v6  ;;  %v231_v57 = vld [vmem:[%s334_s5] ss:$0 sm:$0xff] }
   0x7   :  { %v234_v27 = vpop.eup %233  ;;  %v232_v60 = vld [vmem:[%s335_s6] ss:$0 sm:$0xff] }
   0x8   :  { %v136_v28 = vmul.f32 32.0, %v234_v27  ;;  %vm140_vm2 = vweird.f32 %v234_v27 }
   0x9   :  { %204 = vmatmul.msk.bf16.vlgmr.msra.gmra.mxu0 %vm50_vm0, %v29_v4 }
   0xa   :  { %117 = vmatpush.bf16.msra.mxu1 %v225_v7  ;;  %v137_v29 = vsub.f32 1.0, %v136_v28 }
   0xc   :  { %v138_v30 = vmul.f32 %v234_v27, %v137_v29 }
   0xe   :  { %118 = vmatpush.bf16.msra.mxu1 %v224_v8  ;;  %v139_v31 = vadd.f32 %v234_v27, %v138_v30 }
  0x10   :  { %v141_v32 = vsel %vm140_vm2, %v234_v27, %v139_v31 }
  0x86   :  { %v63_v9 = vpop.f32.mrf.mxu0 }
  0x87   :  { %v64_v11 = vadd.f32 %v229_v10, %v63_v9 }
  0x89   :  { %v68_v14 = vmax.f32 %v64_v11, 0.0 }
  0x8e   :  { %v65_v12 = vpop.f32.mrf.mxu0 }
  0x8f   :  { %v66_v13 = vadd.f32 %v229_v10, %v65_v12 }
  0x91   :  { %v69_v15 = vmax.f32 %v66_v13, 0.0 }
  0x93   :  { %v70_v16 = vpack.c.bf16 %v69_v15, %v68_v14 }
  0x95   :  { %221 = vmatmul.msk.bf16.vlgmr.msra.gmra.mxu1 %vm107_vm1, %v70_v16 }
 0x112   :  { %v120_v18 = vpop.f32.mrf.mxu1 }
 0x113   :  { %v121_v19 = vadd.f32 %v230_v17, %v120_v18 }
 0x115   :  { %v125_v20 = vadd.f32 %v121_v19, %v27_v2 }
 0x117   :  { %v129_v21 = vsel %vm50_vm0, %v125_v20, 0.0 }
 0x118   :  { %130 = vadd.xlane.f32.xlu0 %v129_v21 }
 0x11a   :  { %v122_v22 = vpop.f32.mrf.mxu1 }
 0x11b   :  { %v123_v23 = vadd.f32 %v230_v17, %v122_v22 }
 0x11d   :  { %v126_v24 = vadd.f32 %v123_v23, %v28_v3 }
 0x11f   :  { %v132_v25 = vsel %vm50_vm0, %v126_v24, 0.0 }
 0x120   :  { %133 = vadd.xlane.f32.xlu0 %v132_v25 }
 0x18b   :  { %v131_v33 = vpop.xlane.xlu0 %130 }
 0x18c   :  { %v142_v34 = vmul.f32 %v141_v32, %v131_v33 }
 0x18e   :  { %v144_v35 = vsub.f32 %v125_v20, %v142_v34 }
 0x190   :  { %v146_v36 = vmul.f32 %v144_v35, %v144_v35 }
 0x192   :  { %v148_v37 = vsel %vm50_vm0, %v146_v36, 0.0 }
 0x193   :  { %149 = vadd.xlane.f32.xlu1 %v148_v37  ;;  %v134_v38 = vpop.xlane.xlu0 %133 }
 0x194   :  { %v143_v39 = vmul.f32 %v141_v32, %v134_v38 }
 0x196   :  { %v145_v40 = vsub.f32 %v126_v24, %v143_v39 }
 0x198   :  { %v147_v41 = vmul.f32 %v145_v40, %v145_v40 }
 0x19a   :  { %v151_v42 = vsel %vm50_vm0, %v147_v41, 0.0 }
 0x19b   :  { %152 = vadd.xlane.f32.xlu1 %v151_v42 }
 0x206   :  { %v150_v43 = vpop.xlane.xlu1 %149 }
 0x207   :  { %v154_v44 = vmul.f32 %v150_v43, %v141_v32 }
 0x209   :  { %v156_v45 = vadd.f32 1e-05, %v154_v44 }
 0x20b   :  { %235 = vrsqrt.f32 %v156_v45  ;;  %vm164_vm4 = vweird.f32 %v156_v45 }
 0x20e   :  { %v153_v46 = vpop.xlane.xlu1 %152 }
 0x20f   :  { %v155_v47 = vmul.f32 %v153_v46, %v141_v32 }
 0x211   :  { %v236_v48 = vpop.eup %235  ;;  %v157_v49 = vadd.f32 1e-05, %v155_v47 }
 0x212   :  { %v159_v50 = vmul.f32 %v236_v48, %v156_v45  ;;  %vm165_vm3 = vweird.f32 %v236_v48 }
 0x213   :  { %237 = vrsqrt.f32 %v157_v49  ;;  %vm166_vm5 = vmor %vm164_vm4, %vm165_vm3  ;;  %vm174_vm7 = vweird.f32 %v157_v49 }
 0x214   :  { %v160_v51 = vmul.f32 %v236_v48, %v159_v50 }
 0x216   :  { %v161_v52 = vmul.f32 0.5, %v160_v51 }
 0x218   :  { %v162_v53 = vsub.f32 1.5, %v161_v52 }
 0x219   :  { %v238_v54 = vpop.eup %237 }
 0x21a   :  { %v163_v55 = vmul.f32 %v236_v48, %v162_v53  ;;  %v169_v56 = vmul.f32 %v238_v54, %v157_v49  ;;  %vm175_vm6 = vweird.f32 %v238_v54 }
 0x21b   :  { %vm176_vm8 = vmor %vm174_vm7, %vm175_vm6 }
 0x21c   :  { %v167_v58 = vsel %vm166_vm5, %v236_v48, %v163_v55  ;;  %v170_v59 = vmul.f32 %v238_v54, %v169_v56 }
 0x21d   :  { %v178_v61 = vmul.f32 %v167_v58, %v144_v35 }
 0x21e   :  { %v171_v62 = vmul.f32 0.5, %v170_v59 }
 0x21f   :  { %v183_v63 = vmul.f32 %v231_v57, %v178_v61 }
 0x220   :  { %v172_v0 = vsub.f32 1.5, %v171_v62 }
 0x221   :  { %v188_v1 = vadd.f32 %v232_v60, %v183_v63 }
 0x222   :  { %v173_v2 = vmul.f32 %v238_v54, %v172_v0 }
 0x223   :  { %190 = vst.msk [vmem:[%s336_s7] sm:$0xff] %vm50_vm0, %v188_v1 }
 0x224   :  { %v177_v3 = vsel %vm176_vm8, %v238_v54, %v173_v2 }
 0x225   :  { %v179_v4 = vmul.f32 %v177_v3, %v145_v40 }
 0x227   :  { %v184_v5 = vmul.f32 %v231_v57, %v179_v4 }
 0x229   :  { %v189_v6 = vadd.f32 %v232_v60, %v184_v5 }
 0x22b   :  { %191 = vst.msk [vmem:[%s336_s7 + $0x8] sm:$0xff] %vm50_vm0, %v189_v6 }

// kernel: context_knowledge_decoder.7
= control target key start
LH: loop header
LB: loop body
LE: loop exit
PB: predicated region body
PF: predicated region fallthrough
CT: control target
= control target key end

     0   :  { %s1666_s25 = smov 0   ;;  %s1903_s0 = inlined_call_operand.vmem [shape: f32[2,8,32], index: 0, kind: input, shape index: {}]   ;;  %s1904_s1 = inlined_call_operand.vmem [shape: bf16[2,16,32], index: 1, kind: input, shape index: {}]   ;;  %s1905_s2 = inlined_call_operand.vmem [shape: f32[2,1,16], index: 2, kind: input, shape index: {}]   ;;  %s1906_s3 = inlined_call_operand.vmem [shape: bf16[4,32,8], index: 3, kind: input, shape index: {}]   ;;  %s1907_s4 = inlined_call_operand.vmem [shape: f32[4,1,8], index: 4, kind: input, shape index: {}]   ;;  %s1908_s5 = inlined_call_operand.vmem [shape: bf16[4,32,8], index: 5, kind: input, shape index: {}]   ;;  %s1909_s6 = inlined_call_operand.vmem [shape: f32[4,1,8], index: 6, kind: input, shape index: {}]   ;;  %s1910_s7 = inlined_call_operand.vmem [shape: bf16[4,32,8], index: 7, kind: input, shape index: {}]   ;;  %s1911_s8 = inlined_call_operand.vmem [shape: f32[4,1,8], index: 8, kind: input, shape index: {}]   ;;  %s1912_s9 = inlined_call_operand.vmem [shape: bf16[4,8,32], index: 9, kind: input, shape index: {}]   ;;  %s1913_s10 = inlined_call_operand.vmem [shape: f32[1,32], index: 10, kind: input, shape index: {}]   ;;  %s1914_s11 = inlined_call_operand.vmem [shape: f32[1,32], index: 11, kind: input, shape index: {}]   ;;  %s1915_s12 = inlined_call_operand.vmem [shape: f32[1,32], index: 12, kind: input, shape index: {}]   ;;  %s1916_s13 = inlined_call_operand.vmem [shape: f32[2,8,32], index: 13, kind: output, shape index: {}]  }
   0x1 LB: > { %s1333_s26 = sadd.s32 4294967295, %s1593_s25   ;;  %p1337_p0 = scmp.ge.s32.totalorder %s1593_s25, 1  ;;  %s1593_s25 = sphi %s1666_s25, %s23_s25  }
   0x2   : > { %p404_p1 = scmp.lt.s32.totalorder %s1593_s25, 3 }
   0x4   : > { %p405_p2 = pnand %p1337_p0, %p404_p1 }
   0x5   : > { %p454_p3 = scmp.lt.s32.totalorder (!%p405_p2), %s1333_s26, 1 }
   0x6   : > { %408 = sbr.rel (%p405_p2) target bundleno = 2584 (0xa18), region = 72 }
   0xb   : > { %v1521_v0 = vld [vmem:[%s1908_s5 + $0x8] sm:$0xff]  ;;  %v1520_v2 = vld [vmem:[%s1908_s5] sm:$0xff]  ;;  %s1918_s26 = smov (!%p454_p3, %s1333_s26), 1  ;;  %vm496_vm0 = vcmask 261120   ;;  %vm591_vm1 = vcmask 64512   ;;  %v1527_v21 = vld [vmem:[%s1908_s5 + $0x18] sm:$0xff] }
   0xc   : > { %v1519_v1 = vld [vmem:[%s1906_s3 + $0x8] sm:$0xff]  ;;  %547 = vmatpush.bf16.msra.mxu1 %v1521_v0  ;;  %v1518_v3 = vld [vmem:[%s1906_s3] sm:$0xff]  ;;  %s1689_s18 = sshll.u32 %s1918_s26, 3  ;;  %s465_s16 = scalar_lea.vmem %s1905_s2, %s1918_s26  ;;  %v1526_v22 = vld [vmem:[%s1908_s5 + $0x10] sm:$0xff]  ;;  %vm616_vm2 = vcmask 130048   ;;  %vm813_vm3 = vcmask 1043456  }
   0xd   : > { %506 = vmatpush.bf16.msra.mxu0 %v1519_v1  ;;  %s462_s21 = scalar_lea.vmem %s1904_s1, %s1689_s18  ;;  %s457_s24 = scalar_lea.vmem %s1903_s0, %s1689_s18  ;;  %v1551_v9 = vld [vmem:[%s1909_s6] ss:$0 sm:$0xff]  ;;  %v1523_v19 = vld [vmem:[%s1910_s7 + $0x8] sm:$0xff]  ;;  %v1525_v29 = vld [vmem:[%s1906_s3 + $0x18] sm:$0xff] }
   0xe   : > { %v1699_v4 = vld [vmem:[%s462_s21] sm:$0xff]  ;;  %581 = vmatpush.bf16.msra.mxu2 %v1523_v19  ;;  %v1524_v30 = vld [vmem:[%s1906_s3 + $0x10] sm:$0xff]  ;;  %v1529_v51 = vld [vmem:[%s1910_s7 + $0x18] sm:$0xff]  ;;  %s469_s19 = scalar_lea.vmem %s1916_s13, %s1689_s18 }
   0xf   : > { %v1701_v5 = vld [vmem:[%s457_s24] sm:$0xff]  ;;  %v1528_v52 = vld [vmem:[%s1910_s7 + $0x10] sm:$0xff] }
  0x10   : > { %548 = vmatpush.bf16.msra.mxu1 %v1520_v2  ;;  %v1705_v6 = vpack.c.bf16 %v1701_v5, %v1701_v5  ;;  %v1552_v13 = vld [vmem:[%s1907_s4] ss:$0 sm:$0xff]  ;;  %v1555_v43 = vld [vmem:[%s1909_s6 + $0x1] ss:$0 sm:$0xff] }
  0x11   : > { %507 = vmatpush.bf16.msra.mxu0 %v1518_v3  ;;  %v1522_v20 = vld [vmem:[%s1910_s7] sm:$0xff] }
  0x12   : > { %582 = vmatpush.bf16.msra.mxu2 %v1522_v20  ;;  %v1737_v23 = vld [vmem:[%s465_s16] ss:$0 sm:$0xff]  ;;  %v1556_v57 = vld [vmem:[%s1907_s4 + $0x1] ss:$0 sm:$0xff] }
  0x13   : > { %1363 = vmatmul.msk.bf16.vlgmr.msra.gmra.mxu1 %vm496_vm0, %v1699_v4  ;;  %v1554_v32 = vld [vmem:[%s1911_s8] ss:$0 sm:$0xff]  ;;  %v1557_v1 = vld [vmem:[%s1911_s8 + $0x1] ss:$0 sm:$0xff] }
  0x14   : > { %1350 = vmatmul.msk.bf16.vlgmr.msra.gmra.mxu0 %vm496_vm0, %v1705_v6  ;;  %676 = vmatpush.bf16.msrb.mxu1 %v1525_v29  ;;  %v647_v60 = vld [vmem:[%s1912_s9] sm:$0xf] }
  0x15   : > { %1372 = vmatmul.msk.bf16.vlgmr.msra.gmra.mxu2 %vm496_vm0, %v1699_v4  ;;  %v834_v61 = vsel %vm813_vm3, %v647_v60, 0  ;;  %v1560_v60 = vld [vmem:[%s1911_s8 + $0x2] ss:$0 sm:$0xff] }
  0x16   : > { %711 = vmatpush.bf16.msrb.mxu2 %v1527_v21 }
  0x18   : > { %677 = vmatpush.bf16.msrb.mxu1 %v1524_v30 }
  0x1a   : > { %712 = vmatpush.bf16.msrb.mxu2 %v1526_v22  ;;  %v1533_v22 = vld [vmem:[%s1908_s5 + $0x28] sm:$0xff] }
  0x23   : > { %1388 = vmatmul.msk.bf16.vlgmr.msrb.gmra.mxu1 %vm496_vm0, %v1705_v6 }
  0x25   : > { %1402 = vmatmul.msk.bf16.vlgmr.msrb.gmra.mxu2 %vm496_vm0, %v1699_v4 }
  0x90   : > { %v550_v7 = vpop.f32.mrf.mxu1 }
  0x91   : > { %v509_v8 = vpop.f32.mrf.mxu0  ;;  %v551_v12 = vadd.f32 %v1551_v9, %v550_v7 }
  0x92   : > { %v510_v16 = vadd.f32 %v1552_v13, %v509_v8 }
  0x94   : > { %v589_v18 = vpack.c.bf16 %v510_v16, %v510_v16 }
  0x98   : > { %v552_v10 = vpop.f32.mrf.mxu1  ;;  %v584_v31 = vpop.f32.mrf.mxu2 }
  0x99   : > { %v511_v11 = vpop.f32.mrf.mxu0  ;;  %v553_v14 = vadd.f32 %v1551_v9, %v552_v10  ;;  %v585_v35 = vadd.f32 %v1554_v32, %v584_v31  ;;  %v1419_v31 = vld [vmem:[%s1912_s9 + $0x4] sm:$0xf] }
  0x9b   : > { %v590_v15 = vpack.c.bf16 %v553_v14, %v551_v12 }
  0x9d   : > { %v596_v17 = vsel %vm591_vm1, %v590_v15, 0 }
  0x9e   : > { %605 = vmatpush.bf16.xpose.msra.mxu3 %v596_v17 }
  0xa0   : > { %v586_v37 = vpop.f32.mrf.mxu2  ;;  %v679_v49 = vpop.f32.mrf.mxu1 }
  0xa1   : > { %v587_v38 = vadd.f32 %v1554_v32, %v586_v37  ;;  %v680_v58 = vadd.f32 %v1556_v57, %v679_v49  ;;  %v815_v32 = vsel %vm813_vm3, %v1419_v31, 0  ;;  %v1539_v57 = vld [vmem:[%s1908_s5 + $0x38] sm:$0xff] }
  0xa2   : > { %824 = vmatpush.bf16.msra.mxu2 %v815_v32 }
  0xa3   : > { %v629_v39 = vpack.c.bf16 %v587_v38, %v585_v35  ;;  %v755_v59 = vpack.c.bf16 %v680_v58, %v680_v58  ;;  %v1538_v58 = vld [vmem:[%s1908_s5 + $0x30] sm:$0xff] }
  0xa5   : > { %1373 = vmatmul.msk.bf16.vlgmr.msra.gmra.mxu3 %vm591_vm1, %v589_v18  ;;  %640 = vmatpush.bf16.msrb.mxu0 %v629_v39  ;;  %v1558_v39 = vld [vmem:[%s1909_s6 + $0x2] ss:$0 sm:$0xff] }
  0xa6   : > { %747 = vmatpush.bf16.msrb.mxu3 %v1529_v51  ;;  %v1534_v51 = vld [vmem:[%s1910_s7 + $0x20] sm:$0xff] }
  0xa8   : > { %v714_v42 = vpop.f32.mrf.mxu2  ;;  %v681_v50 = vpop.f32.mrf.mxu1 }
  0xa9   : > { %v715_v44 = vadd.f32 %v1555_v43, %v714_v42  ;;  %v1535_v50 = vld [vmem:[%s1910_s7 + $0x28] sm:$0xff] }
  0xaa   : > { %748 = vmatpush.bf16.msrb.mxu3 %v1528_v52  ;;  %948 = vmatpush.bf16.msrb.mxu2 %v1535_v50 }
  0xae   : > { %843 = vmatpush.bf16.msra.mxu3 %v834_v61  ;;  %949 = vmatpush.bf16.msrb.mxu2 %v1534_v51 }
  0xb0   : > { %v716_v45 = vpop.f32.mrf.mxu2 }
  0xb1   : > { %v717_v46 = vadd.f32 %v1555_v43, %v716_v45  ;;  %v1559_v43 = vld [vmem:[%s1907_s4 + $0x2] ss:$0 sm:$0xff] }
  0xb3   : > { %v756_v47 = vpack.c.bf16 %v717_v46, %v715_v44 }
  0xb5   : > { %v761_v48 = vsel %vm591_vm1, %v756_v47, 0  ;;  %1416 = vmatmul.msk.bf16.vlgmr.msrb.gmra.mxu3 %vm496_vm0, %v1699_v4 }
  0xb6   : > { %770 = vmatpush.bf16.xpose.msra.mxu0 %v761_v48 }
 0x128   : > { %v607_v24 = vpop.f32.mrf.mxu3 }
 0x129   : > { %v611_v25 = vmul.f32 0.35355338, %v607_v24  ;;  %v1532_v24 = vld [vmem:[%s1908_s5 + $0x20] sm:$0xff] }
 0x12b   : > { %v615_v26 = vadd.f32 %v1737_v23, %v611_v25  ;;  %v1531_v25 = vld [vmem:[%s1906_s3 + $0x28] sm:$0xff] }
 0x12d   : > { %v617_v27 = vsel %vm616_vm2, %v615_v26, -inf }
 0x12e   : > { %618 = vmax.xlane.f32.xlu0 %v617_v27 }
 0x130   : > { %v609_v28 = vpop.f32.mrf.mxu3 }
 0x138   : > { %v750_v62 = vpop.f32.mrf.mxu3 }
 0x139   : > { %v751_v2 = vadd.f32 %v1557_v1, %v750_v62 }
 0x140   : > { %v752_v3 = vpop.f32.mrf.mxu3 }
 0x141   : > { %v753_v8 = vadd.f32 %v1557_v1, %v752_v3 }
 0x143   : > { %v790_v9 = vpack.c.bf16 %v753_v8, %v751_v2 }
 0x145   : > { %801 = vmatpush.bf16.msra.mxu1 %v790_v9  ;;  %v1537_v9 = vld [vmem:[%s1906_s3 + $0x38] sm:$0xff] }
 0x149   : > { %912 = vmatpush.bf16.msrb.mxu1 %v1533_v22 }
 0x14d   : > { %913 = vmatpush.bf16.msrb.mxu1 %v1532_v24 }
 0x1a1   : > { %v619_v33 = vpop.xlane.xlu0 %618 }
 0x1a2   : > { %v620_v34 = vsub.f32 %v615_v26, %v619_v33  ;;  %v1530_v26 = vld [vmem:[%s1906_s3 + $0x20] sm:$0xff] }
 0x1a4   : > { %v621_v36 = vmul.f32 1.442695, %v620_v34 }
 0x1a6   : > { %1567 = vpow2.f32 %v621_v36 }
 0x1ac   : > { %v1568_v40 = vpop.eup %1567 }
 0x1ad   : > { %v623_v41 = vsel %vm616_vm2, %v1568_v40, 0.0 }
 0x1ae   : > { %624 = vadd.xlane.f32.xlu0 %v623_v41 }
 0x221   : > { %v625_v53 = vpop.xlane.xlu0 %624 }
 0x222   : > { %1569 = vrcp.f32 %v625_v53 }
 0x228   : > { %v1570_v54 = vpop.eup %1569 }
 0x229   : > { %v627_v55 = vmul.f32 %v1570_v54, %v1568_v40 }
 0x22b   : > { %v628_v56 = vpack.c.bf16 %v627_v55, %v627_v55 }
 0x22d   : > { %1374 = vmatmul.msk.bf16.vlgmr.msrb.gmra.mxu0 %vm616_vm2, %v628_v56 }
 0x22e   : > { %877 = vmatpush.bf16.msrb.mxu0 %v1531_v25 }
 0x232   : > { %878 = vmatpush.bf16.msrb.mxu0 %v1530_v26 }
 0x23d   : > { %1417 = vmatmul.msk.bf16.vlgmr.msra.gmra.mxu0 %vm591_vm1, %v755_v59 }
 0x24d   : > { %1435 = vmatmul.msk.bf16.vlgmr.msrb.gmra.mxu0 %vm496_vm0, %v1705_v6 }
 0x2aa   : > { %v642_v63 = vpop.f32.mrf.mxu0 }
 0x2ab   : > { %v646_v0 = vpack.c.bf16 %v642_v63, %v642_v63 }
 0x2ad   : > { %1421 = vmatmul.msk.bf16.vlgmr.msra.gmra.mxu3 %vm591_vm1, %v646_v0 }
 0x2b2   : > { %v644_v7 = vpop.f32.mrf.mxu0 }
 0x2ba   : > { %v772_v10 = vpop.f32.mrf.mxu0 }
 0x2bb   : > { %v776_v11 = vmul.f32 0.35355338, %v772_v10  ;;  %v1536_v10 = vld [vmem:[%s1906_s3 + $0x30] sm:$0xff] }
 0x2bd   : > { %v777_v12 = vadd.f32 %v1737_v23, %v776_v11  ;;  %v1466_v11 = vld [vmem:[%s1912_s9 + $0x8] sm:$0xf] }
 0x2bf   : > { %v778_v13 = vsel %vm616_vm2, %v777_v12, -inf }
 0x2c0   : > { %779 = vmax.xlane.f32.xlu1 %v778_v13 }
 0x2c2   : > { %v774_v14 = vpop.f32.mrf.mxu0 }
 0x2ca   : > { %v880_v33 = vpop.f32.mrf.mxu0 }
 0x2cb   : > { %v881_v46 = vadd.f32 %v1559_v43, %v880_v33  ;;  %v1541_v33 = vld [vmem:[%s1910_s7 + $0x38] sm:$0xff] }
 0x2cd   : > { %v956_v47 = vpack.c.bf16 %v881_v46, %v881_v46 }
 0x2d2   : > { %v882_v35 = vpop.f32.mrf.mxu0 }
 0x330   : > { %v1782_v15 = vpop.f32.mrf.mxu3 }
 0x333   : > { %v780_v16 = vpop.xlane.xlu1 %779 }
 0x334   : > { %v781_v17 = vsub.f32 %v777_v12, %v780_v16  ;;  %v1015_v12 = vsel %vm813_vm3, %v1466_v11, 0 }
 0x336   : > { %v782_v18 = vmul.f32 1.442695, %v781_v17 }
 0x338   : > { %1571 = vpow2.f32 %v782_v18  ;;  %v847_v19 = vpop.f32.mrf.mxu3 }
 0x339   : > { %v1561_v19 = vld [vmem:[%s1909_s6 + $0x3] ss:$0 sm:$0xff] }
 0x33e   : > { %v1572_v20 = vpop.eup %1571 }
 0x33f   : > { %v784_v21 = vsel %vm616_vm2, %v1572_v20, 0.0 }
 0x340   : > { %785 = vadd.xlane.f32.xlu1 %v784_v21 }
 0x3b3   : > { %v786_v27 = vpop.xlane.xlu1 %785 }
 0x3b4   : > { %1573 = vrcp.f32 %v786_v27 }
 0x3ba   : > { %v1574_v28 = vpop.eup %1573 }
 0x3bb   : > { %v788_v29 = vmul.f32 %v1574_v28, %v1572_v20 }
 0x3bd   : > { %v789_v30 = vpack.c.bf16 %v788_v29, %v788_v29  ;;  %v1562_v29 = vld [vmem:[%s1907_s4 + $0x3] ss:$0 sm:$0xff] }
 0x3bf   : > { %1418 = vmatmul.msk.bf16.vlgmr.msra.gmra.mxu1 %vm616_vm2, %v789_v30 }
 0x3c0   : > { %1024 = vmatpush.bf16.msra.mxu1 %v1015_v12 }
 0x3cf   : > { %1449 = vmatmul.msk.bf16.vlgmr.msrb.gmra.mxu1 %vm496_vm0, %v1699_v4 }
 0x43c   : > { %v803_v34 = vpop.f32.mrf.mxu1 }
 0x43d   : > { %v807_v36 = vpack.c.bf16 %v803_v34, %v803_v34  ;;  %v1540_v34 = vld [vmem:[%s1910_s7 + $0x30] sm:$0xff] }
 0x43f   : > { %1420 = vmatmul.msk.bf16.vlgmr.msra.gmra.mxu2 %vm591_vm1, %v807_v36 }
 0x440   : > { %1059 = vmatpush.bf16.msra.mxu2 %v1537_v9 }
 0x444   : > { %v805_v37 = vpop.f32.mrf.mxu1  ;;  %1060 = vmatpush.bf16.msra.mxu2 %v1536_v10 }
 0x44c   : > { %v915_v38 = vpop.f32.mrf.mxu1 }
 0x44d   : > { %v916_v41 = vadd.f32 %v1558_v39, %v915_v38 }
 0x44f   : > { %1463 = vmatmul.msk.bf16.vlgmr.msrb.gmra.mxu2 %vm496_vm0, %v1699_v4 }
 0x454   : > { %v917_v40 = vpop.f32.mrf.mxu1 }
 0x455   : > { %v918_v42 = vadd.f32 %v1558_v39, %v917_v40 }
 0x457   : > { %v957_v44 = vpack.c.bf16 %v918_v42, %v916_v41 }
 0x459   : > { %v962_v45 = vsel %vm591_vm1, %v957_v44, 0 }
 0x45a   : > { %971 = vmatpush.bf16.xpose.msrb.mxu3 %v962_v45  ;;  %v1563_v45 = vld [vmem:[%s1911_s8 + $0x3] ss:$0 sm:$0xff] }
 0x45f   : > { %1481 = vmatmul.msk.bf16.vlgmr.msra.gmra.mxu2 %vm496_vm0, %v1705_v6 }
 0x461   : > { %1464 = vmatmul.msk.bf16.vlgmr.msrb.gmra.mxu3 %vm591_vm1, %v956_v47 }
 0x462   : > { %1094 = vmatpush.bf16.msra.mxu3 %v1539_v57 }
 0x466   : > { %1095 = vmatpush.bf16.msra.mxu3 %v1538_v58 }
 0x471   : > { %1495 = vmatmul.msk.bf16.vlgmr.msra.gmra.mxu3 %vm496_vm0, %v1699_v4 }
 0x4c2   : > { %v1815_v48 = vpop.f32.mrf.mxu2 }
 0x4c3   : > { %v846_v35 = vadd.f32 %v1782_v15, %v1815_v48 }
 0x4ca   : > { %v828_v49 = vpop.f32.mrf.mxu2 }
 0x4d2   : > { %v951_v59 = vpop.f32.mrf.mxu2 }
 0x4d3   : > { %v952_v63 = vadd.f32 %v1560_v60, %v951_v59 }
 0x4da   : > { %v953_v1 = vpop.f32.mrf.mxu2 }
 0x4db   : > { %v954_v2 = vadd.f32 %v1560_v60, %v953_v1 }
 0x4dd   : > { %v991_v3 = vpack.c.bf16 %v954_v2, %v952_v63 }
 0x4df   : > { %1002 = vmatpush.bf16.msra.mxu0 %v991_v3 }
 0x4e2   : > { %v1062_v25 = vpop.f32.mrf.mxu2 }
 0x4e3   : > { %v1063_v31 = vadd.f32 %v1562_v29, %v1062_v25  ;;  %1130 = vmatpush.bf16.msrb.mxu0 %v1541_v33 }
 0x4e4   : > { %v973_v52 = vpop.f32.mrf.mxu3 }
 0x4e5   : > { %v977_v53 = vmul.f32 0.35355338, %v973_v52  ;;  %v1138_v32 = vpack.c.bf16 %v1063_v31, %v1063_v31  ;;  %v1512_v52 = vld [vmem:[%s1912_s9 + $0xc] sm:$0xf] }
 0x4e7   : > { %v978_v54 = vadd.f32 %v1737_v23, %v977_v53  ;;  %1131 = vmatpush.bf16.msrb.mxu0 %v1540_v34  ;;  %v1197_v53 = vsel %vm813_vm3, %v1512_v52, 0 }
 0x4e8   : > { %1206 = vmatpush.bf16.msrb.mxu3 %v1197_v53 }
 0x4e9   : > { %v979_v55 = vsel %vm616_vm2, %v978_v54, -inf }
 0x4ea   : > { %980 = vmax.xlane.f32.xlu2 %v979_v55  ;;  %v1064_v26 = vpop.f32.mrf.mxu2 }
 0x4ec   : > { %v975_v56 = vpop.f32.mrf.mxu3 }
 0x4f4   : > { %v1097_v18 = vpop.f32.mrf.mxu3 }
 0x4f5   : > { %v1098_v20 = vadd.f32 %v1561_v19, %v1097_v18 }
 0x4fc   : > { %v1099_v6 = vpop.f32.mrf.mxu3 }
 0x4fd   : > { %v1100_v21 = vadd.f32 %v1561_v19, %v1099_v6 }
 0x4ff   : > { %v1139_v22 = vpack.c.bf16 %v1100_v21, %v1098_v20 }
 0x501   : > { %v1144_v24 = vsel %vm591_vm1, %v1139_v22, 0 }
 0x502   : > { %1153 = vmatpush.bf16.xpose.msrb.mxu1 %v1144_v24 }
 0x55d   : > { %v981_v61 = vpop.xlane.xlu2 %980 }
 0x55e   : > { %v982_v62 = vsub.f32 %v978_v54, %v981_v61  ;;  %v1564_v61 = vld [vmem:[%s1913_s10] ss:$0 sm:$0xff] }
 0x560   : > { %v983_v0 = vmul.f32 1.442695, %v982_v62 }
 0x562   : > { %1575 = vpow2.f32 %v983_v0 }
 0x568   : > { %v1576_v7 = vpop.eup %1575 }
 0x569   : > { %v985_v8 = vsel %vm616_vm2, %v1576_v7, 0.0 }
 0x56a   : > { %986 = vadd.xlane.f32.xlu2 %v985_v8 }
 0x5dd   : > { %v987_v13 = vpop.xlane.xlu2 %986 }
 0x5de   : > { %1577 = vrcp.f32 %v987_v13 }
 0x5e4   : > { %v1578_v14 = vpop.eup %1577 }
 0x5e5   : > { %v989_v16 = vmul.f32 %v1578_v14, %v1576_v7  ;;  %v1595_v7 = vmov 32.0  }
 0x5e7   : > { %v990_v17 = vpack.c.bf16 %v989_v16, %v989_v16 }
 0x5e9   : > { %1465 = vmatmul.msk.bf16.vlgmr.msra.gmra.mxu0 %vm616_vm2, %v990_v17 }
 0x5f9   : > { %1509 = vmatmul.msk.bf16.vlgmr.msrb.gmra.mxu0 %vm496_vm0, %v1699_v4 }
 0x666   : > { %v1004_v27 = vpop.f32.mrf.mxu0 }
 0x667   : > { %v1008_v28 = vpack.c.bf16 %v1004_v27, %v1004_v27 }
 0x669   : > { %1467 = vmatmul.msk.bf16.vlgmr.msra.gmra.mxu1 %vm591_vm1, %v1008_v28  ;;  %v1565_v28 = vld [vmem:[%s1914_s11] ss:$0 sm:$0xff] }
 0x66e   : > { %v1006_v30 = vpop.f32.mrf.mxu0 }
 0x66f   : > { %v1566_v30 = vld [vmem:[%s1915_s12] ss:$0 sm:$0xff] }
 0x676   : > { %v1133_v44 = vpop.f32.mrf.mxu0 }
 0x677   : > { %v1134_v15 = vadd.f32 %v1563_v45, %v1133_v44 }
 0x679   : > { %1510 = vmatmul.msk.bf16.vlgmr.msrb.gmra.mxu1 %vm591_vm1, %v1138_v32 }
 0x67e   : > { %v1135_v46 = vpop.f32.mrf.mxu0 }
 0x67f   : > { %v1136_v47 = vadd.f32 %v1563_v45, %v1135_v46 }
 0x681   : > { %v1173_v49 = vpack.c.bf16 %v1136_v47, %v1134_v15 }
 0x683   : > { %1184 = vmatpush.bf16.msrb.mxu2 %v1173_v49 }
 0x6e6   : > { %v1026_v36 = vpop.f32.mrf.mxu1 }
 0x6e7   : > { %v1030_v37 = vadd.f32 %v1026_v36, %v846_v35 }
 0x6ee   : > { %v1028_v38 = vpop.f32.mrf.mxu1 }
 0x6f6   : > { %v1155_v39 = vpop.f32.mrf.mxu1 }
 0x6f7   : > { %v1159_v40 = vmul.f32 0.35355338, %v1155_v39 }
 0x6f9   : > { %v1160_v41 = vadd.f32 %v1737_v23, %v1159_v40 }
 0x6fb   : > { %v1161_v42 = vsel %vm616_vm2, %v1160_v41, -inf }
 0x6fc   : > { %1162 = vmax.xlane.f32.xlu0 %v1161_v42 }
 0x6fe   : > { %v1157_v43 = vpop.f32.mrf.mxu1 }
 0x76f   : > { %v1163_v48 = vpop.xlane.xlu0 %1162 }
 0x770   : > { %v1164_v4 = vsub.f32 %v1160_v41, %v1163_v48 }
 0x772   : > { %v1165_v50 = vmul.f32 1.442695, %v1164_v4 }
 0x774   : > { %1579 = vpow2.f32 %v1165_v50 }
 0x77a   : > { %v1580_v51 = vpop.eup %1579 }
 0x77b   : > { %v1167_v23 = vsel %vm616_vm2, %v1580_v51, 0.0 }
 0x77c   : > { %1168 = vadd.xlane.f32.xlu1 %v1167_v23 }
 0x7ef   : > { %v1169_v54 = vpop.xlane.xlu1 %1168 }
 0x7f0   : > { %1581 = vrcp.f32 %v1169_v54 }
 0x7f1   : > { %1583 = vrcp.f32 %v1595_v7 }
 0x7f6   : > { %v1582_v55 = vpop.eup %1581 }
 0x7f7   : > { %v1171_v56 = vmul.f32 %v1582_v55, %v1580_v51  ;;  %v1584_v8 = vpop.eup %1583 }
 0x7f8   : > { %v1225_v9 = vmul.f32 32.0, %v1584_v8  ;;  %vm1229_vm4 = vweird.f32 %v1584_v8 }
 0x7f9   : > { %v1172_v57 = vpack.c.bf16 %v1171_v56, %v1171_v56 }
 0x7fa   : > { %v1226_v10 = vsub.f32 1.0, %v1225_v9 }
 0x7fb   : > { %1511 = vmatmul.msk.bf16.vlgmr.msrb.gmra.mxu2 %vm616_vm2, %v1172_v57 }
 0x7fc   : > { %v1227_v11 = vmul.f32 %v1584_v8, %v1226_v10 }
 0x7fe   : > { %v1228_v12 = vadd.f32 %v1584_v8, %v1227_v11 }
 0x800   : > { %v1230_v13 = vsel %vm1229_vm4, %v1584_v8, %v1228_v12 }
 0x87e   : > { %v1186_v58 = vpop.f32.mrf.mxu2 }
 0x87f   : > { %v1190_v59 = vpack.c.bf16 %v1186_v58, %v1186_v58 }
 0x881   : > { %1513 = vmatmul.msk.bf16.vlgmr.msrb.gmra.mxu3 %vm591_vm1, %v1190_v59 }
 0x886   : > { %v1188_v60 = vpop.f32.mrf.mxu2 }
 0x904   : > { %v1208_v62 = vpop.f32.mrf.mxu3 }
 0x905   : > { %v1212_v63 = vadd.f32 %v1208_v62, %v1030_v37 }
 0x907   : > { %v1217_v0 = vadd.f32 %v1564_v61, %v1212_v63 }
 0x909   : > { %v1218_v1 = vadd.f32 %v1217_v0, %v1701_v5 }
 0x90b   : > { %v1221_v2 = vsel %vm496_vm0, %v1218_v1, 0.0 }
 0x90c   : > { %1222 = vadd.xlane.f32.xlu2 %v1221_v2  ;;  %v1210_v3 = vpop.f32.mrf.mxu3 }
 0x97f   : > { %v1223_v14 = vpop.xlane.xlu2 %1222 }
 0x980   : > { %v1231_v16 = vmul.f32 %v1230_v13, %v1223_v14 }
 0x982   : > { %v1232_v17 = vsub.f32 %v1218_v1, %v1231_v16 }
 0x984   : > { %v1233_v18 = vmul.f32 %v1232_v17, %v1232_v17 }
 0x986   : > { %v1234_v19 = vsel %vm496_vm0, %v1233_v18, 0.0 }
 0x987   : > { %1235 = vadd.xlane.f32.xlu0 %v1234_v19 }
 0x9fa   : > { %v1236_v5 = vpop.xlane.xlu0 %1235 }
 0x9fb   : > { %v1237_v6 = vmul.f32 %v1236_v5, %v1230_v13 }
 0x9fd   : > { %v1238_v20 = vadd.f32 1e-05, %v1237_v6 }
 0x9ff   : > { %1585 = vrsqrt.f32 %v1238_v20  ;;  %vm1245_vm6 = vweird.f32 %v1238_v20 }
 0xa05   : > { %v1586_v21 = vpop.eup %1585 }
 0xa06   : > { %v1240_v22 = vmul.f32 %v1586_v21, %v1238_v20  ;;  %vm1246_vm5 = vweird.f32 %v1586_v21 }
 0xa07   : > { %vm1247_vm7 = vmor %vm1245_vm6, %vm1246_vm5 }
 0xa08   : > { %v1241_v24 = vmul.f32 %v1586_v21, %v1240_v22 }
 0xa0a   : > { %v1242_v25 = vmul.f32 0.5, %v1241_v24 }
 0xa0c   : > { %v1243_v26 = vsub.f32 1.5, %v1242_v25 }
 0xa0e   : > { %v1244_v27 = vmul.f32 %v1586_v21, %v1243_v26 }
 0xa10   : > { %v1248_v29 = vsel %vm1247_vm7, %v1586_v21, %v1244_v27 }
 0xa11   : > { %v1249_v31 = vmul.f32 %v1248_v29, %v1232_v17 }
 0xa13   : > { %v1253_v32 = vmul.f32 %v1565_v28, %v1249_v31 }
 0xa15   : > { %v1257_v33 = vadd.f32 %v1566_v30, %v1253_v32 }
 0xa17   : > { %1258 = vst.msk [vmem:[%s469_s19] sm:$0xff] %vm496_vm0, %v1257_v33 }
 0xa18 PF: > { %s23_s25 = sadd.s32 1, %s1593_s25  }
 0xa19   : > { %p20_p4 = scmp.ge.s32.totalorder %s23_s25, 4  }
 0xa1b   :  { %22 = sbr.rel (!%p20_p4) target bundleno = 1 (0x1), region = 129 }

// kernel: context_knowledge_decoder.6
= control target key start
LH: loop header
LB: loop body
LE: loop exit
PB: predicated region body
PF: predicated region fallthrough
CT: control target
= control target key end

     0   :  { %s1535_s17 = smov 0   ;;  %s1766_s0 = inlined_call_operand.vmem [shape: f32[2,8,32], index: 0, kind: input, shape index: {}]   ;;  %s1767_s1 = inlined_call_operand.vmem [shape: bf16[4,32,8], index: 1, kind: input, shape index: {}]   ;;  %s1768_s2 = inlined_call_operand.vmem [shape: f32[4,1,8], index: 2, kind: input, shape index: {}]   ;;  %s1769_s3 = inlined_call_operand.vmem [shape: bf16[4,32,8], index: 3, kind: input, shape index: {}]   ;;  %s1770_s4 = inlined_call_operand.vmem [shape: f32[4,1,8], index: 4, kind: input, shape index: {}]   ;;  %s1771_s5 = inlined_call_operand.vmem [shape: bf16[4,32,8], index: 5, kind: input, shape index: {}]   ;;  %s1772_s6 = inlined_call_operand.vmem [shape: f32[4,1,8], index: 6, kind: input, shape index: {}]   ;;  %s1773_s7 = inlined_call_operand.vmem [shape: bf16[4,8,32], index: 7, kind: input, shape index: {}]   ;;  %s1774_s8 = inlined_call_operand.vmem [shape: f32[1,32], index: 8, kind: input, shape index: {}]   ;;  %s1775_s9 = inlined_call_operand.vmem [shape: f32[1,32], index: 9, kind: input, shape index: {}]   ;;  %s1776_s10 = inlined_call_operand.vmem [shape: f32[1,32], index: 10, kind: input, shape index: {}]   ;;  %s1777_s11 = inlined_call_operand.vmem [shape: f32[2,8,32], index: 11, kind: output, shape index: {}]  }
   0x1 LB: > { %s1219_s18 = sadd.s32 4294967295, %s1471_s17   ;;  %p1223_p0 = scmp.ge.s32.totalorder %s1471_s17, 1  ;;  %s1471_s17 = sphi %s1535_s17, %s21_s17  }
   0x2   : > { %p336_p1 = scmp.lt.s32.totalorder %s1471_s17, 3 }
   0x4   : > { %p337_p2 = pnand %p1223_p0, %p336_p1 }
   0x5   : > { %p374_p3 = scmp.lt.s32.totalorder (!%p337_p2), %s1219_s18, 1 }
   0x6   : > { %340 = sbr.rel (%p337_p2) target bundleno = 2569 (0xa09), region = 64 }
   0xb   : > { %v1397_v0 = vld [vmem:[%s1767_s1 + $0x8] sm:$0xff]  ;;  %v1396_v2 = vld [vmem:[%s1767_s1] sm:$0xff]  ;;  %s1779_s18 = smov (!%p374_p3, %s1219_s18), 1  ;;  %vm411_vm0 = vcmask 261120   ;;  %vm496_vm1 = vcmask 64512   ;;  %v1405_v19 = vld [vmem:[%s1769_s3 + $0x18] sm:$0xff]  ;;  %v385_v20 = vlaneseq }
   0xc   : > { %v1399_v1 = vld [vmem:[%s1769_s3 + $0x8] sm:$0xff]  ;;  %421 = vmatpush.bf16.msra.mxu0 %v1397_v0  ;;  %v1398_v3 = vld [vmem:[%s1769_s3] sm:$0xff]  ;;  %s1224_s27 = sshll.u32 %s1779_s18, 3  ;;  %v1473_v24 = vmov -1e+09   ;;  %v1404_v30 = vld [vmem:[%s1769_s3 + $0x10] sm:$0xff] }
   0xd   : > { %454 = vmatpush.bf16.msra.mxu1 %v1399_v1  ;;  %s377_s30 = scalar_lea.vmem %s1766_s0, %s1224_s27  ;;  %v1431_v6 = vld [vmem:[%s1770_s4] ss:$0 sm:$0xff]  ;;  %v1401_v17 = vld [vmem:[%s1771_s5 + $0x8] sm:$0xff]  ;;  %v386_v21 = vshrl.u32 %v385_v20, 7  ;;  %v388_v22 = vand.u32 127, %v385_v20  ;;  %v1403_v31 = vld [vmem:[%s1767_s1 + $0x18] sm:$0xff]  ;;  %s381_s12 = scalar_lea.vmem %s1777_s11, %s1224_s27 }
   0xe   : > { %v1563_v4 = vld [vmem:[%s377_s30] sm:$0xff]  ;;  %487 = vmatpush.bf16.msra.mxu2 %v1401_v17  ;;  %v1402_v32 = vld [vmem:[%s1767_s1 + $0x10] sm:$0xff]  ;;  %vm534_vm3 = vcmask 1043456   ;;  %v1407_v52 = vld [vmem:[%s1771_s5 + $0x18] sm:$0xff] }
   0xf   : > { %v1567_v5 = vpack.c.bf16 %v1563_v4, %v1563_v4  ;;  %v1430_v9 = vld [vmem:[%s1768_s2] ss:$0 sm:$0xff]  ;;  %vm389_vm2 = vcmp.ge.s32.totalorder %v386_v21, %v388_v22  ;;  %v1433_v45 = vld [vmem:[%s1770_s4 + $0x1] ss:$0 sm:$0xff]  ;;  %v1406_v53 = vld [vmem:[%s1771_s5 + $0x10] sm:$0xff] }
  0x10   : > { %422 = vmatpush.bf16.msra.mxu0 %v1396_v2  ;;  %v1400_v18 = vld [vmem:[%s1771_s5] sm:$0xff]  ;;  %v1592_v25 = vsel %vm389_vm2, 0.0, %v1473_v24  ;;  %v1411_v22 = vld [vmem:[%s1769_s3 + $0x28] sm:$0xff] }
  0x11   : > { %455 = vmatpush.bf16.msra.mxu1 %v1398_v3  ;;  %v1432_v40 = vld [vmem:[%s1772_s6] ss:$0 sm:$0xff]  ;;  %v1434_v58 = vld [vmem:[%s1768_s2 + $0x1] ss:$0 sm:$0xff]  ;;  %v1409_v24 = vld [vmem:[%s1767_s1 + $0x28] sm:$0xff] }
  0x12   : > { %488 = vmatpush.bf16.msra.mxu2 %v1400_v18  ;;  %v552_v61 = vld [vmem:[%s1773_s7] sm:$0xf] }
  0x13   : > { %1234 = vmatmul.msk.bf16.vlgmr.msra.gmra.mxu0 %vm411_vm0, %v1567_v5  ;;  %v739_v62 = vsel %vm534_vm3, %v552_v61, 0  ;;  %v1435_v63 = vld [vmem:[%s1772_s6 + $0x1] ss:$0 sm:$0xff] }
  0x14   : > { %1243 = vmatmul.msk.bf16.vlgmr.msra.gmra.mxu1 %vm411_vm0, %v1567_v5 }
  0x15   : > { %1252 = vmatmul.msk.bf16.vlgmr.msra.gmra.mxu2 %vm411_vm0, %v1567_v5  ;;  %581 = vmatpush.bf16.msrb.mxu1 %v1403_v31  ;;  %v1299_v31 = vld [vmem:[%s1773_s7 + $0x4] sm:$0xf] }
  0x16   : > { %616 = vmatpush.bf16.msrb.mxu2 %v1405_v19 }
  0x19   : > { %582 = vmatpush.bf16.msrb.mxu1 %v1402_v32  ;;  %v720_v32 = vsel %vm534_vm3, %v1299_v31, 0  ;;  %v1419_v31 = vld [vmem:[%s1771_s5 + $0x38] sm:$0xff] }
  0x1a   : > { %617 = vmatpush.bf16.msrb.mxu2 %v1404_v30 }
  0x1e   : > { %729 = vmatpush.bf16.msra.mxu2 %v720_v32  ;;  %v1418_v32 = vld [vmem:[%s1771_s5 + $0x30] sm:$0xff] }
  0x24   : > { %1268 = vmatmul.msk.bf16.vlgmr.msrb.gmra.mxu1 %vm411_vm0, %v1567_v5 }
  0x25   : > { %1282 = vmatmul.msk.bf16.vlgmr.msrb.gmra.mxu2 %vm411_vm0, %v1567_v5 }
  0x90   : > { %v424_v7 = vpop.f32.mrf.mxu0 }
  0x91   : > { %v457_v8 = vpop.f32.mrf.mxu1  ;;  %v425_v12 = vadd.f32 %v1430_v9, %v424_v7 }
  0x92   : > { %v458_v10 = vadd.f32 %v1431_v6, %v457_v8 }
  0x93   : > { %v494_v16 = vpack.c.bf16 %v425_v12, %v425_v12 }
  0x94   : > { %v495_v11 = vpack.c.bf16 %v458_v10, %v458_v10 }
  0x96   : > { %v501_v13 = vsel %vm496_vm1, %v495_v11, 0 }
  0x97   : > { %510 = vmatpush.bf16.xpose.msra.mxu3 %v501_v13 }
  0x98   : > { %v426_v14 = vpop.f32.mrf.mxu0  ;;  %v490_v33 = vpop.f32.mrf.mxu2 }
  0x99   : > { %v459_v15 = vpop.f32.mrf.mxu1  ;;  %v491_v41 = vadd.f32 %v1432_v40, %v490_v33 }
  0x9b   : > { %v530_v42 = vpack.c.bf16 %v491_v41, %v491_v41  ;;  %v1437_v41 = vld [vmem:[%s1768_s2 + $0x2] ss:$0 sm:$0xff] }
  0x9d   : > { %v536_v43 = vsel %vm534_vm3, %v530_v42, 0 }
  0x9e   : > { %1253 = vmatmul.msk.bf16.vlgmr.msra.gmra.mxu3 %vm496_vm1, %v494_v16  ;;  %545 = vmatpush.bf16.msrb.mxu0 %v536_v43 }
  0x9f   : > { %651 = vmatpush.bf16.msrb.mxu3 %v1407_v52 }
  0xa0   : > { %v492_v37 = vpop.f32.mrf.mxu2 }
  0xa1   : > { %v584_v49 = vpop.f32.mrf.mxu1 }
  0xa2   : > { %v585_v59 = vadd.f32 %v1434_v58, %v584_v49  ;;  %v1412_v49 = vld [vmem:[%s1771_s5 + $0x20] sm:$0xff] }
  0xa3   : > { %652 = vmatpush.bf16.msrb.mxu3 %v1406_v53 }
  0xa4   : > { %v658_v60 = vpack.c.bf16 %v585_v59, %v585_v59 }
  0xa7   : > { %748 = vmatpush.bf16.msra.mxu3 %v739_v62 }
  0xa8   : > { %v619_v44 = vpop.f32.mrf.mxu2 }
  0xa9   : > { %v620_v46 = vadd.f32 %v1433_v45, %v619_v44  ;;  %v586_v51 = vpop.f32.mrf.mxu1 }
  0xab   : > { %v659_v47 = vpack.c.bf16 %v620_v46, %v620_v46 }
  0xad   : > { %v664_v48 = vsel %vm496_vm1, %v659_v47, 0 }
  0xae   : > { %673 = vmatpush.bf16.xpose.msra.mxu0 %v664_v48  ;;  %1296 = vmatmul.msk.bf16.vlgmr.msrb.gmra.mxu3 %vm411_vm0, %v1567_v5  ;;  %v1413_v48 = vld [vmem:[%s1771_s5 + $0x28] sm:$0xff] }
  0xaf   : > { %852 = vmatpush.bf16.msrb.mxu2 %v1413_v48 }
  0xb0   : > { %v621_v50 = vpop.f32.mrf.mxu2 }
  0xb3   : > { %853 = vmatpush.bf16.msrb.mxu2 %v1412_v49 }
 0x121   : > { %v512_v23 = vpop.f32.mrf.mxu3 }
 0x122   : > { %v516_v26 = vmul.f32 0.35355338, %v512_v23  ;;  %v1410_v23 = vld [vmem:[%s1769_s3 + $0x20] sm:$0xff] }
 0x124   : > { %v517_v27 = vadd.f32 %v516_v26, %v1592_v25  ;;  %v1408_v26 = vld [vmem:[%s1767_s1 + $0x20] sm:$0xff] }
 0x126   : > { %v518_v28 = vsel %vm496_vm1, %v517_v27, -inf }
 0x127   : > { %519 = vmax.xlane.f32.xlu0 %v518_v28 }
 0x129   : > { %v514_v29 = vpop.f32.mrf.mxu3 }
 0x131   : > { %v654_v0 = vpop.f32.mrf.mxu3 }
 0x132   : > { %v655_v2 = vadd.f32 %v1435_v63, %v654_v0 }
 0x134   : > { %v693_v6 = vpack.c.bf16 %v655_v2, %v655_v2 }
 0x136   : > { %v698_v7 = vsel %vm534_vm3, %v693_v6, 0  ;;  %v1416_v6 = vld [vmem:[%s1769_s3 + $0x30] sm:$0xff] }
 0x137   : > { %707 = vmatpush.bf16.msra.mxu1 %v698_v7  ;;  %v1415_v7 = vld [vmem:[%s1767_s1 + $0x38] sm:$0xff] }
 0x139   : > { %v656_v8 = vpop.f32.mrf.mxu3 }
 0x13a   : > { %v1414_v8 = vld [vmem:[%s1767_s1 + $0x30] sm:$0xff] }
 0x13b   : > { %817 = vmatpush.bf16.msrb.mxu1 %v1411_v22 }
 0x13f   : > { %818 = vmatpush.bf16.msrb.mxu1 %v1410_v23 }
 0x19a   : > { %v520_v34 = vpop.xlane.xlu0 %519 }
 0x19b   : > { %v521_v35 = vsub.f32 %v517_v27, %v520_v34 }
 0x19d   : > { %v522_v36 = vmul.f32 1.442695, %v521_v35 }
 0x19f   : > { %1445 = vpow2.f32 %v522_v36 }
 0x1a5   : > { %v1446_v38 = vpop.eup %1445 }
 0x1a6   : > { %v524_v39 = vsel %vm496_vm1, %v1446_v38, 0.0 }
 0x1a7   : > { %525 = vadd.xlane.f32.xlu0 %v524_v39 }
 0x21a   : > { %v526_v54 = vpop.xlane.xlu0 %525 }
 0x21b   : > { %1447 = vrcp.f32 %v526_v54 }
 0x221   : > { %v1448_v55 = vpop.eup %1447 }
 0x222   : > { %v528_v56 = vmul.f32 %v1448_v55, %v1446_v38  ;;  %v1436_v38 = vld [vmem:[%s1770_s4 + $0x2] ss:$0 sm:$0xff] }
 0x224   : > { %v529_v57 = vpack.c.bf16 %v528_v56, %v528_v56  ;;  %v1417_v56 = vld [vmem:[%s1769_s3 + $0x38] sm:$0xff] }
 0x226   : > { %1254 = vmatmul.msk.bf16.vlgmr.msrb.gmra.mxu0 %vm496_vm1, %v529_v57  ;;  %v1438_v57 = vld [vmem:[%s1772_s6 + $0x2] ss:$0 sm:$0xff] }
 0x227   : > { %782 = vmatpush.bf16.msrb.mxu0 %v1409_v24 }
 0x22b   : > { %783 = vmatpush.bf16.msrb.mxu0 %v1408_v26 }
 0x236   : > { %1297 = vmatmul.msk.bf16.vlgmr.msra.gmra.mxu0 %vm496_vm1, %v658_v60 }
 0x246   : > { %1315 = vmatmul.msk.bf16.vlgmr.msrb.gmra.mxu0 %vm411_vm0, %v1567_v5 }
 0x2a3   : > { %v547_v1 = vpop.f32.mrf.mxu0 }
 0x2a4   : > { %v551_v3 = vpack.c.bf16 %v547_v1, %v547_v1 }
 0x2a6   : > { %1301 = vmatmul.msk.bf16.vlgmr.msra.gmra.mxu3 %vm496_vm1, %v551_v3 }
 0x2ab   : > { %v549_v9 = vpop.f32.mrf.mxu0 }
 0x2ac   : > { %v1346_v9 = vld [vmem:[%s1773_s7 + $0x8] sm:$0xf] }
 0x2b3   : > { %v675_v10 = vpop.f32.mrf.mxu0 }
 0x2b4   : > { %v679_v11 = vmul.f32 0.35355338, %v675_v10  ;;  %v921_v10 = vsel %vm534_vm3, %v1346_v9, 0 }
 0x2b6   : > { %v680_v12 = vadd.f32 %v679_v11, %v1592_v25 }
 0x2b8   : > { %v681_v13 = vsel %vm496_vm1, %v680_v12, -inf }
 0x2b9   : > { %682 = vmax.xlane.f32.xlu1 %v681_v13 }
 0x2bb   : > { %v677_v14 = vpop.f32.mrf.mxu0 }
 0x2c3   : > { %v785_v33 = vpop.f32.mrf.mxu0 }
 0x2c4   : > { %v786_v44 = vadd.f32 %v1437_v41, %v785_v33 }
 0x2c6   : > { %v859_v46 = vpack.c.bf16 %v786_v44, %v786_v44 }
 0x2cb   : > { %v787_v34 = vpop.f32.mrf.mxu0 }
 0x329   : > { %v1642_v15 = vpop.f32.mrf.mxu3 }
 0x32c   : > { %v683_v16 = vpop.xlane.xlu1 %682 }
 0x32d   : > { %v684_v17 = vsub.f32 %v680_v12, %v683_v16  ;;  %v1439_v16 = vld [vmem:[%s1770_s4 + $0x3] ss:$0 sm:$0xff] }
 0x32f   : > { %v685_v18 = vmul.f32 1.442695, %v684_v17 }
 0x331   : > { %1449 = vpow2.f32 %v685_v18  ;;  %v752_v19 = vpop.f32.mrf.mxu3 }
 0x337   : > { %v1450_v20 = vpop.eup %1449 }
 0x338   : > { %v687_v21 = vsel %vm496_vm1, %v1450_v20, 0.0 }
 0x339   : > { %688 = vadd.xlane.f32.xlu1 %v687_v21 }
 0x3ac   : > { %v689_v27 = vpop.xlane.xlu1 %688 }
 0x3ad   : > { %1451 = vrcp.f32 %v689_v27  ;;  %v1440_v27 = vld [vmem:[%s1768_s2 + $0x3] ss:$0 sm:$0xff] }
 0x3b3   : > { %v1452_v28 = vpop.eup %1451 }
 0x3b4   : > { %v691_v29 = vmul.f32 %v1452_v28, %v1450_v20 }
 0x3b6   : > { %v692_v30 = vpack.c.bf16 %v691_v29, %v691_v29 }
 0x3b8   : > { %1298 = vmatmul.msk.bf16.vlgmr.msra.gmra.mxu1 %vm496_vm1, %v692_v30 }
 0x3b9   : > { %930 = vmatpush.bf16.msra.mxu1 %v921_v10 }
 0x3c8   : > { %1329 = vmatmul.msk.bf16.vlgmr.msrb.gmra.mxu1 %vm411_vm0, %v1567_v5 }
 0x435   : > { %v709_v35 = vpop.f32.mrf.mxu1 }
 0x436   : > { %v713_v36 = vpack.c.bf16 %v709_v35, %v709_v35 }
 0x438   : > { %1300 = vmatmul.msk.bf16.vlgmr.msra.gmra.mxu2 %vm496_vm1, %v713_v36 }
 0x439   : > { %965 = vmatpush.bf16.msra.mxu2 %v1415_v7 }
 0x43d   : > { %v711_v37 = vpop.f32.mrf.mxu1  ;;  %966 = vmatpush.bf16.msra.mxu2 %v1414_v8 }
 0x445   : > { %v820_v39 = vpop.f32.mrf.mxu1 }
 0x446   : > { %v821_v40 = vadd.f32 %v1436_v38, %v820_v39 }
 0x448   : > { %v860_v42 = vpack.c.bf16 %v821_v40, %v821_v40  ;;  %1343 = vmatmul.msk.bf16.vlgmr.msrb.gmra.mxu2 %vm411_vm0, %v1567_v5 }
 0x44a   : > { %v865_v43 = vsel %vm496_vm1, %v860_v42, 0  ;;  %v1441_v42 = vld [vmem:[%s1772_s6 + $0x3] ss:$0 sm:$0xff] }
 0x44b   : > { %874 = vmatpush.bf16.xpose.msrb.mxu3 %v865_v43 }
 0x44d   : > { %v822_v45 = vpop.f32.mrf.mxu1 }
 0x452   : > { %1344 = vmatmul.msk.bf16.vlgmr.msrb.gmra.mxu3 %vm496_vm1, %v859_v46 }
 0x453   : > { %1000 = vmatpush.bf16.msra.mxu3 %v1417_v56 }
 0x457   : > { %1001 = vmatpush.bf16.msra.mxu3 %v1416_v6 }
 0x458   : > { %1361 = vmatmul.msk.bf16.vlgmr.msra.gmra.mxu2 %vm411_vm0, %v1567_v5 }
 0x462   : > { %1375 = vmatmul.msk.bf16.vlgmr.msra.gmra.mxu3 %vm411_vm0, %v1567_v5 }
 0x4bb   : > { %v1675_v47 = vpop.f32.mrf.mxu2 }
 0x4bc   : > { %v751_v33 = vadd.f32 %v1642_v15, %v1675_v47 }
 0x4c3   : > { %v733_v50 = vpop.f32.mrf.mxu2 }
 0x4c4   : > { %v1392_v50 = vld [vmem:[%s1773_s7 + $0xc] sm:$0xf] }
 0x4cb   : > { %v855_v58 = vpop.f32.mrf.mxu2 }
 0x4cc   : > { %v856_v59 = vadd.f32 %v1438_v57, %v855_v58 }
 0x4ce   : > { %v894_v60 = vpack.c.bf16 %v856_v59, %v856_v59  ;;  %v1442_v59 = vld [vmem:[%s1774_s8] ss:$0 sm:$0xff] }
 0x4d0   : > { %v899_v62 = vsel %vm534_vm3, %v894_v60, 0 }
 0x4d1   : > { %908 = vmatpush.bf16.msra.mxu0 %v899_v62 }
 0x4d3   : > { %v857_v1 = vpop.f32.mrf.mxu2 }
 0x4d5   : > { %v876_v51 = vpop.f32.mrf.mxu3  ;;  %1035 = vmatpush.bf16.msrb.mxu0 %v1419_v31 }
 0x4d6   : > { %v880_v52 = vmul.f32 0.35355338, %v876_v51  ;;  %v1104_v51 = vsel %vm534_vm3, %v1392_v50, 0 }
 0x4d7   : > { %1113 = vmatpush.bf16.msrb.mxu3 %v1104_v51 }
 0x4d8   : > { %v881_v53 = vadd.f32 %v880_v52, %v1592_v25 }
 0x4d9   : > { %1036 = vmatpush.bf16.msrb.mxu0 %v1418_v32 }
 0x4da   : > { %v882_v54 = vsel %vm496_vm1, %v881_v53, -inf }
 0x4db   : > { %883 = vmax.xlane.f32.xlu2 %v882_v54  ;;  %v968_v22 = vpop.f32.mrf.mxu2 }
 0x4dc   : > { %v969_v29 = vadd.f32 %v1440_v27, %v968_v22 }
 0x4dd   : > { %v878_v55 = vpop.f32.mrf.mxu3 }
 0x4de   : > { %v1042_v30 = vpack.c.bf16 %v969_v29, %v969_v29 }
 0x4e3   : > { %v970_v23 = vpop.f32.mrf.mxu2 }
 0x4e5   : > { %v1003_v17 = vpop.f32.mrf.mxu3 }
 0x4e6   : > { %v1004_v18 = vadd.f32 %v1439_v16, %v1003_v17 }
 0x4e8   : > { %v1043_v19 = vpack.c.bf16 %v1004_v18, %v1004_v18 }
 0x4ea   : > { %v1048_v20 = vsel %vm496_vm1, %v1043_v19, 0 }
 0x4eb   : > { %1057 = vmatpush.bf16.xpose.msrb.mxu1 %v1048_v20 }
 0x4ed   : > { %v1005_v21 = vpop.f32.mrf.mxu3 }
 0x54e   : > { %v884_v61 = vpop.xlane.xlu2 %883 }
 0x54f   : > { %v885_v63 = vsub.f32 %v881_v53, %v884_v61 }
 0x551   : > { %v886_v0 = vmul.f32 1.442695, %v885_v63 }
 0x553   : > { %1453 = vpow2.f32 %v886_v0 }
 0x559   : > { %v1454_v2 = vpop.eup %1453 }
 0x55a   : > { %v888_v3 = vsel %vm496_vm1, %v1454_v2, 0.0 }
 0x55b   : > { %889 = vadd.xlane.f32.xlu2 %v888_v3 }
 0x5ce   : > { %v890_v11 = vpop.xlane.xlu2 %889 }
 0x5cf   : > { %1455 = vrcp.f32 %v890_v11 }
 0x5d5   : > { %v1456_v12 = vpop.eup %1455 }
 0x5d6   : > { %v892_v13 = vmul.f32 %v1456_v12, %v1454_v2  ;;  %v1474_v2 = vmov 32.0  }
 0x5d8   : > { %v893_v14 = vpack.c.bf16 %v892_v13, %v892_v13 }
 0x5da   : > { %1345 = vmatmul.msk.bf16.vlgmr.msra.gmra.mxu0 %vm496_vm1, %v893_v14 }
 0x5ea   : > { %1389 = vmatmul.msk.bf16.vlgmr.msrb.gmra.mxu0 %vm411_vm0, %v1567_v5 }
 0x657   : > { %v910_v24 = vpop.f32.mrf.mxu0 }
 0x658   : > { %v914_v26 = vpack.c.bf16 %v910_v24, %v910_v24 }
 0x65a   : > { %1347 = vmatmul.msk.bf16.vlgmr.msra.gmra.mxu1 %vm496_vm1, %v914_v26  ;;  %v1443_v26 = vld [vmem:[%s1775_s9] ss:$0 sm:$0xff] }
 0x65f   : > { %v912_v28 = vpop.f32.mrf.mxu0 }
 0x660   : > { %v1444_v28 = vld [vmem:[%s1776_s10] ss:$0 sm:$0xff] }
 0x667   : > { %v1038_v43 = vpop.f32.mrf.mxu0 }
 0x668   : > { %v1039_v15 = vadd.f32 %v1441_v42, %v1038_v43 }
 0x66a   : > { %1390 = vmatmul.msk.bf16.vlgmr.msrb.gmra.mxu1 %vm496_vm1, %v1042_v30  ;;  %v1077_v44 = vpack.c.bf16 %v1039_v15, %v1039_v15 }
 0x66c   : > { %v1082_v45 = vsel %vm534_vm3, %v1077_v44, 0 }
 0x66d   : > { %1091 = vmatpush.bf16.msrb.mxu2 %v1082_v45 }
 0x66f   : > { %v1040_v5 = vpop.f32.mrf.mxu0 }
 0x6d7   : > { %v932_v34 = vpop.f32.mrf.mxu1 }
 0x6d8   : > { %v936_v35 = vadd.f32 %v932_v34, %v751_v33 }
 0x6df   : > { %v934_v36 = vpop.f32.mrf.mxu1 }
 0x6e7   : > { %v1059_v37 = vpop.f32.mrf.mxu1 }
 0x6e8   : > { %v1063_v38 = vmul.f32 0.35355338, %v1059_v37 }
 0x6ea   : > { %v1064_v39 = vadd.f32 %v1063_v38, %v1592_v25 }
 0x6ec   : > { %v1065_v40 = vsel %vm496_vm1, %v1064_v39, -inf }
 0x6ed   : > { %1066 = vmax.xlane.f32.xlu0 %v1065_v40 }
 0x6ef   : > { %v1061_v41 = vpop.f32.mrf.mxu1 }
 0x760   : > { %v1067_v46 = vpop.xlane.xlu0 %1066 }
 0x761   : > { %v1068_v47 = vsub.f32 %v1064_v39, %v1067_v46 }
 0x763   : > { %v1069_v48 = vmul.f32 1.442695, %v1068_v47 }
 0x765   : > { %1457 = vpow2.f32 %v1069_v48 }
 0x76b   : > { %v1458_v25 = vpop.eup %1457 }
 0x76c   : > { %v1071_v49 = vsel %vm496_vm1, %v1458_v25, 0.0 }
 0x76d   : > { %1072 = vadd.xlane.f32.xlu1 %v1071_v49 }
 0x7e0   : > { %v1073_v52 = vpop.xlane.xlu1 %1072 }
 0x7e1   : > { %1459 = vrcp.f32 %v1073_v52 }
 0x7e2   : > { %1461 = vrcp.f32 %v1474_v2 }
 0x7e7   : > { %v1460_v53 = vpop.eup %1459 }
 0x7e8   : > { %v1075_v54 = vmul.f32 %v1460_v53, %v1458_v25  ;;  %v1462_v3 = vpop.eup %1461 }
 0x7e9   : > { %v1132_v6 = vmul.f32 32.0, %v1462_v3  ;;  %vm1136_vm4 = vweird.f32 %v1462_v3 }
 0x7ea   : > { %v1076_v55 = vpack.c.bf16 %v1075_v54, %v1075_v54 }
 0x7eb   : > { %v1133_v7 = vsub.f32 1.0, %v1132_v6 }
 0x7ec   : > { %1391 = vmatmul.msk.bf16.vlgmr.msrb.gmra.mxu2 %vm496_vm1, %v1076_v55 }
 0x7ed   : > { %v1134_v8 = vmul.f32 %v1462_v3, %v1133_v7 }
 0x7ef   : > { %v1135_v9 = vadd.f32 %v1462_v3, %v1134_v8 }
 0x7f1   : > { %v1137_v10 = vsel %vm1136_vm4, %v1462_v3, %v1135_v9 }
 0x86f   : > { %v1093_v56 = vpop.f32.mrf.mxu2 }
 0x870   : > { %v1097_v57 = vpack.c.bf16 %v1093_v56, %v1093_v56 }
 0x872   : > { %1393 = vmatmul.msk.bf16.vlgmr.msrb.gmra.mxu3 %vm496_vm1, %v1097_v57 }
 0x877   : > { %v1095_v58 = vpop.f32.mrf.mxu2 }
 0x8f5   : > { %v1115_v60 = vpop.f32.mrf.mxu3 }
 0x8f6   : > { %v1119_v61 = vadd.f32 %v1115_v60, %v936_v35 }
 0x8f8   : > { %v1124_v62 = vadd.f32 %v1442_v59, %v1119_v61 }
 0x8fa   : > { %v1125_v63 = vadd.f32 %v1124_v62, %v1563_v4 }
 0x8fc   : > { %v1128_v0 = vsel %vm411_vm0, %v1125_v63, 0.0 }
 0x8fd   : > { %1129 = vadd.xlane.f32.xlu2 %v1128_v0  ;;  %v1117_v1 = vpop.f32.mrf.mxu3 }
 0x970   : > { %v1130_v11 = vpop.xlane.xlu2 %1129 }
 0x971   : > { %v1138_v12 = vmul.f32 %v1137_v10, %v1130_v11 }
 0x973   : > { %v1139_v13 = vsub.f32 %v1125_v63, %v1138_v12 }
 0x975   : > { %v1140_v14 = vmul.f32 %v1139_v13, %v1139_v13 }
 0x977   : > { %v1141_v16 = vsel %vm411_vm0, %v1140_v14, 0.0 }
 0x978   : > { %1142 = vadd.xlane.f32.xlu0 %v1141_v16 }
 0x9eb   : > { %v1143_v4 = vpop.xlane.xlu0 %1142 }
 0x9ec   : > { %v1144_v17 = vmul.f32 %v1143_v4, %v1137_v10 }
 0x9ee   : > { %v1145_v18 = vadd.f32 1e-05, %v1144_v17 }
 0x9f0   : > { %1463 = vrsqrt.f32 %v1145_v18  ;;  %vm1152_vm6 = vweird.f32 %v1145_v18 }
 0x9f6   : > { %v1464_v19 = vpop.eup %1463 }
 0x9f7   : > { %v1147_v20 = vmul.f32 %v1464_v19, %v1145_v18  ;;  %vm1153_vm5 = vweird.f32 %v1464_v19 }
 0x9f8   : > { %vm1154_vm7 = vmor %vm1152_vm6, %vm1153_vm5 }
 0x9f9   : > { %v1148_v21 = vmul.f32 %v1464_v19, %v1147_v20 }
 0x9fb   : > { %v1149_v22 = vmul.f32 0.5, %v1148_v21 }
 0x9fd   : > { %v1150_v23 = vsub.f32 1.5, %v1149_v22 }
 0x9ff   : > { %v1151_v24 = vmul.f32 %v1464_v19, %v1150_v23 }
 0xa01   : > { %v1155_v27 = vsel %vm1154_vm7, %v1464_v19, %v1151_v24 }
 0xa02   : > { %v1156_v29 = vmul.f32 %v1155_v27, %v1139_v13 }
 0xa04   : > { %v1160_v30 = vmul.f32 %v1443_v26, %v1156_v29 }
 0xa06   : > { %v1164_v31 = vadd.f32 %v1444_v28, %v1160_v30 }
 0xa08   : > { %1165 = vst.msk [vmem:[%s381_s12] sm:$0xff] %vm411_vm0, %v1164_v31 }
 0xa09 PF: > { %s21_s17 = sadd.s32 1, %s1471_s17  }
 0xa0a   : > { %p18_p4 = scmp.ge.s32.totalorder %s21_s17, 4  }
 0xa0c   :  { %20 = sbr.rel (!%p18_p4) target bundleno = 1 (0x1), region = 115 }

</bundles_post_ra>
